<compile_context>
chip_gen: v7x
topology: tpu7x:2x2x1
jax: 0.10.0
libtpu: 0.0.40
codegen_flags: <defaults>
</compile_context>

<pallas_src>
import functools

import jax
import jax.numpy as jnp
from jax import lax
from jax.experimental import pallas as pl
from jax.experimental.pallas import tpu as pltpu


def _round_up(x, m):
    return (x + m - 1) // m * m


# ---------------------------------------------------------------------------
# Pallas kernel 1: tiled matmul + bias (+ReLU), bf16 MXU inputs, f32 accumulator
# ---------------------------------------------------------------------------
def _matmul_bias_kernel(a_ref, b_ref, bias_ref, o_ref, acc_ref, *, activation):
    k = pl.program_id(2)

    @pl.when(k == 0)
    def _():
        acc_ref[...] = jnp.zeros_like(acc_ref)

    acc_ref[...] += jnp.dot(a_ref[...], b_ref[...],
                            preferred_element_type=jnp.float32)

    @pl.when(k == pl.num_programs(2) - 1)
    def _():
        out = acc_ref[...] + bias_ref[...]        # f32 epilogue (safe on v5e too)
        if activation == "relu":
            out = jnp.maximum(out, 0.0)
        o_ref[...] = out.astype(o_ref.dtype)


def _pick_tile(dim, cap):
    """Full extent if it fits (block == full dim, no padding), else aligned cap."""
    if dim <= cap:
        return dim, dim
    return cap, _round_up(dim, cap)


def matmul_bias(a, b, bias, activation=None):
    """(M,K) @ (K,N) + bias[N] (optional ReLU). bf16 MXU inputs, f32 accumulate."""
    M, K = a.shape
    K2, N = b.shape
    assert K == K2
    # Tile caps: at these problem sizes everything fits in a single block
    # (grid == (1,1,1), no pad/slice copies, no pipeline overhead); for larger
    # shapes the 512/512/256 tiles double-buffer to ~3 MiB of VMEM.
    tm, Mp = _pick_tile(M, 512)
    tk, Kp = _pick_tile(K, 512)
    tn, Np = _pick_tile(N, 256)

    a16 = a.astype(jnp.bfloat16)
    b16 = b.astype(jnp.bfloat16)
    bias_f = bias.astype(jnp.float32).reshape(1, N)
    if (Mp, Kp) != (M, K):
        a16 = jnp.pad(a16, ((0, Mp - M), (0, Kp - K)))
    if (Kp, Np) != (K, N):
        b16 = jnp.pad(b16, ((0, Kp - K), (0, Np - N)))
    if Np != N:
        bias_f = jnp.pad(bias_f, ((0, 0), (0, Np - N)))

    grid = (Mp // tm, Np // tn, Kp // tk)
    out = pl.pallas_call(
        functools.partial(_matmul_bias_kernel, activation=activation),
        out_shape=jax.ShapeDtypeStruct((Mp, Np), jnp.float32),
        grid_spec=pltpu.PrefetchScalarGridSpec(
            num_scalar_prefetch=0,
            grid=grid,
            in_specs=[
                pl.BlockSpec((tm, tk), lambda i, j, k: (i, k)),
                pl.BlockSpec((tk, tn), lambda i, j, k: (k, j)),
                pl.BlockSpec((1, tn), lambda i, j, k: (0, j)),  # bias resident over k
            ],
            out_specs=pl.BlockSpec((tm, tn), lambda i, j, k: (i, j)),
            scratch_shapes=[pltpu.VMEM((tm, tn), jnp.float32)],
        ),
        compiler_params=pltpu.CompilerParams(
            dimension_semantics=("parallel", "parallel", "arbitrary")),
    )(a16, b16, bias_f)
    if (Mp, Np) != (M, N):
        out = out[:M, :N]
    return out


# ---------------------------------------------------------------------------
# Pallas kernel 2: whole bidirectional LSTM recurrence in one pallas_call
#   grid = (direction [parallel], time [arbitrary])
#   h/c live in VMEM scratch; W_hh^T (H, 4H) resident in VMEM per direction;
#   one fused (B,H)x(H,4H) gate matmul per step; gate order i,f,g,o (PyTorch).
# ---------------------------------------------------------------------------
def _bilstm_rec_kernel(xp_ref, whh_ref, hs_ref, h_ref, c_ref, *, hidden):
    t = pl.program_id(1)

    @pl.when(t == 0)
    def _():
        h_ref[...] = jnp.zeros_like(h_ref)
        c_ref[...] = jnp.zeros_like(c_ref)

    H = hidden
    h = h_ref[...]                                   # (B, H)
    xp = xp_ref[0, 0]                                # (B, 4H) input proj (+b_ih+b_hh)
    gates = xp + jnp.dot(h, whh_ref[0],              # single fused 4-gate matmul
                         preferred_element_type=jnp.float32)
    i = jax.nn.sigmoid(gates[:, 0:H])
    f = jax.nn.sigmoid(gates[:, H:2 * H])
    g = jnp.tanh(gates[:, 2 * H:3 * H])
    o = jax.nn.sigmoid(gates[:, 3 * H:4 * H])
    c_new = f * c_ref[...] + i * g
    h_new = o * jnp.tanh(c_new)
    c_ref[...] = c_new
    h_ref[...] = h_new
    hs_ref[...] = h_new.reshape(hs_ref.shape)


def lstm_recurrent(xp_stacked, whh_stacked):
    """xp_stacked: (2, T, B, 4H) per-direction input projections (incl. biases).
       whh_stacked: (2, H, 4H) per-direction W_hh^T.  Returns hs: (2, T, B, H)."""
    _, T, B, G = xp_stacked.shape
    H = G // 4

    def time_map(d, t):
        # direction 0: forward order t; direction 1: reversed order T-1-t
        return (d, d * (T - 1) + (1 - 2 * d) * t, 0, 0)

    return pl.pallas_call(
        functools.partial(_bilstm_rec_kernel, hidden=H),
        out_shape=jax.ShapeDtypeStruct((2, T, B, H), jnp.float32),
        grid_spec=pltpu.PrefetchScalarGridSpec(
            num_scalar_prefetch=0,
            grid=(2, T),
            in_specs=[
                pl.BlockSpec((1, 1, B, G), time_map),
                pl.BlockSpec((1, H, G), lambda d, t: (d, 0, 0)),  # W_hh resident over t
            ],
            out_specs=pl.BlockSpec((1, 1, B, H), time_map),
            scratch_shapes=[pltpu.VMEM((B, H), jnp.float32),      # h
                            pltpu.VMEM((B, H), jnp.float32)],     # c
        ),
        compiler_params=pltpu.CompilerParams(
            dimension_semantics=("parallel", "arbitrary")),
    )(xp_stacked, whh_stacked)


# ---------------------------------------------------------------------------
# Building blocks (glue in XLA, heavy math in the Pallas kernels above)
# ---------------------------------------------------------------------------
def conv2d_relu(x_nhwc, w, b, stride, padding, relu=True):
    """NHWC conv: lax patch extraction + Pallas matmul (bias + ReLU fused)."""
    B = x_nhwc.shape[0]
    Cout, Cin, kh, kw = w.shape
    patches = lax.conv_general_dilated_patches(
        x_nhwc, (kh, kw), stride,
        [(padding[0], padding[0]), (padding[1], padding[1])],
        dimension_numbers=("NHWC", "HWIO", "NHWC"))
    _, Ho, Wo, CK = patches.shape                    # CK = Cin*kh*kw, channel-major
    wmat = w.reshape(Cout, CK).T                     # (Cin*kh*kw, Cout), channel-major
    out = matmul_bias(patches.reshape(B * Ho * Wo, CK), wmat, b,
                      activation="relu" if relu else None)
    return out.reshape(B, Ho, Wo, Cout)


def bidirectional_lstm(x_btd, p):
    """PyTorch BidirectionalLSTM: bi-LSTM (batch_first) + Linear(2H -> H)."""
    B, T, D = x_btd.shape
    H = p["w_hh_f"].shape[1]
    x2d = x_btd.reshape(B * T, D)

    # One fused input projection for BOTH directions: (B*T, D) @ (D, 8H)
    w_ih = jnp.concatenate([p["w_ih_f"].T, p["w_ih_b"].T], axis=1)         # (D, 8H)
    b_in = jnp.concatenate([p["b_ih_f"] + p["b_hh_f"],
                            p["b_ih_b"] + p["b_hh_b"]])                    # (8H,)
    xp = matmul_bias(x2d, w_ih, b_in)                                      # (B*T, 8H)
    xp = xp.reshape(B, T, 2, 4 * H).transpose(2, 1, 0, 3)                  # (2, T, B, 4H)

    whh = jnp.stack([p["w_hh_f"].T, p["w_hh_b"].T], axis=0)                # (2, H, 4H)

    hs = lstm_recurrent(xp, whh)                                           # (2, T, B, H)
    rec = hs.transpose(2, 1, 0, 3).reshape(B * T, 2 * H)                   # [fwd | bwd]

    out = matmul_bias(rec, p["w_lin"].T, p["b_lin"])                       # (B*T, H)
    return out.reshape(B, T, H)


# ---------------------------------------------------------------------------
# Visual_Encoder
# ---------------------------------------------------------------------------
def init_params(key, opt):
    ks = list(jax.random.split(key, 32))
    ctr = [0]

    def nrm(shape, scale=0.1):
        k = ks[ctr[0]]
        ctr[0] += 1
        return scale * jax.random.normal(k, shape, jnp.float32)

    H = opt["hidden_size"]
    Cin, Cout = opt["input_channel"], opt["output_channel"]
    C1, C2 = 16, 32
    W_feat = opt["imgW"] // 4 + 1
    T_out = opt["src_batch_max_length"] + 1

    def lstm_params(in_dim):
        return {
            "w_ih_f": nrm((4 * H, in_dim)), "w_hh_f": nrm((4 * H, H)),
            "b_ih_f": nrm((4 * H,)), "b_hh_f": nrm((4 * H,)),
            "w_ih_b": nrm((4 * H, in_dim)), "w_hh_b": nrm((4 * H, H)),
            "b_ih_b": nrm((4 * H,)), "b_hh_b": nrm((4 * H,)),
            "w_lin": nrm((H, 2 * H)), "b_lin": nrm((H,)),
        }

    return {
        "conv1_w": nrm((C1, Cin, 3, 3)), "conv1_b": nrm((C1,)),
        "conv2_w": nrm((C2, C1, 3, 3)), "conv2_b": nrm((C2,)),
        "conv3_w": nrm((Cout, C2, 3, 3)), "conv3_b": nrm((Cout,)),
        "mfd_w": nrm((T_out, W_feat)), "mfd_b": nrm((T_out,)),   # make_feature_dim
        "lstm1": lstm_params(Cout),
        "lstm2": lstm_params(H),
    }


def visual_encoder_forward(params, x, text=None, tgt_mask=None, is_train=True, *, opt):
    del text, tgt_mask, is_train          # unused by the PyTorch forward as well
    # 1. Transformation stage: opt.Transformation != 'TPS' -> module is None -> skip.
    # 2. Feature extraction: compact ResNet-style stack -> (B, Cout, imgH/4, imgW/4+1)
    f = x.transpose(0, 2, 3, 1)           # NCHW -> NHWC once
    f = conv2d_relu(f, params["conv1_w"], params["conv1_b"], (1, 1), (1, 1))
    f = conv2d_relu(f, params["conv2_w"], params["conv2_b"], (2, 2), (1, 1))
    f = conv2d_relu(f, params["conv3_w"], params["conv3_b"], (2, 2), (1, 2))
    B, Hc, Wc, C = f.shape

    # AdaptiveAvgPool2d((None, 1)) on permute(0,3,1,2) + squeeze(3) == mean over H
    vf = jnp.mean(f, axis=1)                                    # (B, W', C)
    assert vf.ndim == 3

    T_out = opt["src_batch_max_length"] + 1
    if Wc != T_out:   # make_feature_dim: Linear(imgW/4+1 -> src_batch_max_length+1)
        v = vf.transpose(0, 2, 1).reshape(B * C, Wc)            # (B*C, W')
        v = matmul_bias(v, params["mfd_w"].T, params["mfd_b"])  # (B*C, T)
        vf = v.reshape(B, C, T_out).transpose(0, 2, 1)          # (B, T, C)

    # cv_bi_lstm: two stacked BidirectionalLSTM blocks
    vf = bidirectional_lstm(vf, params["lstm1"])
    vf = bidirectional_lstm(vf, params["lstm2"])
    return vf                                                   # (B, T, hidden_size)


if __name__ == "__main__":
    opt = dict(Transformation="None", num_fiducial=20,
               imgH=16, imgW=16, input_channel=4, output_channel=64,
               hidden_size=32, src_batch_max_length=7)

    key = jax.random.PRNGKey(0)
    kp, kx = jax.random.split(key)
    params = init_params(kp, opt)
    x = jax.random.normal(
        kx, (2, opt["input_channel"], opt["imgH"], opt["imgW"]), jnp.float32)

    fwd = jax.jit(functools.partial(visual_encoder_forward, opt=opt))
    out = jax.block_until_ready(fwd(params, x))
    assert out.shape == (2, opt["src_batch_max_length"] + 1, opt["hidden_size"])
    assert bool(jnp.all(jnp.isfinite(out)))
    print("KERNEL_OK")
</pallas_src>

<mosaic_0001>
module attributes {stable_mosaic.version = 11 : i64} {
  func.func @_matmul_bias_kernel(%arg0: i32, %arg1: i32, %arg2: i32, %arg3: memref<512x36xbf16, #tpu.memory_space<vmem>>, %arg4: memref<36x16xbf16, #tpu.memory_space<vmem>>, %arg5: memref<1x16xf32, #tpu.memory_space<vmem>>, %arg6: memref<512x16xf32, #tpu.memory_space<vmem>>, %arg7: memref<512x16xf32, #tpu.memory_space<vmem>>) attributes {dimension_semantics = [#tpu.dimension_semantics<parallel>, #tpu.dimension_semantics<parallel>, #tpu.dimension_semantics<arbitrary>], iteration_bounds = array<i64: 1, 1, 1>, scalar_prefetch = 0 : i64, scratch_operands = 1 : i64, tpu.core_type = #tpu.core_type<tc>, window_params = [{transform_indices = @transform_0, window_bounds = array<i64: 512, 36>}, {transform_indices = @transform_1, window_bounds = array<i64: 36, 16>}, {transform_indices = @transform_2, window_bounds = array<i64: 1, 16>}, {transform_indices = @transform_3, window_bounds = array<i64: 512, 16>}]} {
    %c0_i32 = arith.constant 0 : i32
    %0 = arith.cmpi eq, %arg2, %c0_i32 : i32
    %1 = arith.extui %0 : i1 to i32
    %c0_i32_0 = arith.constant 0 : i32
    %2 = arith.cmpi ne, %1, %c0_i32_0 : i32
    scf.if %2 {
      %cst_10 = arith.constant 0.000000e+00 : f32
      %12 = vector.broadcast %cst_10 : f32 to vector<512x16xf32>
      %c0_11 = arith.constant 0 : index
      %c0_12 = arith.constant 0 : index
      %13 = vector.load %arg7[%c0_11, %c0_12] : memref<512x16xf32, #tpu.memory_space<vmem>>, vector<512x16xf32>
      tpu.vector_store %arg7[%c0_11, %c0_12], %12 {strides = array<i32>} : memref<512x16xf32, #tpu.memory_space<vmem>>, vector<512x16xf32>,
    } else {
    }
    %c0 = arith.constant 0 : index
    %c0_1 = arith.constant 0 : index
    %3 = vector.load %arg7[%c0, %c0_1] : memref<512x16xf32, #tpu.memory_space<vmem>>, vector<512x16xf32>
    %c0_2 = arith.constant 0 : index
    %c0_3 = arith.constant 0 : index
    %4 = vector.load %arg3[%c0_2, %c0_3] : memref<512x36xbf16, #tpu.memory_space<vmem>>, vector<512x36xbf16>
    %c0_4 = arith.constant 0 : index
    %c0_5 = arith.constant 0 : index
    %5 = vector.load %arg4[%c0_4, %c0_5] : memref<36x16xbf16, #tpu.memory_space<vmem>>, vector<36x16xbf16>
    %cst = arith.constant dense<0.000000e+00> : vector<512x16xf32>
    %6 = tpu.matmul %4, %5, %cst {dimension_numbers = #tpu.dot_dimension_numbers<[1], [0], [0], [1], [0, 0, 1, 1], [], []>} : vector<512x36xbf16>, vector<36x16xbf16>, vector<512x16xf32> -> vector<512x16xf32>
    %7 = arith.addf %3, %6 : vector<512x16xf32>
    %c0_6 = arith.constant 0 : index
    %c0_7 = arith.constant 0 : index
    %8 = vector.load %arg7[%c0_6, %c0_7] : memref<512x16xf32, #tpu.memory_space<vmem>>, vector<512x16xf32>
    tpu.vector_store %arg7[%c0_6, %c0_7], %7 {strides = array<i32>} : memref<512x16xf32, #tpu.memory_space<vmem>>, vector<512x16xf32>,
    %c0_i32_8 = arith.constant 0 : i32
    %9 = arith.cmpi eq, %arg2, %c0_i32_8 : i32
    %10 = arith.extui %9 : i1 to i32
    %c0_i32_9 = arith.constant 0 : i32
    %11 = arith.cmpi ne, %10, %c0_i32_9 : i32
    scf.if %11 {
      %c0_10 = arith.constant 0 : index
      %c0_11 = arith.constant 0 : index
      %12 = vector.load %arg7[%c0_10, %c0_11] : memref<512x16xf32, #tpu.memory_space<vmem>>, vector<512x16xf32>
      %c0_12 = arith.constant 0 : index
      %c0_13 = arith.constant 0 : index
      %13 = vector.load %arg5[%c0_12, %c0_13] : memref<1x16xf32, #tpu.memory_space<vmem>>, vector<1x16xf32>
      %14 = vector.broadcast %13 : vector<1x16xf32> to vector<512x16xf32>
      %15 = arith.addf %12, %14 : vector<512x16xf32>
      %cst_14 = arith.constant 0.000000e+00 : f32
      %16 = vector.broadcast %cst_14 : f32 to vector<512x16xf32>
      %17 = arith.maximumf %15, %16 : vector<512x16xf32>
      %c0_15 = arith.constant 0 : index
      %c0_16 = arith.constant 0 : index
      %18 = vector.load %arg6[%c0_15, %c0_16] : memref<512x16xf32, #tpu.memory_space<vmem>>, vector<512x16xf32>
      tpu.vector_store %arg6[%c0_15, %c0_16], %17 {strides = array<i32>} : memref<512x16xf32, #tpu.memory_space<vmem>>, vector<512x16xf32>,
    } else {
    }
    return
  }
  func.func @transform_0(%arg0: i32, %arg1: i32, %arg2: i32) -> (i32, i32) {
    %c0_i32 = arith.constant 0 : i32
    return %arg0, %arg2 : i32, i32
  }
  func.func @transform_1(%arg0: i32, %arg1: i32, %arg2: i32) -> (i32, i32) {
    %c0_i32 = arith.constant 0 : i32
    return %arg2, %arg1 : i32, i32
  }
  func.func @transform_2(%arg0: i32, %arg1: i32, %arg2: i32) -> (i32, i32) {
    %c0_i32 = arith.constant 0 : i32
    %c0_i32_0 = arith.constant 0 : i32
    return %c0_i32, %arg1 : i32, i32
  }
  func.func @transform_3(%arg0: i32, %arg1: i32, %arg2: i32) -> (i32, i32) {
    %c0_i32 = arith.constant 0 : i32
    return %arg0, %arg1 : i32, i32
  }
}

module attributes {stable_mosaic.version = 11 : i64} {
  func.func @_matmul_bias_kernel(%arg0: i32, %arg1: i32, %arg2: i32, %arg3: memref<128x144xbf16, #tpu.memory_space<vmem>>, %arg4: memref<144x32xbf16, #tpu.memory_space<vmem>>, %arg5: memref<1x32xf32, #tpu.memory_space<vmem>>, %arg6: memref<128x32xf32, #tpu.memory_space<vmem>>, %arg7: memref<128x32xf32, #tpu.memory_space<vmem>>) attributes {dimension_semantics = [#tpu.dimension_semantics<parallel>, #tpu.dimension_semantics<parallel>, #tpu.dimension_semantics<arbitrary>], iteration_bounds = array<i64: 1, 1, 1>, scalar_prefetch = 0 : i64, scratch_operands = 1 : i64, tpu.core_type = #tpu.core_type<tc>, window_params = [{transform_indices = @transform_0, window_bounds = array<i64: 128, 144>}, {transform_indices = @transform_1, window_bounds = array<i64: 144, 32>}, {transform_indices = @transform_2, window_bounds = array<i64: 1, 32>}, {transform_indices = @transform_3, window_bounds = array<i64: 128, 32>}]} {
    %c0_i32 = arith.constant 0 : i32
    %0 = arith.cmpi eq, %arg2, %c0_i32 : i32
    %1 = arith.extui %0 : i1 to i32
    %c0_i32_0 = arith.constant 0 : i32
    %2 = arith.cmpi ne, %1, %c0_i32_0 : i32
    scf.if %2 {
      %cst_10 = arith.constant 0.000000e+00 : f32
      %12 = vector.broadcast %cst_10 : f32 to vector<128x32xf32>
      %c0_11 = arith.constant 0 : index
      %c0_12 = arith.constant 0 : index
      %13 = vector.load %arg7[%c0_11, %c0_12] : memref<128x32xf32, #tpu.memory_space<vmem>>, vector<128x32xf32>
      tpu.vector_store %arg7[%c0_11, %c0_12], %12 {strides = array<i32>} : memref<128x32xf32, #tpu.memory_space<vmem>>, vector<128x32xf32>,
    } else {
    }
    %c0 = arith.constant 0 : index
    %c0_1 = arith.constant 0 : index
    %3 = vector.load %arg7[%c0, %c0_1] : memref<128x32xf32, #tpu.memory_space<vmem>>, vector<128x32xf32>
    %c0_2 = arith.constant 0 : index
    %c0_3 = arith.constant 0 : index
    %4 = vector.load %arg3[%c0_2, %c0_3] : memref<128x144xbf16, #tpu.memory_space<vmem>>, vector<128x144xbf16>
    %c0_4 = arith.constant 0 : index
    %c0_5 = arith.constant 0 : index
    %5 = vector.load %arg4[%c0_4, %c0_5] : memref<144x32xbf16, #tpu.memory_space<vmem>>, vector<144x32xbf16>
    %cst = arith.constant dense<0.000000e+00> : vector<128x32xf32>
    %6 = tpu.matmul %4, %5, %cst {dimension_numbers = #tpu.dot_dimension_numbers<[1], [0], [0], [1], [0, 0, 1, 1], [], []>} : vector<128x144xbf16>, vector<144x32xbf16>, vector<128x32xf32> -> vector<128x32xf32>
    %7 = arith.addf %3, %6 : vector<128x32xf32>
    %c0_6 = arith.constant 0 : index
    %c0_7 = arith.constant 0 : index
    %8 = vector.load %arg7[%c0_6, %c0_7] : memref<128x32xf32, #tpu.memory_space<vmem>>, vector<128x32xf32>
    tpu.vector_store %arg7[%c0_6, %c0_7], %7 {strides = array<i32>} : memref<128x32xf32, #tpu.memory_space<vmem>>, vector<128x32xf32>,
    %c0_i32_8 = arith.constant 0 : i32
    %9 = arith.cmpi eq, %arg2, %c0_i32_8 : i32
    %10 = arith.extui %9 : i1 to i32
    %c0_i32_9 = arith.constant 0 : i32
    %11 = arith.cmpi ne, %10, %c0_i32_9 : i32
    scf.if %11 {
      %c0_10 = arith.constant 0 : index
      %c0_11 = arith.constant 0 : index
      %12 = vector.load %arg7[%c0_10, %c0_11] : memref<128x32xf32, #tpu.memory_space<vmem>>, vector<128x32xf32>
      %c0_12 = arith.constant 0 : index
      %c0_13 = arith.constant 0 : index
      %13 = vector.load %arg5[%c0_12, %c0_13] : memref<1x32xf32, #tpu.memory_space<vmem>>, vector<1x32xf32>
      %14 = vector.broadcast %13 : vector<1x32xf32> to vector<128x32xf32>
      %15 = arith.addf %12, %14 : vector<128x32xf32>
      %cst_14 = arith.constant 0.000000e+00 : f32
      %16 = vector.broadcast %cst_14 : f32 to vector<128x32xf32>
      %17 = arith.maximumf %15, %16 : vector<128x32xf32>
      %c0_15 = arith.constant 0 : index
      %c0_16 = arith.constant 0 : index
      %18 = vector.load %arg6[%c0_15, %c0_16] : memref<128x32xf32, #tpu.memory_space<vmem>>, vector<128x32xf32>
      tpu.vector_store %arg6[%c0_15, %c0_16], %17 {strides = array<i32>} : memref<128x32xf32, #tpu.memory_space<vmem>>, vector<128x32xf32>,
    } else {
    }
    return
  }
  func.func @transform_0(%arg0: i32, %arg1: i32, %arg2: i32) -> (i32, i32) {
    %c0_i32 = arith.constant 0 : i32
    return %arg0, %arg2 : i32, i32
  }
  func.func @transform_1(%arg0: i32, %arg1: i32, %arg2: i32) -> (i32, i32) {
    %c0_i32 = arith.constant 0 : i32
    return %arg2, %arg1 : i32, i32
  }
  func.func @transform_2(%arg0: i32, %arg1: i32, %arg2: i32) -> (i32, i32) {
    %c0_i32 = arith.constant 0 : i32
    %c0_i32_0 = arith.constant 0 : i32
    return %c0_i32, %arg1 : i32, i32
  }
  func.func @transform_3(%arg0: i32, %arg1: i32, %arg2: i32) -> (i32, i32) {
    %c0_i32 = arith.constant 0 : i32
    return %arg0, %arg1 : i32, i32
  }
}

module attributes {stable_mosaic.version = 11 : i64} {
  func.func @_matmul_bias_kernel(%arg0: i32, %arg1: i32, %arg2: i32, %arg3: memref<40x288xbf16, #tpu.memory_space<vmem>>, %arg4: memref<288x64xbf16, #tpu.memory_space<vmem>>, %arg5: memref<1x64xf32, #tpu.memory_space<vmem>>, %arg6: memref<40x64xf32, #tpu.memory_space<vmem>>, %arg7: memref<40x64xf32, #tpu.memory_space<vmem>>) attributes {dimension_semantics = [#tpu.dimension_semantics<parallel>, #tpu.dimension_semantics<parallel>, #tpu.dimension_semantics<arbitrary>], iteration_bounds = array<i64: 1, 1, 1>, scalar_prefetch = 0 : i64, scratch_operands = 1 : i64, tpu.core_type = #tpu.core_type<tc>, window_params = [{transform_indices = @transform_0, window_bounds = array<i64: 40, 288>}, {transform_indices = @transform_1, window_bounds = array<i64: 288, 64>}, {transform_indices = @transform_2, window_bounds = array<i64: 1, 64>}, {transform_indices = @transform_3, window_bounds = array<i64: 40, 64>}]} {
    %c0_i32 = arith.constant 0 : i32
    %0 = arith.cmpi eq, %arg2, %c0_i32 : i32
    %1 = arith.extui %0 : i1 to i32
    %c0_i32_0 = arith.constant 0 : i32
    %2 = arith.cmpi ne, %1, %c0_i32_0 : i32
    scf.if %2 {
      %cst_10 = arith.constant 0.000000e+00 : f32
      %12 = vector.broadcast %cst_10 : f32 to vector<40x64xf32>
      %c0_11 = arith.constant 0 : index
      %c0_12 = arith.constant 0 : index
      %13 = vector.load %arg7[%c0_11, %c0_12] : memref<40x64xf32, #tpu.memory_space<vmem>>, vector<40x64xf32>
      tpu.vector_store %arg7[%c0_11, %c0_12], %12 {strides = array<i32>} : memref<40x64xf32, #tpu.memory_space<vmem>>, vector<40x64xf32>,
    } else {
    }
    %c0 = arith.constant 0 : index
    %c0_1 = arith.constant 0 : index
    %3 = vector.load %arg7[%c0, %c0_1] : memref<40x64xf32, #tpu.memory_space<vmem>>, vector<40x64xf32>
    %c0_2 = arith.constant 0 : index
    %c0_3 = arith.constant 0 : index
    %4 = vector.load %arg3[%c0_2, %c0_3] : memref<40x288xbf16, #tpu.memory_space<vmem>>, vector<40x288xbf16>
    %c0_4 = arith.constant 0 : index
    %c0_5 = arith.constant 0 : index
    %5 = vector.load %arg4[%c0_4, %c0_5] : memref<288x64xbf16, #tpu.memory_space<vmem>>, vector<288x64xbf16>
    %cst = arith.constant dense<0.000000e+00> : vector<40x64xf32>
    %6 = tpu.matmul %4, %5, %cst {dimension_numbers = #tpu.dot_dimension_numbers<[1], [0], [0], [1], [0, 0, 1, 1], [], []>} : vector<40x288xbf16>, vector<288x64xbf16>, vector<40x64xf32> -> vector<40x64xf32>
    %7 = arith.addf %3, %6 : vector<40x64xf32>
    %c0_6 = arith.constant 0 : index
    %c0_7 = arith.constant 0 : index
    %8 = vector.load %arg7[%c0_6, %c0_7] : memref<40x64xf32, #tpu.memory_space<vmem>>, vector<40x64xf32>
    tpu.vector_store %arg7[%c0_6, %c0_7], %7 {strides = array<i32>} : memref<40x64xf32, #tpu.memory_space<vmem>>, vector<40x64xf32>,
    %c0_i32_8 = arith.constant 0 : i32
    %9 = arith.cmpi eq, %arg2, %c0_i32_8 : i32
    %10 = arith.extui %9 : i1 to i32
    %c0_i32_9 = arith.constant 0 : i32
    %11 = arith.cmpi ne, %10, %c0_i32_9 : i32
    scf.if %11 {
      %c0_10 = arith.constant 0 : index
      %c0_11 = arith.constant 0 : index
      %12 = vector.load %arg7[%c0_10, %c0_11] : memref<40x64xf32, #tpu.memory_space<vmem>>, vector<40x64xf32>
      %c0_12 = arith.constant 0 : index
      %c0_13 = arith.constant 0 : index
      %13 = vector.load %arg5[%c0_12, %c0_13] : memref<1x64xf32, #tpu.memory_space<vmem>>, vector<1x64xf32>
      %14 = vector.broadcast %13 : vector<1x64xf32> to vector<40x64xf32>
      %15 = arith.addf %12, %14 : vector<40x64xf32>
      %cst_14 = arith.constant 0.000000e+00 : f32
      %16 = vector.broadcast %cst_14 : f32 to vector<40x64xf32>
      %17 = arith.maximumf %15, %16 : vector<40x64xf32>
      %c0_15 = arith.constant 0 : index
      %c0_16 = arith.constant 0 : index
      %18 = vector.load %arg6[%c0_15, %c0_16] : memref<40x64xf32, #tpu.memory_space<vmem>>, vector<40x64xf32>
      tpu.vector_store %arg6[%c0_15, %c0_16], %17 {strides = array<i32>} : memref<40x64xf32, #tpu.memory_space<vmem>>, vector<40x64xf32>,
    } else {
    }
    return
  }
  func.func @transform_0(%arg0: i32, %arg1: i32, %arg2: i32) -> (i32, i32) {
    %c0_i32 = arith.constant 0 : i32
    return %arg0, %arg2 : i32, i32
  }
  func.func @transform_1(%arg0: i32, %arg1: i32, %arg2: i32) -> (i32, i32) {
    %c0_i32 = arith.constant 0 : i32
    return %arg2, %arg1 : i32, i32
  }
  func.func @transform_2(%arg0: i32, %arg1: i32, %arg2: i32) -> (i32, i32) {
    %c0_i32 = arith.constant 0 : i32
    %c0_i32_0 = arith.constant 0 : i32
    return %c0_i32, %arg1 : i32, i32
  }
  func.func @transform_3(%arg0: i32, %arg1: i32, %arg2: i32) -> (i32, i32) {
    %c0_i32 = arith.constant 0 : i32
    return %arg0, %arg1 : i32, i32
  }
}

module attributes {stable_mosaic.version = 11 : i64} {
  func.func @_matmul_bias_kernel(%arg0: i32, %arg1: i32, %arg2: i32, %arg3: memref<128x5xbf16, #tpu.memory_space<vmem>>, %arg4: memref<5x8xbf16, #tpu.memory_space<vmem>>, %arg5: memref<1x8xf32, #tpu.memory_space<vmem>>, %arg6: memref<128x8xf32, #tpu.memory_space<vmem>>, %arg7: memref<128x8xf32, #tpu.memory_space<vmem>>) attributes {dimension_semantics = [#tpu.dimension_semantics<parallel>, #tpu.dimension_semantics<parallel>, #tpu.dimension_semantics<arbitrary>], iteration_bounds = array<i64: 1, 1, 1>, scalar_prefetch = 0 : i64, scratch_operands = 1 : i64, tpu.core_type = #tpu.core_type<tc>, window_params = [{transform_indices = @transform_0, window_bounds = array<i64: 128, 5>}, {transform_indices = @transform_1, window_bounds = array<i64: 5, 8>}, {transform_indices = @transform_2, window_bounds = array<i64: 1, 8>}, {transform_indices = @transform_3, window_bounds = array<i64: 128, 8>}]} {
    %c0_i32 = arith.constant 0 : i32
    %0 = arith.cmpi eq, %arg2, %c0_i32 : i32
    %1 = arith.extui %0 : i1 to i32
    %c0_i32_0 = arith.constant 0 : i32
    %2 = arith.cmpi ne, %1, %c0_i32_0 : i32
    scf.if %2 {
      %cst_10 = arith.constant 0.000000e+00 : f32
      %12 = vector.broadcast %cst_10 : f32 to vector<128x8xf32>
      %c0_11 = arith.constant 0 : index
      %c0_12 = arith.constant 0 : index
      %13 = vector.load %arg7[%c0_11, %c0_12] : memref<128x8xf32, #tpu.memory_space<vmem>>, vector<128x8xf32>
      tpu.vector_store %arg7[%c0_11, %c0_12], %12 {strides = array<i32>} : memref<128x8xf32, #tpu.memory_space<vmem>>, vector<128x8xf32>,
    } else {
    }
    %c0 = arith.constant 0 : index
    %c0_1 = arith.constant 0 : index
    %3 = vector.load %arg7[%c0, %c0_1] : memref<128x8xf32, #tpu.memory_space<vmem>>, vector<128x8xf32>
    %c0_2 = arith.constant 0 : index
    %c0_3 = arith.constant 0 : index
    %4 = vector.load %arg3[%c0_2, %c0_3] : memref<128x5xbf16, #tpu.memory_space<vmem>>, vector<128x5xbf16>
    %c0_4 = arith.constant 0 : index
    %c0_5 = arith.constant 0 : index
    %5 = vector.load %arg4[%c0_4, %c0_5] : memref<5x8xbf16, #tpu.memory_space<vmem>>, vector<5x8xbf16>
    %cst = arith.constant dense<0.000000e+00> : vector<128x8xf32>
    %6 = tpu.matmul %4, %5, %cst {dimension_numbers = #tpu.dot_dimension_numbers<[1], [0], [0], [1], [0, 0, 1, 1], [], []>} : vector<128x5xbf16>, vector<5x8xbf16>, vector<128x8xf32> -> vector<128x8xf32>
    %7 = arith.addf %3, %6 : vector<128x8xf32>
    %c0_6 = arith.constant 0 : index
    %c0_7 = arith.constant 0 : index
    %8 = vector.load %arg7[%c0_6, %c0_7] : memref<128x8xf32, #tpu.memory_space<vmem>>, vector<128x8xf32>
    tpu.vector_store %arg7[%c0_6, %c0_7], %7 {strides = array<i32>} : memref<128x8xf32, #tpu.memory_space<vmem>>, vector<128x8xf32>,
    %c0_i32_8 = arith.constant 0 : i32
    %9 = arith.cmpi eq, %arg2, %c0_i32_8 : i32
    %10 = arith.extui %9 : i1 to i32
    %c0_i32_9 = arith.constant 0 : i32
    %11 = arith.cmpi ne, %10, %c0_i32_9 : i32
    scf.if %11 {
      %c0_10 = arith.constant 0 : index
      %c0_11 = arith.constant 0 : index
      %12 = vector.load %arg7[%c0_10, %c0_11] : memref<128x8xf32, #tpu.memory_space<vmem>>, vector<128x8xf32>
      %c0_12 = arith.constant 0 : index
      %c0_13 = arith.constant 0 : index
      %13 = vector.load %arg5[%c0_12, %c0_13] : memref<1x8xf32, #tpu.memory_space<vmem>>, vector<1x8xf32>
      %14 = vector.broadcast %13 : vector<1x8xf32> to vector<128x8xf32>
      %15 = arith.addf %12, %14 : vector<128x8xf32>
      %c0_14 = arith.constant 0 : index
      %c0_15 = arith.constant 0 : index
      %16 = vector.load %arg6[%c0_14, %c0_15] : memref<128x8xf32, #tpu.memory_space<vmem>>, vector<128x8xf32>
      tpu.vector_store %arg6[%c0_14, %c0_15], %15 {strides = array<i32>} : memref<128x8xf32, #tpu.memory_space<vmem>>, vector<128x8xf32>,
    } else {
    }
    return
  }
  func.func @transform_0(%arg0: i32, %arg1: i32, %arg2: i32) -> (i32, i32) {
    %c0_i32 = arith.constant 0 : i32
    return %arg0, %arg2 : i32, i32
  }
  func.func @transform_1(%arg0: i32, %arg1: i32, %arg2: i32) -> (i32, i32) {
    %c0_i32 = arith.constant 0 : i32
    return %arg2, %arg1 : i32, i32
  }
  func.func @transform_2(%arg0: i32, %arg1: i32, %arg2: i32) -> (i32, i32) {
    %c0_i32 = arith.constant 0 : i32
    %c0_i32_0 = arith.constant 0 : i32
    return %c0_i32, %arg1 : i32, i32
  }
  func.func @transform_3(%arg0: i32, %arg1: i32, %arg2: i32) -> (i32, i32) {
    %c0_i32 = arith.constant 0 : i32
    return %arg0, %arg1 : i32, i32
  }
}

module attributes {stable_mosaic.version = 11 : i64} {
  func.func @_bilstm_rec_kernel(%arg0: i32, %arg1: i32, %arg2: memref<1x1x2x128xf32, #tpu.memory_space<vmem>>, %arg3: memref<1x32x128xf32, #tpu.memory_space<vmem>>, %arg4: memref<1x1x2x32xf32, #tpu.memory_space<vmem>>, %arg5: memref<2x32xf32, #tpu.memory_space<vmem>>, %arg6: memref<2x32xf32, #tpu.memory_space<vmem>>) attributes {dimension_semantics = [#tpu.dimension_semantics<parallel>, #tpu.dimension_semantics<arbitrary>], iteration_bounds = array<i64: 2, 8>, scalar_prefetch = 0 : i64, scratch_operands = 2 : i64, tpu.core_type = #tpu.core_type<tc>, window_params = [{transform_indices = @transform_0, window_bounds = array<i64: 1, 1, 2, 128>}, {transform_indices = @transform_1, window_bounds = array<i64: 1, 32, 128>}, {transform_indices = @transform_2, window_bounds = array<i64: 1, 1, 2, 32>}]} {
    %c0_i32 = arith.constant 0 : i32
    %0 = arith.cmpi eq, %arg1, %c0_i32 : i32
    %1 = arith.extui %0 : i1 to i32
    %c0_i32_0 = arith.constant 0 : i32
    %2 = arith.cmpi ne, %1, %c0_i32_0 : i32
    scf.if %2 {
      %cst_22 = arith.constant 0.000000e+00 : f32
      %40 = vector.broadcast %cst_22 : f32 to vector<2x32xf32>
      %c0_23 = arith.constant 0 : index
      %c0_24 = arith.constant 0 : index
      %41 = vector.load %arg5[%c0_23, %c0_24] : memref<2x32xf32, #tpu.memory_space<vmem>>, vector<2x32xf32>
      tpu.vector_store %arg5[%c0_23, %c0_24], %40 {strides = array<i32>} : memref<2x32xf32, #tpu.memory_space<vmem>>, vector<2x32xf32>,
      %cst_25 = arith.constant 0.000000e+00 : f32
      %42 = vector.broadcast %cst_25 : f32 to vector<2x32xf32>
      %c0_26 = arith.constant 0 : index
      %c0_27 = arith.constant 0 : index
      %43 = vector.load %arg6[%c0_26, %c0_27] : memref<2x32xf32, #tpu.memory_space<vmem>>, vector<2x32xf32>
      tpu.vector_store %arg6[%c0_26, %c0_27], %42 {strides = array<i32>} : memref<2x32xf32, #tpu.memory_space<vmem>>, vector<2x32xf32>,
    } else {
    }
    %c0 = arith.constant 0 : index
    %c0_1 = arith.constant 0 : index
    %3 = vector.load %arg5[%c0, %c0_1] : memref<2x32xf32, #tpu.memory_space<vmem>>, vector<2x32xf32>
    %c0_2 = arith.constant 0 : index
    %c0_3 = arith.constant 0 : index
    %c0_4 = arith.constant 0 : index
    %c0_5 = arith.constant 0 : index
    %4 = vector.load %arg2[%c0_2, %c0_3, %c0_4, %c0_5] : memref<1x1x2x128xf32, #tpu.memory_space<vmem>>, vector<1x1x2x128xf32>
    %5 = vector.shape_cast %4 : vector<1x1x2x128xf32> to vector<2x128xf32>
    %c0_6 = arith.constant 0 : index
    %c0_7 = arith.constant 0 : index
    %c0_8 = arith.constant 0 : index
    %6 = vector.load %arg3[%c0_6, %c0_7, %c0_8] : memref<1x32x128xf32, #tpu.memory_space<vmem>>, vector<1x32x128xf32>
    %7 = vector.shape_cast %6 : vector<1x32x128xf32> to vector<32x128xf32>
    %cst = arith.constant dense<0.000000e+00> : vector<2x128xf32>
    %8 = tpu.matmul %3, %7, %cst {dimension_numbers = #tpu.dot_dimension_numbers<[1], [0], [0], [1], [0, 0, 1, 1], [], []>} : vector<2x32xf32>, vector<32x128xf32>, vector<2x128xf32> -> vector<2x128xf32>
    %9 = arith.addf %5, %8 : vector<2x128xf32>
    %10 = vector.extract_strided_slice %9 {offsets = [0, 0], sizes = [2, 32], strides = [1, 1]} : vector<2x128xf32> to vector<2x32xf32>
    %11 = arith.negf %10 : vector<2x32xf32>
    %12 = math.exp %11 : vector<2x32xf32>
    %cst_9 = arith.constant 1.000000e+00 : f32
    %13 = vector.broadcast %cst_9 : f32 to vector<2x32xf32>
    %14 = arith.addf %13, %12 : vector<2x32xf32>
    %15 = arith.divf %13, %14 : vector<2x32xf32>
    %16 = vector.extract_strided_slice %9 {offsets = [0, 32], sizes = [2, 32], strides = [1, 1]} : vector<2x128xf32> to vector<2x32xf32>
    %17 = arith.negf %16 : vector<2x32xf32>
    %18 = math.exp %17 : vector<2x32xf32>
    %cst_10 = arith.constant 1.000000e+00 : f32
    %19 = vector.broadcast %cst_10 : f32 to vector<2x32xf32>
    %20 = arith.addf %19, %18 : vector<2x32xf32>
    %21 = arith.divf %19, %20 : vector<2x32xf32>
    %22 = vector.extract_strided_slice %9 {offsets = [0, 64], sizes = [2, 32], strides = [1, 1]} : vector<2x128xf32> to vector<2x32xf32>
    %23 = math.tanh %22 : vector<2x32xf32>
    %24 = vector.extract_strided_slice %9 {offsets = [0, 96], sizes = [2, 32], strides = [1, 1]} : vector<2x128xf32> to vector<2x32xf32>
    %25 = arith.negf %24 : vector<2x32xf32>
    %26 = math.exp %25 : vector<2x32xf32>
    %cst_11 = arith.constant 1.000000e+00 : f32
    %27 = vector.broadcast %cst_11 : f32 to vector<2x32xf32>
    %28 = arith.addf %27, %26 : vector<2x32xf32>
    %29 = arith.divf %27, %28 : vector<2x32xf32>
    %c0_12 = arith.constant 0 : index
    %c0_13 = arith.constant 0 : index
    %30 = vector.load %arg6[%c0_12, %c0_13] : memref<2x32xf32, #tpu.memory_space<vmem>>, vector<2x32xf32>
    %31 = arith.mulf %21, %30 : vector<2x32xf32>
    %32 = arith.mulf %15, %23 : vector<2x32xf32>
    %33 = arith.addf %31, %32 : vector<2x32xf32>
    %34 = math.tanh %33 : vector<2x32xf32>
    %35 = arith.mulf %29, %34 : vector<2x32xf32>
    %c0_14 = arith.constant 0 : index
    %c0_15 = arith.constant 0 : index
    %36 = vector.load %arg6[%c0_14, %c0_15] : memref<2x32xf32, #tpu.memory_space<vmem>>, vector<2x32xf32>
    tpu.vector_store %arg6[%c0_14, %c0_15], %33 {strides = array<i32>} : memref<2x32xf32, #tpu.memory_space<vmem>>, vector<2x32xf32>,
    %c0_16 = arith.constant 0 : index
    %c0_17 = arith.constant 0 : index
    %37 = vector.load %arg5[%c0_16, %c0_17] : memref<2x32xf32, #tpu.memory_space<vmem>>, vector<2x32xf32>
    tpu.vector_store %arg5[%c0_16, %c0_17], %35 {strides = array<i32>} : memref<2x32xf32, #tpu.memory_space<vmem>>, vector<2x32xf32>,
    %38 = vector.shape_cast %35 : vector<2x32xf32> to vector<1x1x2x32xf32>
    %c0_18 = arith.constant 0 : index
    %c0_19 = arith.constant 0 : index
    %c0_20 = arith.constant 0 : index
    %c0_21 = arith.constant 0 : index
    %39 = vector.load %arg4[%c0_18, %c0_19, %c0_20, %c0_21] : memref<1x1x2x32xf32, #tpu.memory_space<vmem>>, vector<1x1x2x32xf32>
    tpu.vector_store %arg4[%c0_18, %c0_19, %c0_20, %c0_21], %38 {strides = array<i32>} : memref<1x1x2x32xf32, #tpu.memory_space<vmem>>, vector<1x1x2x32xf32>,
    return
  }
  func.func @transform_0(%arg0: i32, %arg1: i32) -> (i32, i32, i32, i32) {
    %c7_i32 = arith.constant 7 : i32
    %0 = arith.muli %arg0, %c7_i32 : i32
    %c2_i32 = arith.constant 2 : i32
    %1 = arith.muli %c2_i32, %arg0 : i32
    %c1_i32 = arith.constant 1 : i32
    %2 = arith.subi %c1_i32, %1 : i32
    %3 = arith.muli %2, %arg1 : i32
    %4 = arith.addi %0, %3 : i32
    %c0_i32 = arith.constant 0 : i32
    %c0_i32_0 = arith.constant 0 : i32
    %c0_i32_1 = arith.constant 0 : i32
    return %arg0, %4, %c0_i32, %c0_i32_0 : i32, i32, i32, i32
  }
  func.func @transform_1(%arg0: i32, %arg1: i32) -> (i32, i32, i32) {
    %c0_i32 = arith.constant 0 : i32
    %c0_i32_0 = arith.constant 0 : i32
    %c0_i32_1 = arith.constant 0 : i32
    return %arg0, %c0_i32, %c0_i32_0 : i32, i32, i32
  }
  func.func @transform_2(%arg0: i32, %arg1: i32) -> (i32, i32, i32, i32) {
    %c7_i32 = arith.constant 7 : i32
    %0 = arith.muli %arg0, %c7_i32 : i32
    %c2_i32 = arith.constant 2 : i32
    %1 = arith.muli %c2_i32, %arg0 : i32
    %c1_i32 = arith.constant 1 : i32
    %2 = arith.subi %c1_i32, %1 : i32
    %3 = arith.muli %2, %arg1 : i32
    %4 = arith.addi %0, %3 : i32
    %c0_i32 = arith.constant 0 : i32
    %c0_i32_0 = arith.constant 0 : i32
    %c0_i32_1 = arith.constant 0 : i32
    return %arg0, %4, %c0_i32, %c0_i32_0 : i32, i32, i32, i32
  }
}

module attributes {stable_mosaic.version = 11 : i64} {
  func.func @_matmul_bias_kernel(%arg0: i32, %arg1: i32, %arg2: i32, %arg3: memref<16x64xbf16, #tpu.memory_space<vmem>>, %arg4: memref<64x256xbf16, #tpu.memory_space<vmem>>, %arg5: memref<1x256xf32, #tpu.memory_space<vmem>>, %arg6: memref<16x256xf32, #tpu.memory_space<vmem>>, %arg7: memref<16x256xf32, #tpu.memory_space<vmem>>) attributes {dimension_semantics = [#tpu.dimension_semantics<parallel>, #tpu.dimension_semantics<parallel>, #tpu.dimension_semantics<arbitrary>], iteration_bounds = array<i64: 1, 1, 1>, scalar_prefetch = 0 : i64, scratch_operands = 1 : i64, tpu.core_type = #tpu.core_type<tc>, window_params = [{transform_indices = @transform_0, window_bounds = array<i64: 16, 64>}, {transform_indices = @transform_1, window_bounds = array<i64: 64, 256>}, {transform_indices = @transform_2, window_bounds = array<i64: 1, 256>}, {transform_indices = @transform_3, window_bounds = array<i64: 16, 256>}]} {
    %c0_i32 = arith.constant 0 : i32
    %0 = arith.cmpi eq, %arg2, %c0_i32 : i32
    %1 = arith.extui %0 : i1 to i32
    %c0_i32_0 = arith.constant 0 : i32
    %2 = arith.cmpi ne, %1, %c0_i32_0 : i32
    scf.if %2 {
      %cst_10 = arith.constant 0.000000e+00 : f32
      %12 = vector.broadcast %cst_10 : f32 to vector<16x256xf32>
      %c0_11 = arith.constant 0 : index
      %c0_12 = arith.constant 0 : index
      %13 = vector.load %arg7[%c0_11, %c0_12] : memref<16x256xf32, #tpu.memory_space<vmem>>, vector<16x256xf32>
      tpu.vector_store %arg7[%c0_11, %c0_12], %12 {strides = array<i32>} : memref<16x256xf32, #tpu.memory_space<vmem>>, vector<16x256xf32>,
    } else {
    }
    %c0 = arith.constant 0 : index
    %c0_1 = arith.constant 0 : index
    %3 = vector.load %arg7[%c0, %c0_1] : memref<16x256xf32, #tpu.memory_space<vmem>>, vector<16x256xf32>
    %c0_2 = arith.constant 0 : index
    %c0_3 = arith.constant 0 : index
    %4 = vector.load %arg3[%c0_2, %c0_3] : memref<16x64xbf16, #tpu.memory_space<vmem>>, vector<16x64xbf16>
    %c0_4 = arith.constant 0 : index
    %c0_5 = arith.constant 0 : index
    %5 = vector.load %arg4[%c0_4, %c0_5] : memref<64x256xbf16, #tpu.memory_space<vmem>>, vector<64x256xbf16>
    %cst = arith.constant dense<0.000000e+00> : vector<16x256xf32>
    %6 = tpu.matmul %4, %5, %cst {dimension_numbers = #tpu.dot_dimension_numbers<[1], [0], [0], [1], [0, 0, 1, 1], [], []>} : vector<16x64xbf16>, vector<64x256xbf16>, vector<16x256xf32> -> vector<16x256xf32>
    %7 = arith.addf %3, %6 : vector<16x256xf32>
    %c0_6 = arith.constant 0 : index
    %c0_7 = arith.constant 0 : index
    %8 = vector.load %arg7[%c0_6, %c0_7] : memref<16x256xf32, #tpu.memory_space<vmem>>, vector<16x256xf32>
    tpu.vector_store %arg7[%c0_6, %c0_7], %7 {strides = array<i32>} : memref<16x256xf32, #tpu.memory_space<vmem>>, vector<16x256xf32>,
    %c0_i32_8 = arith.constant 0 : i32
    %9 = arith.cmpi eq, %arg2, %c0_i32_8 : i32
    %10 = arith.extui %9 : i1 to i32
    %c0_i32_9 = arith.constant 0 : i32
    %11 = arith.cmpi ne, %10, %c0_i32_9 : i32
    scf.if %11 {
      %c0_10 = arith.constant 0 : index
      %c0_11 = arith.constant 0 : index
      %12 = vector.load %arg7[%c0_10, %c0_11] : memref<16x256xf32, #tpu.memory_space<vmem>>, vector<16x256xf32>
      %c0_12 = arith.constant 0 : index
      %c0_13 = arith.constant 0 : index
      %13 = vector.load %arg5[%c0_12, %c0_13] : memref<1x256xf32, #tpu.memory_space<vmem>>, vector<1x256xf32>
      %14 = vector.broadcast %13 : vector<1x256xf32> to vector<16x256xf32>
      %15 = arith.addf %12, %14 : vector<16x256xf32>
      %c0_14 = arith.constant 0 : index
      %c0_15 = arith.constant 0 : index
      %16 = vector.load %arg6[%c0_14, %c0_15] : memref<16x256xf32, #tpu.memory_space<vmem>>, vector<16x256xf32>
      tpu.vector_store %arg6[%c0_14, %c0_15], %15 {strides = array<i32>} : memref<16x256xf32, #tpu.memory_space<vmem>>, vector<16x256xf32>,
    } else {
    }
    return
  }
  func.func @transform_0(%arg0: i32, %arg1: i32, %arg2: i32) -> (i32, i32) {
    %c0_i32 = arith.constant 0 : i32
    return %arg0, %arg2 : i32, i32
  }
  func.func @transform_1(%arg0: i32, %arg1: i32, %arg2: i32) -> (i32, i32) {
    %c0_i32 = arith.constant 0 : i32
    return %arg2, %arg1 : i32, i32
  }
  func.func @transform_2(%arg0: i32, %arg1: i32, %arg2: i32) -> (i32, i32) {
    %c0_i32 = arith.constant 0 : i32
    %c0_i32_0 = arith.constant 0 : i32
    return %c0_i32, %arg1 : i32, i32
  }
  func.func @transform_3(%arg0: i32, %arg1: i32, %arg2: i32) -> (i32, i32) {
    %c0_i32 = arith.constant 0 : i32
    return %arg0, %arg1 : i32, i32
  }
}

module attributes {stable_mosaic.version = 11 : i64} {
  func.func @_matmul_bias_kernel(%arg0: i32, %arg1: i32, %arg2: i32, %arg3: memref<16x64xbf16, #tpu.memory_space<vmem>>, %arg4: memref<64x32xbf16, #tpu.memory_space<vmem>>, %arg5: memref<1x32xf32, #tpu.memory_space<vmem>>, %arg6: memref<16x32xf32, #tpu.memory_space<vmem>>, %arg7: memref<16x32xf32, #tpu.memory_space<vmem>>) attributes {dimension_semantics = [#tpu.dimension_semantics<parallel>, #tpu.dimension_semantics<parallel>, #tpu.dimension_semantics<arbitrary>], iteration_bounds = array<i64: 1, 1, 1>, scalar_prefetch = 0 : i64, scratch_operands = 1 : i64, tpu.core_type = #tpu.core_type<tc>, window_params = [{transform_indices = @transform_0, window_bounds = array<i64: 16, 64>}, {transform_indices = @transform_1, window_bounds = array<i64: 64, 32>}, {transform_indices = @transform_2, window_bounds = array<i64: 1, 32>}, {transform_indices = @transform_3, window_bounds = array<i64: 16, 32>}]} {
    %c0_i32 = arith.constant 0 : i32
    %0 = arith.cmpi eq, %arg2, %c0_i32 : i32
    %1 = arith.extui %0 : i1 to i32
    %c0_i32_0 = arith.constant 0 : i32
    %2 = arith.cmpi ne, %1, %c0_i32_0 : i32
    scf.if %2 {
      %cst_10 = arith.constant 0.000000e+00 : f32
      %12 = vector.broadcast %cst_10 : f32 to vector<16x32xf32>
      %c0_11 = arith.constant 0 : index
      %c0_12 = arith.constant 0 : index
      %13 = vector.load %arg7[%c0_11, %c0_12] : memref<16x32xf32, #tpu.memory_space<vmem>>, vector<16x32xf32>
      tpu.vector_store %arg7[%c0_11, %c0_12], %12 {strides = array<i32>} : memref<16x32xf32, #tpu.memory_space<vmem>>, vector<16x32xf32>,
    } else {
    }
    %c0 = arith.constant 0 : index
    %c0_1 = arith.constant 0 : index
    %3 = vector.load %arg7[%c0, %c0_1] : memref<16x32xf32, #tpu.memory_space<vmem>>, vector<16x32xf32>
    %c0_2 = arith.constant 0 : index
    %c0_3 = arith.constant 0 : index
    %4 = vector.load %arg3[%c0_2, %c0_3] : memref<16x64xbf16, #tpu.memory_space<vmem>>, vector<16x64xbf16>
    %c0_4 = arith.constant 0 : index
    %c0_5 = arith.constant 0 : index
    %5 = vector.load %arg4[%c0_4, %c0_5] : memref<64x32xbf16, #tpu.memory_space<vmem>>, vector<64x32xbf16>
    %cst = arith.constant dense<0.000000e+00> : vector<16x32xf32>
    %6 = tpu.matmul %4, %5, %cst {dimension_numbers = #tpu.dot_dimension_numbers<[1], [0], [0], [1], [0, 0, 1, 1], [], []>} : vector<16x64xbf16>, vector<64x32xbf16>, vector<16x32xf32> -> vector<16x32xf32>
    %7 = arith.addf %3, %6 : vector<16x32xf32>
    %c0_6 = arith.constant 0 : index
    %c0_7 = arith.constant 0 : index
    %8 = vector.load %arg7[%c0_6, %c0_7] : memref<16x32xf32, #tpu.memory_space<vmem>>, vector<16x32xf32>
    tpu.vector_store %arg7[%c0_6, %c0_7], %7 {strides = array<i32>} : memref<16x32xf32, #tpu.memory_space<vmem>>, vector<16x32xf32>,
    %c0_i32_8 = arith.constant 0 : i32
    %9 = arith.cmpi eq, %arg2, %c0_i32_8 : i32
    %10 = arith.extui %9 : i1 to i32
    %c0_i32_9 = arith.constant 0 : i32
    %11 = arith.cmpi ne, %10, %c0_i32_9 : i32
    scf.if %11 {
      %c0_10 = arith.constant 0 : index
      %c0_11 = arith.constant 0 : index
      %12 = vector.load %arg7[%c0_10, %c0_11] : memref<16x32xf32, #tpu.memory_space<vmem>>, vector<16x32xf32>
      %c0_12 = arith.constant 0 : index
      %c0_13 = arith.constant 0 : index
      %13 = vector.load %arg5[%c0_12, %c0_13] : memref<1x32xf32, #tpu.memory_space<vmem>>, vector<1x32xf32>
      %14 = vector.broadcast %13 : vector<1x32xf32> to vector<16x32xf32>
      %15 = arith.addf %12, %14 : vector<16x32xf32>
      %c0_14 = arith.constant 0 : index
      %c0_15 = arith.constant 0 : index
      %16 = vector.load %arg6[%c0_14, %c0_15] : memref<16x32xf32, #tpu.memory_space<vmem>>, vector<16x32xf32>
      tpu.vector_store %arg6[%c0_14, %c0_15], %15 {strides = array<i32>} : memref<16x32xf32, #tpu.memory_space<vmem>>, vector<16x32xf32>,
    } else {
    }
    return
  }
  func.func @transform_0(%arg0: i32, %arg1: i32, %arg2: i32) -> (i32, i32) {
    %c0_i32 = arith.constant 0 : i32
    return %arg0, %arg2 : i32, i32
  }
  func.func @transform_1(%arg0: i32, %arg1: i32, %arg2: i32) -> (i32, i32) {
    %c0_i32 = arith.constant 0 : i32
    return %arg2, %arg1 : i32, i32
  }
  func.func @transform_2(%arg0: i32, %arg1: i32, %arg2: i32) -> (i32, i32) {
    %c0_i32 = arith.constant 0 : i32
    %c0_i32_0 = arith.constant 0 : i32
    return %c0_i32, %arg1 : i32, i32
  }
  func.func @transform_3(%arg0: i32, %arg1: i32, %arg2: i32) -> (i32, i32) {
    %c0_i32 = arith.constant 0 : i32
    return %arg0, %arg1 : i32, i32
  }
}

module attributes {stable_mosaic.version = 11 : i64} {
  func.func @_matmul_bias_kernel(%arg0: i32, %arg1: i32, %arg2: i32, %arg3: memref<16x64xbf16, #tpu.memory_space<vmem>>, %arg4: memref<64x32xbf16, #tpu.memory_space<vmem>>, %arg5: memref<1x32xf32, #tpu.memory_space<vmem>>, %arg6: memref<16x32xf32, #tpu.memory_space<vmem>>, %arg7: memref<16x32xf32, #tpu.memory_space<vmem>>) attributes {dimension_semantics = [#tpu.dimension_semantics<parallel>, #tpu.dimension_semantics<parallel>, #tpu.dimension_semantics<arbitrary>], iteration_bounds = array<i64: 1, 1, 1>, scalar_prefetch = 0 : i64, scratch_operands = 1 : i64, tpu.core_type = #tpu.core_type<tc>, window_params = [{transform_indices = @transform_0, window_bounds = array<i64: 16, 64>}, {transform_indices = @transform_1, window_bounds = array<i64: 64, 32>}, {transform_indices = @transform_2, window_bounds = array<i64: 1, 32>}, {transform_indices = @transform_3, window_bounds = array<i64: 16, 32>}]} {
    %c0_i32 = arith.constant 0 : i32
    %0 = arith.cmpi eq, %arg2, %c0_i32 : i32
    %1 = arith.extui %0 : i1 to i32
    %c0_i32_0 = arith.constant 0 : i32
    %2 = arith.cmpi ne, %1, %c0_i32_0 : i32
    scf.if %2 {
      %cst_10 = arith.constant 0.000000e+00 : f32
      %12 = vector.broadcast %cst_10 : f32 to vector<16x32xf32>
      %c0_11 = arith.constant 0 : index
      %c0_12 = arith.constant 0 : index
      %13 = vector.load %arg7[%c0_11, %c0_12] : memref<16x32xf32, #tpu.memory_space<vmem>>, vector<16x32xf32>
      tpu.vector_store %arg7[%c0_11, %c0_12], %12 {strides = array<i32>} : memref<16x32xf32, #tpu.memory_space<vmem>>, vector<16x32xf32>,
    } else {
    }
    %c0 = arith.constant 0 : index
    %c0_1 = arith.constant 0 : index
    %3 = vector.load %arg7[%c0, %c0_1] : memref<16x32xf32, #tpu.memory_space<vmem>>, vector<16x32xf32>
    %c0_2 = arith.constant 0 : index
    %c0_3 = arith.constant 0 : index
    %4 = vector.load %arg3[%c0_2, %c0_3] : memref<16x64xbf16, #tpu.memory_space<vmem>>, vector<16x64xbf16>
    %c0_4 = arith.constant 0 : index
    %c0_5 = arith.constant 0 : index
    %5 = vector.load %arg4[%c0_4, %c0_5] : memref<64x32xbf16, #tpu.memory_space<vmem>>, vector<64x32xbf16>
    %cst = arith.constant dense<0.000000e+00> : vector<16x32xf32>
    %6 = tpu.matmul %4, %5, %cst {dimension_numbers = #tpu.dot_dimension_numbers<[1], [0], [0], [1], [0, 0, 1, 1], [], []>} : vector<16x64xbf16>, vector<64x32xbf16>, vector<16x32xf32> -> vector<16x32xf32>
    %7 = arith.addf %3, %6 : vector<16x32xf32>
    %c0_6 = arith.constant 0 : index
    %c0_7 = arith.constant 0 : index
    %8 = vector.load %arg7[%c0_6, %c0_7] : memref<16x32xf32, #tpu.memory_space<vmem>>, vector<16x32xf32>
    tpu.vector_store %arg7[%c0_6, %c0_7], %7 {strides = array<i32>} : memref<16x32xf32, #tpu.memory_space<vmem>>, vector<16x32xf32>,
    %c0_i32_8 = arith.constant 0 : i32
    %9 = arith.cmpi eq, %arg2, %c0_i32_8 : i32
    %10 = arith.extui %9 : i1 to i32
    %c0_i32_9 = arith.constant 0 : i32
    %11 = arith.cmpi ne, %10, %c0_i32_9 : i32
    scf.if %11 {
      %c0_10 = arith.constant 0 : index
      %c0_11 = arith.constant 0 : index
      %12 = vector.load %arg7[%c0_10, %c0_11] : memref<16x32xf32, #tpu.memory_space<vmem>>, vector<16x32xf32>
      %c0_12 = arith.constant 0 : index
      %c0_13 = arith.constant 0 : index
      %13 = vector.load %arg5[%c0_12, %c0_13] : memref<1x32xf32, #tpu.memory_space<vmem>>, vector<1x32xf32>
      %14 = vector.broadcast %13 : vector<1x32xf32> to vector<16x32xf32>
      %15 = arith.addf %12, %14 : vector<16x32xf32>
      %c0_14 = arith.constant 0 : index
      %c0_15 = arith.constant 0 : index
      %16 = vector.load %arg6[%c0_14, %c0_15] : memref<16x32xf32, #tpu.memory_space<vmem>>, vector<16x32xf32>
      tpu.vector_store %arg6[%c0_14, %c0_15], %15 {strides = array<i32>} : memref<16x32xf32, #tpu.memory_space<vmem>>, vector<16x32xf32>,
    } else {
    }
    return
  }
  func.func @transform_0(%arg0: i32, %arg1: i32, %arg2: i32) -> (i32, i32) {
    %c0_i32 = arith.constant 0 : i32
    return %arg0, %arg2 : i32, i32
  }
  func.func @transform_1(%arg0: i32, %arg1: i32, %arg2: i32) -> (i32, i32) {
    %c0_i32 = arith.constant 0 : i32
    return %arg2, %arg1 : i32, i32
  }
  func.func @transform_2(%arg0: i32, %arg1: i32, %arg2: i32) -> (i32, i32) {
    %c0_i32 = arith.constant 0 : i32
    %c0_i32_0 = arith.constant 0 : i32
    return %c0_i32, %arg1 : i32, i32
  }
  func.func @transform_3(%arg0: i32, %arg1: i32, %arg2: i32) -> (i32, i32) {
    %c0_i32 = arith.constant 0 : i32
    return %arg0, %arg1 : i32, i32
  }
}

module attributes {stable_mosaic.version = 11 : i64} {
  func.func @_matmul_bias_kernel(%arg0: i32, %arg1: i32, %arg2: i32, %arg3: memref<16x32xbf16, #tpu.memory_space<vmem>>, %arg4: memref<32x256xbf16, #tpu.memory_space<vmem>>, %arg5: memref<1x256xf32, #tpu.memory_space<vmem>>, %arg6: memref<16x256xf32, #tpu.memory_space<vmem>>, %arg7: memref<16x256xf32, #tpu.memory_space<vmem>>) attributes {dimension_semantics = [#tpu.dimension_semantics<parallel>, #tpu.dimension_semantics<parallel>, #tpu.dimension_semantics<arbitrary>], iteration_bounds = array<i64: 1, 1, 1>, scalar_prefetch = 0 : i64, scratch_operands = 1 : i64, tpu.core_type = #tpu.core_type<tc>, window_params = [{transform_indices = @transform_0, window_bounds = array<i64: 16, 32>}, {transform_indices = @transform_1, window_bounds = array<i64: 32, 256>}, {transform_indices = @transform_2, window_bounds = array<i64: 1, 256>}, {transform_indices = @transform_3, window_bounds = array<i64: 16, 256>}]} {
    %c0_i32 = arith.constant 0 : i32
    %0 = arith.cmpi eq, %arg2, %c0_i32 : i32
    %1 = arith.extui %0 : i1 to i32
    %c0_i32_0 = arith.constant 0 : i32
    %2 = arith.cmpi ne, %1, %c0_i32_0 : i32
    scf.if %2 {
      %cst_10 = arith.constant 0.000000e+00 : f32
      %12 = vector.broadcast %cst_10 : f32 to vector<16x256xf32>
      %c0_11 = arith.constant 0 : index
      %c0_12 = arith.constant 0 : index
      %13 = vector.load %arg7[%c0_11, %c0_12] : memref<16x256xf32, #tpu.memory_space<vmem>>, vector<16x256xf32>
      tpu.vector_store %arg7[%c0_11, %c0_12], %12 {strides = array<i32>} : memref<16x256xf32, #tpu.memory_space<vmem>>, vector<16x256xf32>,
    } else {
    }
    %c0 = arith.constant 0 : index
    %c0_1 = arith.constant 0 : index
    %3 = vector.load %arg7[%c0, %c0_1] : memref<16x256xf32, #tpu.memory_space<vmem>>, vector<16x256xf32>
    %c0_2 = arith.constant 0 : index
    %c0_3 = arith.constant 0 : index
    %4 = vector.load %arg3[%c0_2, %c0_3] : memref<16x32xbf16, #tpu.memory_space<vmem>>, vector<16x32xbf16>
    %c0_4 = arith.constant 0 : index
    %c0_5 = arith.constant 0 : index
    %5 = vector.load %arg4[%c0_4, %c0_5] : memref<32x256xbf16, #tpu.memory_space<vmem>>, vector<32x256xbf16>
    %cst = arith.constant dense<0.000000e+00> : vector<16x256xf32>
    %6 = tpu.matmul %4, %5, %cst {dimension_numbers = #tpu.dot_dimension_numbers<[1], [0], [0], [1], [0, 0, 1, 1], [], []>} : vector<16x32xbf16>, vector<32x256xbf16>, vector<16x256xf32> -> vector<16x256xf32>
    %7 = arith.addf %3, %6 : vector<16x256xf32>
    %c0_6 = arith.constant 0 : index
    %c0_7 = arith.constant 0 : index
    %8 = vector.load %arg7[%c0_6, %c0_7] : memref<16x256xf32, #tpu.memory_space<vmem>>, vector<16x256xf32>
    tpu.vector_store %arg7[%c0_6, %c0_7], %7 {strides = array<i32>} : memref<16x256xf32, #tpu.memory_space<vmem>>, vector<16x256xf32>,
    %c0_i32_8 = arith.constant 0 : i32
    %9 = arith.cmpi eq, %arg2, %c0_i32_8 : i32
    %10 = arith.extui %9 : i1 to i32
    %c0_i32_9 = arith.constant 0 : i32
    %11 = arith.cmpi ne, %10, %c0_i32_9 : i32
    scf.if %11 {
      %c0_10 = arith.constant 0 : index
      %c0_11 = arith.constant 0 : index
      %12 = vector.load %arg7[%c0_10, %c0_11] : memref<16x256xf32, #tpu.memory_space<vmem>>, vector<16x256xf32>
      %c0_12 = arith.constant 0 : index
      %c0_13 = arith.constant 0 : index
      %13 = vector.load %arg5[%c0_12, %c0_13] : memref<1x256xf32, #tpu.memory_space<vmem>>, vector<1x256xf32>
      %14 = vector.broadcast %13 : vector<1x256xf32> to vector<16x256xf32>
      %15 = arith.addf %12, %14 : vector<16x256xf32>
      %c0_14 = arith.constant 0 : index
      %c0_15 = arith.constant 0 : index
      %16 = vector.load %arg6[%c0_14, %c0_15] : memref<16x256xf32, #tpu.memory_space<vmem>>, vector<16x256xf32>
      tpu.vector_store %arg6[%c0_14, %c0_15], %15 {strides = array<i32>} : memref<16x256xf32, #tpu.memory_space<vmem>>, vector<16x256xf32>,
    } else {
    }
    return
  }
  func.func @transform_0(%arg0: i32, %arg1: i32, %arg2: i32) -> (i32, i32) {
    %c0_i32 = arith.constant 0 : i32
    return %arg0, %arg2 : i32, i32
  }
  func.func @transform_1(%arg0: i32, %arg1: i32, %arg2: i32) -> (i32, i32) {
    %c0_i32 = arith.constant 0 : i32
    return %arg2, %arg1 : i32, i32
  }
  func.func @transform_2(%arg0: i32, %arg1: i32, %arg2: i32) -> (i32, i32) {
    %c0_i32 = arith.constant 0 : i32
    %c0_i32_0 = arith.constant 0 : i32
    return %c0_i32, %arg1 : i32, i32
  }
  func.func @transform_3(%arg0: i32, %arg1: i32, %arg2: i32) -> (i32, i32) {
    %c0_i32 = arith.constant 0 : i32
    return %arg0, %arg1 : i32, i32
  }
}

</mosaic_0001>

<bundles_post_ra>
// kernel: visual_encoder_forward.10
= control target key start
LH: loop header
LB: loop body
LE: loop exit
PB: predicated region body
PF: predicated region fallthrough
CT: control target
= control target key end

     0   :  { %vm19_vm0 = vcmask 130048   ;;  %v1398_v1 = vmov 0.0   ;;  %vm392_vm1 = vcmask 293888   ;;  %vm489_vm2 = vcmask 1041408   ;;  %s2079_s1 = inlined_call_operand.vmem [shape: bf16[36,16], index: 1, kind: input, shape index: {}]   ;;  %s2080_s0 = inlined_call_operand.vmem [shape: bf16[512,36], index: 0, kind: input, shape index: {}]   ;;  %s2081_s2 = inlined_call_operand.vmem [shape: f32[1,16], index: 2, kind: input, shape index: {}]   ;;  %s2082_s3 = inlined_call_operand.vmem [shape: f32[512,16], index: 3, kind: output, shape index: {}]  }
   0x1   :  { %v1422_v0 = vld [vmem:[%s2079_s1] sm:$0xff]   ;;  %22 = vst.msk [vmem:[#allocation2 + $0x10] sm:$0xff] %vm19_vm0, %v1398_v1  ;;  %20 = vst.msk [vmem:[#allocation2] sm:$0xff] %vm19_vm0, %v1398_v1  ;;  %v1364_v2 = vld [vmem:[%s2079_s1 + $0x8] sm:$0xff]  }
   0x2   :  { %21 = vst.msk [vmem:[#allocation2 + $0x8] sm:$0xff] %vm19_vm0, %v1398_v1  ;;  %23 = vst.msk [vmem:[#allocation2 + $0x18] sm:$0xff] %vm19_vm0, %v1398_v1  ;;  %1284 = vmatprep.subr.bf16.mxu0 %v1422_v0  ;;  %1354 = vmatprep.subr.bf16.mxu1 %v1422_v0  ;;  %v1365_v3 = vld [vmem:[%s2079_s1 + $0x10] ss:$0 sps:$4 sm:$0x33]   ;;  %v1366_v4 = vld [vmem:[%s2080_s0] sm:$0xff]  }
   0x3   :  { %24 = vst.msk [vmem:[#allocation2 + $0x20] sm:$0xff] %vm19_vm0, %v1398_v1  ;;  %25 = vst.msk [vmem:[#allocation2 + $0x28] sm:$0xff] %vm19_vm0, %v1398_v1  ;;  %1285 = vmatpush3.bf16.msra.mxu0 %v1422_v0  ;;  %1357 = vmatpush3.bf16.msra.mxu1 %v1422_v0  ;;  %v1367_v5 = vld [vmem:[%s2080_s0 + $0x80] sm:$0xff]   ;;  %v491_v6 = vsel %vm489_vm2, %v1365_v3, 0  ;;  %v1368_v7 = vld [vmem:[%s2080_s0 + $0x8] sm:$0xff]  }
   0x4   :  { %26 = vst.msk [vmem:[#allocation2 + $0x30] sm:$0xff] %vm19_vm0, %v1398_v1  ;;  %27 = vst.msk [vmem:[#allocation2 + $0x38] sm:$0xff] %vm19_vm0, %v1398_v1  ;;  %1286 = vmatprep.subr.bf16.mxu0 %v1364_v2  ;;  %1355 = vmatprep.subr.bf16.mxu1 %v1364_v2  ;;  %v1369_v8 = vld [vmem:[%s2080_s0 + $0x88] sm:$0xff]   ;;  %v1370_v9 = vld [vmem:[%s2080_s0 + $0x10] sm:$0xff]  }
   0x5   :  { %28 = vst.msk [vmem:[#allocation2 + $0x40] sm:$0xff] %vm19_vm0, %v1398_v1  ;;  %29 = vst.msk [vmem:[#allocation2 + $0x48] sm:$0xff] %vm19_vm0, %v1398_v1  ;;  %1290 = vmatprep.mubr.msk.bf16.mxu0 %vm392_vm1, %v1366_v4  ;;  %1322 = vmatprep.mubr.msk.bf16.mxu1 %vm392_vm1, %v1367_v5  ;;  %v1371_v10 = vld [vmem:[%s2080_s0 + $0x90] sm:$0xff]   ;;  %v1372_v11 = vld [vmem:[%s2080_s0 + $0x18] sm:$0xff]  }
   0x6   :  { %30 = vst.msk [vmem:[#allocation2 + $0x50] sm:$0xff] %vm19_vm0, %v1398_v1  ;;  %31 = vst.msk [vmem:[#allocation2 + $0x58] sm:$0xff] %vm19_vm0, %v1398_v1  ;;  %v1373_v12 = vld [vmem:[%s2080_s0 + $0x98] sm:$0xff]   ;;  %v1374_v13 = vld [vmem:[%s2080_s0 + $0x20] sm:$0xff]  }
   0x7   :  { %32 = vst.msk [vmem:[#allocation2 + $0x60] sm:$0xff] %vm19_vm0, %v1398_v1  ;;  %33 = vst.msk [vmem:[#allocation2 + $0x68] sm:$0xff] %vm19_vm0, %v1398_v1  ;;  %1287 = vmatpush3.bf16.msra.mxu0 %v1364_v2  ;;  %1358 = vmatpush3.bf16.msra.mxu1 %v1364_v2  ;;  %v1375_v14 = vld [vmem:[%s2080_s0 + $0xa0] sm:$0xff]   ;;  %v1376_v15 = vld [vmem:[%s2080_s0 + $0x28] sm:$0xff]  }
   0x8   :  { %34 = vst.msk [vmem:[#allocation2 + $0x70] sm:$0xff] %vm19_vm0, %v1398_v1  ;;  %35 = vst.msk [vmem:[#allocation2 + $0x78] sm:$0xff] %vm19_vm0, %v1398_v1  ;;  %1360 = vmatprep.subr.msk.bf16.mxu0 %vm489_vm2, %v1365_v3  ;;  %1361 = vmatprep.subr.msk.bf16.mxu1 %vm489_vm2, %v1365_v3  ;;  %v1377_v16 = vld [vmem:[%s2080_s0 + $0xa8] sm:$0xff]   ;;  %v1378_v17 = vld [vmem:[%s2080_s0 + $0x30] sm:$0xff]  }
   0x9   :  { %36 = vst.msk [vmem:[#allocation2 + $0x80] sm:$0xff] %vm19_vm0, %v1398_v1  ;;  %37 = vst.msk [vmem:[#allocation2 + $0x88] sm:$0xff] %vm19_vm0, %v1398_v1  ;;  %v1379_v18 = vld [vmem:[%s2080_s0 + $0xb0] sm:$0xff]   ;;  %v1380_v19 = vld [vmem:[%s2080_s0 + $0x38] sm:$0xff]  }
   0xa   :  { %38 = vst.msk [vmem:[#allocation2 + $0x90] sm:$0xff] %vm19_vm0, %v1398_v1  ;;  %39 = vst.msk [vmem:[#allocation2 + $0x98] sm:$0xff] %vm19_vm0, %v1398_v1  ;;  %v1381_v20 = vld [vmem:[%s2080_s0 + $0xb8] sm:$0xff]   ;;  %v1382_v21 = vld [vmem:[%s2080_s0 + $0x40] sm:$0xff]  }
   0xb   :  { %40 = vst.msk [vmem:[#allocation2 + $0xa0] sm:$0xff] %vm19_vm0, %v1398_v1  ;;  %41 = vst.msk [vmem:[#allocation2 + $0xa8] sm:$0xff] %vm19_vm0, %v1398_v1  ;;  %1289 = vmatpush3.bf16.msra.mxu0 %v491_v6  ;;  %1359 = vmatpush3.bf16.msra.mxu1 %v491_v6  ;;  %v1383_v22 = vld [vmem:[%s2080_s0 + $0xc0] sm:$0xff]   ;;  %v1384_v23 = vld [vmem:[%s2080_s0 + $0x48] sm:$0xff]  }
   0xc   :  { %42 = vst.msk [vmem:[#allocation2 + $0xb0] sm:$0xff] %vm19_vm0, %v1398_v1  ;;  %43 = vst.msk [vmem:[#allocation2 + $0xb8] sm:$0xff] %vm19_vm0, %v1398_v1  ;;  %v1385_v24 = vld [vmem:[%s2080_s0 + $0xc8] sm:$0xff]   ;;  %v1386_v25 = vld [vmem:[%s2080_s0 + $0x50] sm:$0xff]  }
   0xd   :  { %44 = vst.msk [vmem:[#allocation2 + $0xc0] sm:$0xff] %vm19_vm0, %v1398_v1  ;;  %45 = vst.msk [vmem:[#allocation2 + $0xc8] sm:$0xff] %vm19_vm0, %v1398_v1  ;;  %v1387_v26 = vld [vmem:[%s2080_s0 + $0xd0] sm:$0xff]   ;;  %v1388_v27 = vld [vmem:[%s2080_s0 + $0x58] sm:$0xff]  }
   0xe   :  { %46 = vst.msk [vmem:[#allocation2 + $0xd0] sm:$0xff] %vm19_vm0, %v1398_v1  ;;  %47 = vst.msk [vmem:[#allocation2 + $0xd8] sm:$0xff] %vm19_vm0, %v1398_v1  ;;  %1291 = vmatmul.mubr.msk.bf16.vlgmr.msra.gmra.mrb[0].mxu0 %vm392_vm1, %v1368_v7  ;;  %1323 = vmatmul.mubr.msk.bf16.vlgmr.msra.gmra.mrb[0].mxu1 %vm392_vm1, %v1369_v8  ;;  %v1389_v28 = vld [vmem:[%s2080_s0 + $0xd8] sm:$0xff]   ;;  %v1390_v29 = vld [vmem:[%s2080_s0 + $0x60] sm:$0xff]  }
   0xf   :  { %48 = vst.msk [vmem:[#allocation2 + $0xe0] sm:$0xff] %vm19_vm0, %v1398_v1  ;;  %49 = vst.msk [vmem:[#allocation2 + $0xe8] sm:$0xff] %vm19_vm0, %v1398_v1  ;;  %1294 = vmatprep.mubr.msk.bf16.mxu0 %vm392_vm1, %v1370_v9  ;;  %1326 = vmatprep.mubr.msk.bf16.mxu1 %vm392_vm1, %v1371_v10  ;;  %v1391_v30 = vld [vmem:[%s2080_s0 + $0xe0] sm:$0xff]   ;;  %v1392_v31 = vld [vmem:[%s2080_s0 + $0x68] sm:$0xff]  }
  0x10   :  { %50 = vst.msk [vmem:[#allocation2 + $0xf0] sm:$0xff] %vm19_vm0, %v1398_v1  ;;  %51 = vst.msk [vmem:[#allocation2 + $0xf8] sm:$0xff] %vm19_vm0, %v1398_v1  ;;  %v1393_v32 = vld [vmem:[%s2080_s0 + $0xe8] sm:$0xff]   ;;  %v1394_v33 = vld [vmem:[%s2080_s0 + $0x70] sm:$0xff]  }
  0x11   :  { %52 = vst.msk [vmem:[#allocation2 + $0x100] sm:$0xff] %vm19_vm0, %v1398_v1  ;;  %53 = vst.msk [vmem:[#allocation2 + $0x108] sm:$0xff] %vm19_vm0, %v1398_v1  ;;  %v1395_v34 = vld [vmem:[%s2080_s0 + $0xf0] sm:$0xff]   ;;  %v1396_v35 = vld [vmem:[%s2080_s0 + $0x78] sm:$0xff]  }
  0x12   :  { %54 = vst.msk [vmem:[#allocation2 + $0x110] sm:$0xff] %vm19_vm0, %v1398_v1  ;;  %55 = vst.msk [vmem:[#allocation2 + $0x118] sm:$0xff] %vm19_vm0, %v1398_v1  ;;  %v1397_v36 = vld [vmem:[%s2080_s0 + $0xf8] sm:$0xff]   ;;  %v86_v37 = vld [vmem:[#allocation2 + $0x10] sm:$0xff] }
  0x13   :  { %56 = vst.msk [vmem:[#allocation2 + $0x120] sm:$0xff] %vm19_vm0, %v1398_v1  ;;  %57 = vst.msk [vmem:[#allocation2 + $0x128] sm:$0xff] %vm19_vm0, %v1398_v1  ;;  %v84_v39 = vld [vmem:[#allocation2] sm:$0xff]  ;;  %v87_v43 = vld [vmem:[#allocation2 + $0x18] sm:$0xff] }
  0x14   :  { %58 = vst.msk [vmem:[#allocation2 + $0x130] sm:$0xff] %vm19_vm0, %v1398_v1  ;;  %59 = vst.msk [vmem:[#allocation2 + $0x138] sm:$0xff] %vm19_vm0, %v1398_v1  ;;  %v85_v49 = vld [vmem:[#allocation2 + $0x8] sm:$0xff]  ;;  %v90_v61 = vld [vmem:[#allocation2 + $0x30] sm:$0xff] }
  0x15   :  { %60 = vst.msk [vmem:[#allocation2 + $0x140] sm:$0xff] %vm19_vm0, %v1398_v1  ;;  %61 = vst.msk [vmem:[#allocation2 + $0x148] sm:$0xff] %vm19_vm0, %v1398_v1  ;;  %v88_v63 = vld [vmem:[#allocation2 + $0x20] sm:$0xff]  ;;  %v91_v4 = vld [vmem:[#allocation2 + $0x38] sm:$0xff] }
  0x16   :  { %62 = vst.msk [vmem:[#allocation2 + $0x150] sm:$0xff] %vm19_vm0, %v1398_v1  ;;  %63 = vst.msk [vmem:[#allocation2 + $0x158] sm:$0xff] %vm19_vm0, %v1398_v1  ;;  %1295 = vmatmul.mubr.msk.bf16.gmra.mrb[4].mxu0 %vm392_vm1, %v1372_v11  ;;  %1327 = vmatmul.mubr.msk.bf16.gmra.mrb[4].mxu1 %vm392_vm1, %v1373_v12  ;;  %v89_v10 = vld [vmem:[#allocation2 + $0x28] sm:$0xff] }
  0x17   :  { %64 = vst.msk [vmem:[#allocation2 + $0x160] sm:$0xff] %vm19_vm0, %v1398_v1  ;;  %65 = vst.msk [vmem:[#allocation2 + $0x168] sm:$0xff] %vm19_vm0, %v1398_v1  ;;  %1298 = vmatprep.mubr.msk.bf16.mxu0 %vm392_vm1, %v1374_v13  ;;  %1330 = vmatprep.mubr.msk.bf16.mxu1 %vm392_vm1, %v1375_v14 }
  0x18   :  { %66 = vst.msk [vmem:[#allocation2 + $0x170] sm:$0xff] %vm19_vm0, %v1398_v1  ;;  %67 = vst.msk [vmem:[#allocation2 + $0x178] sm:$0xff] %vm19_vm0, %v1398_v1  ;;  %v116_v40 = vld [vmem:[#allocation2 + $0x100] sm:$0xff]  ;;  %v117_v50 = vld [vmem:[#allocation2 + $0x108] sm:$0xff] }
  0x19   :  { %68 = vst.msk [vmem:[#allocation2 + $0x180] sm:$0xff] %vm19_vm0, %v1398_v1  ;;  %69 = vst.msk [vmem:[#allocation2 + $0x188] sm:$0xff] %vm19_vm0, %v1398_v1  ;;  %v118_v38 = vld [vmem:[#allocation2 + $0x110] sm:$0xff]  ;;  %v119_v44 = vld [vmem:[#allocation2 + $0x118] sm:$0xff] }
  0x1a   :  { %70 = vst.msk [vmem:[#allocation2 + $0x190] sm:$0xff] %vm19_vm0, %v1398_v1  ;;  %71 = vst.msk [vmem:[#allocation2 + $0x198] sm:$0xff] %vm19_vm0, %v1398_v1  ;;  %v120_v0 = vld [vmem:[#allocation2 + $0x120] sm:$0xff]  ;;  %v121_v11 = vld [vmem:[#allocation2 + $0x128] sm:$0xff] }
  0x1b   :  { %72 = vst.msk [vmem:[#allocation2 + $0x1a0] sm:$0xff] %vm19_vm0, %v1398_v1  ;;  %73 = vst.msk [vmem:[#allocation2 + $0x1a8] sm:$0xff] %vm19_vm0, %v1398_v1  ;;  %v122_v62 = vld [vmem:[#allocation2 + $0x130] sm:$0xff]  ;;  %v123_v5 = vld [vmem:[#allocation2 + $0x138] sm:$0xff] }
  0x1c   :  { %74 = vst.msk [vmem:[#allocation2 + $0x1b0] sm:$0xff] %vm19_vm0, %v1398_v1  ;;  %75 = vst.msk [vmem:[#allocation2 + $0x1b8] sm:$0xff] %vm19_vm0, %v1398_v1 }
  0x1d   :  { %76 = vst.msk [vmem:[#allocation2 + $0x1c0] sm:$0xff] %vm19_vm0, %v1398_v1  ;;  %77 = vst.msk [vmem:[#allocation2 + $0x1c8] sm:$0xff] %vm19_vm0, %v1398_v1 }
  0x1e   :  { %78 = vst.msk [vmem:[#allocation2 + $0x1d0] sm:$0xff] %vm19_vm0, %v1398_v1  ;;  %79 = vst.msk [vmem:[#allocation2 + $0x1d8] sm:$0xff] %vm19_vm0, %v1398_v1  ;;  %1299 = vmatmul.mubr.msk.bf16.gmra.mrb[8].mxu0 %vm392_vm1, %v1376_v15  ;;  %1331 = vmatmul.mubr.msk.bf16.gmra.mrb[8].mxu1 %vm392_vm1, %v1377_v16 }
  0x1f   :  { %80 = vst.msk [vmem:[#allocation2 + $0x1e0] sm:$0xff] %vm19_vm0, %v1398_v1  ;;  %81 = vst.msk [vmem:[#allocation2 + $0x1e8] sm:$0xff] %vm19_vm0, %v1398_v1  ;;  %1302 = vmatprep.mubr.msk.bf16.mxu0 %vm392_vm1, %v1378_v17  ;;  %1334 = vmatprep.mubr.msk.bf16.mxu1 %vm392_vm1, %v1379_v18 }
  0x20   :  { %82 = vst.msk [vmem:[#allocation2 + $0x1f0] sm:$0xff] %vm19_vm0, %v1398_v1  ;;  %83 = vst.msk [vmem:[#allocation2 + $0x1f8] sm:$0xff] %vm19_vm0, %v1398_v1  ;;  %v1701_v1 = vld [vmem:[%s2081_s2] ss:$0 sm:$0xff] }
  0x26   :  { %1303 = vmatmul.mubr.msk.bf16.gmra.mrb[12].mxu0 %vm392_vm1, %v1380_v19  ;;  %1335 = vmatmul.mubr.msk.bf16.gmra.mrb[12].mxu1 %vm392_vm1, %v1381_v20 }
  0x27   :  { %1306 = vmatprep.mubr.msk.bf16.mxu0 %vm392_vm1, %v1382_v21  ;;  %1338 = vmatprep.mubr.msk.bf16.mxu1 %vm392_vm1, %v1383_v22 }
  0x2e   :  { %1307 = vmatmul.mubr.msk.bf16.gmra.mrb[16].mxu0 %vm392_vm1, %v1384_v23  ;;  %1339 = vmatmul.mubr.msk.bf16.gmra.mrb[16].mxu1 %vm392_vm1, %v1385_v24 }
  0x2f   :  { %1310 = vmatprep.mubr.msk.bf16.mxu0 %vm392_vm1, %v1386_v25  ;;  %1342 = vmatprep.mubr.msk.bf16.mxu1 %vm392_vm1, %v1387_v26 }
  0x36   :  { %1311 = vmatmul.mubr.msk.bf16.gmra.mrb[20].mxu0 %vm392_vm1, %v1388_v27  ;;  %1343 = vmatmul.mubr.msk.bf16.gmra.mrb[20].mxu1 %vm392_vm1, %v1389_v28 }
  0x37   :  { %1314 = vmatprep.mubr.msk.bf16.mxu0 %vm392_vm1, %v1390_v29  ;;  %1346 = vmatprep.mubr.msk.bf16.mxu1 %vm392_vm1, %v1391_v30 }
  0x3e   :  { %1315 = vmatmul.mubr.msk.bf16.gmra.mrb[24].mxu0 %vm392_vm1, %v1392_v31  ;;  %1347 = vmatmul.mubr.msk.bf16.gmra.mrb[24].mxu1 %vm392_vm1, %v1393_v32 }
  0x3f   :  { %1318 = vmatprep.mubr.msk.bf16.mxu0 %vm392_vm1, %v1394_v33  ;;  %1350 = vmatprep.mubr.msk.bf16.mxu1 %vm392_vm1, %v1395_v34 }
  0x46   :  { %1319 = vmatmul.mubr.msk.bf16.gmra.mrb[28].mxu0 %vm392_vm1, %v1396_v35  ;;  %1351 = vmatmul.mubr.msk.bf16.gmra.mrb[28].mxu1 %vm392_vm1, %v1397_v36 }
  0xe1   :  { %v1292_v41 = vpop.f32.mrb[0].mxu0  ;;  %v1324_v42 = vpop.f32.mrb[0].mxu1 }
  0xe2   :  { %v784_v45 = vadd.f32 %v1292_v41, %v86_v37  ;;  %v816_v46 = vadd.f32 %v1324_v42, %v118_v38  ;;  %v527_v47 = vpop.f32.mrb[1].mxu0  ;;  %v655_v48 = vpop.f32.mrb[1].mxu1  ;;  %v94_v42 = vld [vmem:[#allocation2 + $0x50] sm:$0xff] }
  0xe3   :  { %v782_v51 = vadd.f32 %v527_v47, %v84_v39  ;;  %v814_v52 = vadd.f32 %v655_v48, %v116_v40  ;;  %v1293_v53 = vpop.f32.mrb[2].mxu0  ;;  %v1325_v54 = vpop.f32.mrb[2].mxu1  ;;  %v124_v47 = vld [vmem:[#allocation2 + $0x140] sm:$0xff] }
  0xe4   :  { %849 = vst.msk [vmem:[#allocation2 + $0x10] sm:$0xff] %vm19_vm0, %v784_v45  ;;  %881 = vst.msk [vmem:[#allocation2 + $0x110] sm:$0xff] %vm19_vm0, %v816_v46  ;;  %v785_v55 = vadd.f32 %v1293_v53, %v87_v43  ;;  %v817_v56 = vadd.f32 %v1325_v54, %v119_v44  ;;  %v530_v57 = vpop.f32.mrb[3].mxu0  ;;  %v658_v58 = vpop.f32.mrb[3].mxu1  ;;  %v126_v43 = vld [vmem:[#allocation2 + $0x150] sm:$0xff]  ;;  %v92_v46 = vld [vmem:[#allocation2 + $0x40] sm:$0xff] }
  0xe5   :  { %847 = vst.msk [vmem:[#allocation2] sm:$0xff] %vm19_vm0, %v782_v51  ;;  %879 = vst.msk [vmem:[#allocation2 + $0x100] sm:$0xff] %vm19_vm0, %v814_v52  ;;  %v783_v59 = vadd.f32 %v530_v57, %v85_v49  ;;  %v815_v60 = vadd.f32 %v658_v58, %v117_v50  ;;  %v95_v52 = vld [vmem:[#allocation2 + $0x58] sm:$0xff]  ;;  %v93_v58 = vld [vmem:[#allocation2 + $0x48] sm:$0xff] }
  0xe6   :  { %850 = vst.msk [vmem:[#allocation2 + $0x18] sm:$0xff] %vm19_vm0, %v785_v55  ;;  %882 = vst.msk [vmem:[#allocation2 + $0x118] sm:$0xff] %vm19_vm0, %v817_v56  ;;  %v127_v53 = vld [vmem:[#allocation2 + $0x158] sm:$0xff] }
  0xe7   :  { %848 = vst.msk [vmem:[#allocation2 + $0x8] sm:$0xff] %vm19_vm0, %v783_v59  ;;  %880 = vst.msk [vmem:[#allocation2 + $0x108] sm:$0xff] %vm19_vm0, %v815_v60  ;;  %v125_v59 = vld [vmem:[#allocation2 + $0x148] sm:$0xff] }
  0xe9   :  { %v1296_v2 = vpop.f32.mrb[4].mxu0  ;;  %v1328_v3 = vpop.f32.mrb[4].mxu1 }
  0xea   :  { %v788_v6 = vadd.f32 %v1296_v2, %v90_v61  ;;  %v820_v7 = vadd.f32 %v1328_v3, %v122_v62  ;;  %v543_v8 = vpop.f32.mrb[5].mxu0  ;;  %v671_v9 = vpop.f32.mrb[5].mxu1 }
  0xeb   :  { %v916_v12 = vld [vmem:[#allocation2 + $0x10] sm:$0xff]  ;;  %v786_v14 = vadd.f32 %v543_v8, %v88_v63  ;;  %v818_v15 = vadd.f32 %v671_v9, %v120_v0  ;;  %v1297_v16 = vpop.f32.mrb[6].mxu0  ;;  %v1329_v17 = vpop.f32.mrb[6].mxu1 }
  0xec   :  { %v948_v13 = vld [vmem:[#allocation2 + $0x110] sm:$0xff]  ;;  %v987_v18 = vadd.f32 %v1701_v1, %v916_v12  ;;  %v914_v20 = vld [vmem:[#allocation2] sm:$0xff]  ;;  %853 = vst.msk [vmem:[#allocation2 + $0x30] sm:$0xff] %vm19_vm0, %v788_v6  ;;  %885 = vst.msk [vmem:[#allocation2 + $0x130] sm:$0xff] %vm19_vm0, %v820_v7  ;;  %v789_v22 = vadd.f32 %v1297_v16, %v91_v4  ;;  %v821_v23 = vadd.f32 %v1329_v17, %v123_v5  ;;  %v546_v24 = vpop.f32.mrb[7].mxu0  ;;  %v674_v25 = vpop.f32.mrb[7].mxu1 }
  0xed   :  { %v1019_v19 = vadd.f32 %v1701_v1, %v948_v13  ;;  %v946_v21 = vld [vmem:[#allocation2 + $0x100] sm:$0xff]  ;;  %v985_v26 = vadd.f32 %v1701_v1, %v914_v20  ;;  %v917_v28 = vld [vmem:[#allocation2 + $0x18] sm:$0xff]  ;;  %851 = vst.msk [vmem:[#allocation2 + $0x20] sm:$0xff] %vm19_vm0, %v786_v14  ;;  %883 = vst.msk [vmem:[#allocation2 + $0x120] sm:$0xff] %vm19_vm0, %v818_v15  ;;  %v787_v30 = vadd.f32 %v546_v24, %v89_v10 }
  0xee   :  { %v1017_v27 = vadd.f32 %v1701_v1, %v946_v21  ;;  %v949_v29 = vld [vmem:[#allocation2 + $0x118] sm:$0xff]  ;;  %v819_v31 = vadd.f32 %v674_v25, %v121_v11  ;;  %v1051_v32 = vmax.f32 %v987_v18, 0.0  ;;  %v988_v34 = vadd.f32 %v1701_v1, %v917_v28  ;;  %v915_v36 = vld [vmem:[#allocation2 + $0x8] sm:$0xff]  ;;  %854 = vst.msk [vmem:[#allocation2 + $0x38] sm:$0xff] %vm19_vm0, %v789_v22  ;;  %886 = vst.msk [vmem:[#allocation2 + $0x138] sm:$0xff] %vm19_vm0, %v821_v23 }
  0xef   :  { %v1083_v33 = vmax.f32 %v1019_v19, 0.0  ;;  %v1020_v35 = vadd.f32 %v1701_v1, %v949_v29  ;;  %v947_v37 = vld [vmem:[#allocation2 + $0x108] sm:$0xff]  ;;  %v1049_v38 = vmax.f32 %v985_v26, 0.0  ;;  %v986_v40 = vadd.f32 %v1701_v1, %v915_v36  ;;  %852 = vst.msk [vmem:[#allocation2 + $0x28] sm:$0xff] %vm19_vm0, %v787_v30  ;;  %v130_v28 = vld [vmem:[#allocation2 + $0x170] sm:$0xff] }
  0xf0   :  { %v1081_v39 = vmax.f32 %v1017_v27, 0.0  ;;  %v1018_v41 = vadd.f32 %v1701_v1, %v947_v37  ;;  %884 = vst.msk [vmem:[#allocation2 + $0x128] sm:$0xff] %vm19_vm0, %v819_v31  ;;  %1115 = vst.msk [vmem:[%s2082_s3 + $0x10] sm:$0xff] %vm19_vm0, %v1051_v32  ;;  %v1052_v44 = vmax.f32 %v988_v34, 0.0  ;;  %v98_v27 = vld [vmem:[#allocation2 + $0x70] sm:$0xff]  ;;  %v96_v31 = vld [vmem:[#allocation2 + $0x60] sm:$0xff] }
  0xf1   :  { %1147 = vst.msk [vmem:[%s2082_s3 + $0x110] sm:$0xff] %vm19_vm0, %v1083_v33  ;;  %v1084_v45 = vmax.f32 %v1020_v35, 0.0  ;;  %1113 = vst.msk [vmem:[%s2082_s3] sm:$0xff] %vm19_vm0, %v1049_v38  ;;  %v1050_v48 = vmax.f32 %v986_v40, 0.0  ;;  %v1300_v50 = vpop.f32.mrb[8].mxu0  ;;  %v1332_v51 = vpop.f32.mrb[8].mxu1 }
  0xf2   :  { %1145 = vst.msk [vmem:[%s2082_s3 + $0x100] sm:$0xff] %vm19_vm0, %v1081_v39  ;;  %v1082_v49 = vmax.f32 %v1018_v41, 0.0  ;;  %1116 = vst.msk [vmem:[%s2082_s3 + $0x18] sm:$0xff] %vm19_vm0, %v1052_v44  ;;  %v792_v54 = vadd.f32 %v1300_v50, %v94_v42  ;;  %v824_v55 = vadd.f32 %v1332_v51, %v126_v43  ;;  %v559_v56 = vpop.f32.mrb[9].mxu0  ;;  %v687_v57 = vpop.f32.mrb[9].mxu1  ;;  %v128_v32 = vld [vmem:[#allocation2 + $0x160] sm:$0xff] }
  0xf3   :  { %1148 = vst.msk [vmem:[%s2082_s3 + $0x118] sm:$0xff] %vm19_vm0, %v1084_v45  ;;  %1114 = vst.msk [vmem:[%s2082_s3 + $0x8] sm:$0xff] %vm19_vm0, %v1050_v48  ;;  %v920_v60 = vld [vmem:[#allocation2 + $0x30] sm:$0xff]  ;;  %v790_v62 = vadd.f32 %v559_v56, %v92_v46  ;;  %v822_v63 = vadd.f32 %v687_v57, %v124_v47  ;;  %v1301_v0 = vpop.f32.mrb[10].mxu0  ;;  %v1333_v2 = vpop.f32.mrb[10].mxu1  ;;  %v99_v37 = vld [vmem:[#allocation2 + $0x78] sm:$0xff] }
  0xf4   :  { %1146 = vst.msk [vmem:[%s2082_s3 + $0x108] sm:$0xff] %vm19_vm0, %v1082_v49  ;;  %v952_v61 = vld [vmem:[#allocation2 + $0x130] sm:$0xff]  ;;  %v991_v3 = vadd.f32 %v1701_v1, %v920_v60  ;;  %v918_v5 = vld [vmem:[#allocation2 + $0x20] sm:$0xff]  ;;  %857 = vst.msk [vmem:[#allocation2 + $0x50] sm:$0xff] %vm19_vm0, %v792_v54  ;;  %v793_v7 = vadd.f32 %v1301_v0, %v95_v52  ;;  %v825_v8 = vadd.f32 %v1333_v2, %v127_v53  ;;  %v562_v9 = vpop.f32.mrb[11].mxu0  ;;  %v690_v10 = vpop.f32.mrb[11].mxu1 }
  0xf5   :  { %v1023_v4 = vadd.f32 %v1701_v1, %v952_v61  ;;  %v950_v6 = vld [vmem:[#allocation2 + $0x120] sm:$0xff]  ;;  %889 = vst.msk [vmem:[#allocation2 + $0x150] sm:$0xff] %vm19_vm0, %v824_v55  ;;  %v989_v11 = vadd.f32 %v1701_v1, %v918_v5  ;;  %v921_v13 = vld [vmem:[#allocation2 + $0x38] sm:$0xff]  ;;  %855 = vst.msk [vmem:[#allocation2 + $0x40] sm:$0xff] %vm19_vm0, %v790_v62  ;;  %v791_v15 = vadd.f32 %v562_v9, %v93_v58 }
  0xf6   :  { %v1021_v12 = vadd.f32 %v1701_v1, %v950_v6  ;;  %v953_v14 = vld [vmem:[#allocation2 + $0x138] sm:$0xff]  ;;  %887 = vst.msk [vmem:[#allocation2 + $0x140] sm:$0xff] %vm19_vm0, %v822_v63  ;;  %v823_v16 = vadd.f32 %v690_v10, %v125_v59  ;;  %v1055_v17 = vmax.f32 %v991_v3, 0.0  ;;  %v992_v19 = vadd.f32 %v1701_v1, %v921_v13  ;;  %v919_v21 = vld [vmem:[#allocation2 + $0x28] sm:$0xff]  ;;  %858 = vst.msk [vmem:[#allocation2 + $0x58] sm:$0xff] %vm19_vm0, %v793_v7 }
  0xf7   :  { %v1087_v18 = vmax.f32 %v1023_v4, 0.0  ;;  %v1024_v20 = vadd.f32 %v1701_v1, %v953_v14  ;;  %v951_v22 = vld [vmem:[#allocation2 + $0x128] sm:$0xff]  ;;  %890 = vst.msk [vmem:[#allocation2 + $0x158] sm:$0xff] %vm19_vm0, %v825_v8  ;;  %v1053_v23 = vmax.f32 %v989_v11, 0.0  ;;  %v990_v25 = vadd.f32 %v1701_v1, %v919_v21  ;;  %856 = vst.msk [vmem:[#allocation2 + $0x48] sm:$0xff] %vm19_vm0, %v791_v15  ;;  %v131_v38 = vld [vmem:[#allocation2 + $0x178] sm:$0xff] }
  0xf8   :  { %v1085_v24 = vmax.f32 %v1021_v12, 0.0  ;;  %v1022_v26 = vadd.f32 %v1701_v1, %v951_v22  ;;  %888 = vst.msk [vmem:[#allocation2 + $0x148] sm:$0xff] %vm19_vm0, %v823_v16  ;;  %1119 = vst.msk [vmem:[%s2082_s3 + $0x30] sm:$0xff] %vm19_vm0, %v1055_v17  ;;  %v1056_v29 = vmax.f32 %v992_v19, 0.0  ;;  %v97_v43 = vld [vmem:[#allocation2 + $0x68] sm:$0xff]  ;;  %v102_v12 = vld [vmem:[#allocation2 + $0x90] sm:$0xff] }
  0xf9   :  { %1151 = vst.msk [vmem:[%s2082_s3 + $0x130] sm:$0xff] %vm19_vm0, %v1087_v18  ;;  %v1088_v30 = vmax.f32 %v1024_v20, 0.0  ;;  %1117 = vst.msk [vmem:[%s2082_s3 + $0x20] sm:$0xff] %vm19_vm0, %v1053_v23  ;;  %v1054_v33 = vmax.f32 %v990_v25, 0.0  ;;  %v1304_v35 = vpop.f32.mrb[12].mxu0  ;;  %v1336_v36 = vpop.f32.mrb[12].mxu1 }
  0xfa   :  { %1149 = vst.msk [vmem:[%s2082_s3 + $0x120] sm:$0xff] %vm19_vm0, %v1085_v24  ;;  %v1086_v34 = vmax.f32 %v1022_v26, 0.0  ;;  %1120 = vst.msk [vmem:[%s2082_s3 + $0x38] sm:$0xff] %vm19_vm0, %v1056_v29  ;;  %v796_v39 = vadd.f32 %v1304_v35, %v98_v27  ;;  %v828_v40 = vadd.f32 %v1336_v36, %v130_v28  ;;  %v575_v41 = vpop.f32.mrb[13].mxu0  ;;  %v703_v42 = vpop.f32.mrb[13].mxu1  ;;  %v129_v44 = vld [vmem:[#allocation2 + $0x168] sm:$0xff] }
  0xfb   :  { %1152 = vst.msk [vmem:[%s2082_s3 + $0x138] sm:$0xff] %vm19_vm0, %v1088_v30  ;;  %1118 = vst.msk [vmem:[%s2082_s3 + $0x28] sm:$0xff] %vm19_vm0, %v1054_v33  ;;  %v924_v45 = vld [vmem:[#allocation2 + $0x50] sm:$0xff]  ;;  %v794_v47 = vadd.f32 %v575_v41, %v96_v31  ;;  %v826_v48 = vadd.f32 %v703_v42, %v128_v32  ;;  %v1305_v49 = vpop.f32.mrb[14].mxu0  ;;  %v1337_v50 = vpop.f32.mrb[14].mxu1  ;;  %v100_v16 = vld [vmem:[#allocation2 + $0x80] sm:$0xff] }
  0xfc   :  { %1150 = vst.msk [vmem:[%s2082_s3 + $0x128] sm:$0xff] %vm19_vm0, %v1086_v34  ;;  %v956_v46 = vld [vmem:[#allocation2 + $0x150] sm:$0xff]  ;;  %v995_v51 = vadd.f32 %v1701_v1, %v924_v45  ;;  %v922_v53 = vld [vmem:[#allocation2 + $0x40] sm:$0xff]  ;;  %861 = vst.msk [vmem:[#allocation2 + $0x70] sm:$0xff] %vm19_vm0, %v796_v39  ;;  %v797_v55 = vadd.f32 %v1305_v49, %v99_v37  ;;  %v829_v56 = vadd.f32 %v1337_v50, %v131_v38  ;;  %v578_v57 = vpop.f32.mrb[15].mxu0  ;;  %v706_v58 = vpop.f32.mrb[15].mxu1 }
  0xfd   :  { %v1027_v52 = vadd.f32 %v1701_v1, %v956_v46  ;;  %v954_v54 = vld [vmem:[#allocation2 + $0x140] sm:$0xff]  ;;  %893 = vst.msk [vmem:[#allocation2 + $0x170] sm:$0xff] %vm19_vm0, %v828_v40  ;;  %v993_v59 = vadd.f32 %v1701_v1, %v922_v53  ;;  %v925_v61 = vld [vmem:[#allocation2 + $0x58] sm:$0xff]  ;;  %859 = vst.msk [vmem:[#allocation2 + $0x60] sm:$0xff] %vm19_vm0, %v794_v47  ;;  %v795_v63 = vadd.f32 %v578_v57, %v97_v43 }
  0xfe   :  { %v1025_v60 = vadd.f32 %v1701_v1, %v954_v54  ;;  %v957_v62 = vld [vmem:[#allocation2 + $0x158] sm:$0xff]  ;;  %891 = vst.msk [vmem:[#allocation2 + $0x160] sm:$0xff] %vm19_vm0, %v826_v48  ;;  %v827_v0 = vadd.f32 %v706_v58, %v129_v44  ;;  %v1059_v2 = vmax.f32 %v995_v51, 0.0  ;;  %v996_v4 = vadd.f32 %v1701_v1, %v925_v61  ;;  %v923_v6 = vld [vmem:[#allocation2 + $0x48] sm:$0xff]  ;;  %862 = vst.msk [vmem:[#allocation2 + $0x78] sm:$0xff] %vm19_vm0, %v797_v55 }
  0xff   :  { %v1091_v3 = vmax.f32 %v1027_v52, 0.0  ;;  %v1028_v5 = vadd.f32 %v1701_v1, %v957_v62  ;;  %v955_v7 = vld [vmem:[#allocation2 + $0x148] sm:$0xff]  ;;  %894 = vst.msk [vmem:[#allocation2 + $0x178] sm:$0xff] %vm19_vm0, %v829_v56  ;;  %v1057_v8 = vmax.f32 %v993_v59, 0.0  ;;  %v994_v10 = vadd.f32 %v1701_v1, %v923_v6  ;;  %860 = vst.msk [vmem:[#allocation2 + $0x68] sm:$0xff] %vm19_vm0, %v795_v63  ;;  %v134_v13 = vld [vmem:[#allocation2 + $0x190] sm:$0xff] }
 0x100   :  { %v1089_v9 = vmax.f32 %v1025_v60, 0.0  ;;  %v1026_v11 = vadd.f32 %v1701_v1, %v955_v7  ;;  %892 = vst.msk [vmem:[#allocation2 + $0x168] sm:$0xff] %vm19_vm0, %v827_v0  ;;  %1123 = vst.msk [vmem:[%s2082_s3 + $0x50] sm:$0xff] %vm19_vm0, %v1059_v2  ;;  %v1060_v14 = vmax.f32 %v996_v4, 0.0  ;;  %v132_v17 = vld [vmem:[#allocation2 + $0x180] sm:$0xff]  ;;  %v103_v22 = vld [vmem:[#allocation2 + $0x98] sm:$0xff] }
 0x101   :  { %1155 = vst.msk [vmem:[%s2082_s3 + $0x150] sm:$0xff] %vm19_vm0, %v1091_v3  ;;  %v1092_v15 = vmax.f32 %v1028_v5, 0.0  ;;  %1121 = vst.msk [vmem:[%s2082_s3 + $0x40] sm:$0xff] %vm19_vm0, %v1057_v8  ;;  %v1058_v18 = vmax.f32 %v994_v10, 0.0  ;;  %v1308_v20 = vpop.f32.mrb[16].mxu0  ;;  %v1340_v21 = vpop.f32.mrb[16].mxu1 }
 0x102   :  { %1153 = vst.msk [vmem:[%s2082_s3 + $0x140] sm:$0xff] %vm19_vm0, %v1089_v9  ;;  %v1090_v19 = vmax.f32 %v1026_v11, 0.0  ;;  %v135_v23 = vld [vmem:[#allocation2 + $0x198] sm:$0xff]  ;;  %1124 = vst.msk [vmem:[%s2082_s3 + $0x58] sm:$0xff] %vm19_vm0, %v1060_v14  ;;  %v800_v24 = vadd.f32 %v1308_v20, %v102_v12  ;;  %v832_v25 = vadd.f32 %v1340_v21, %v134_v13  ;;  %v591_v26 = vpop.f32.mrb[17].mxu0  ;;  %v719_v27 = vpop.f32.mrb[17].mxu1 }
 0x103   :  { %1156 = vst.msk [vmem:[%s2082_s3 + $0x158] sm:$0xff] %vm19_vm0, %v1092_v15  ;;  %v101_v28 = vld [vmem:[#allocation2 + $0x88] sm:$0xff]  ;;  %1122 = vst.msk [vmem:[%s2082_s3 + $0x48] sm:$0xff] %vm19_vm0, %v1058_v18  ;;  %v928_v30 = vld [vmem:[#allocation2 + $0x70] sm:$0xff]  ;;  %v798_v32 = vadd.f32 %v591_v26, %v100_v16  ;;  %v830_v33 = vadd.f32 %v719_v27, %v132_v17  ;;  %v1309_v34 = vpop.f32.mrb[18].mxu0  ;;  %v1341_v35 = vpop.f32.mrb[18].mxu1 }
 0x104   :  { %v133_v29 = vld [vmem:[#allocation2 + $0x188] sm:$0xff]  ;;  %1154 = vst.msk [vmem:[%s2082_s3 + $0x148] sm:$0xff] %vm19_vm0, %v1090_v19  ;;  %v960_v31 = vld [vmem:[#allocation2 + $0x170] sm:$0xff]  ;;  %v999_v36 = vadd.f32 %v1701_v1, %v928_v30  ;;  %v926_v38 = vld [vmem:[#allocation2 + $0x60] sm:$0xff]  ;;  %v801_v40 = vadd.f32 %v1309_v34, %v103_v22  ;;  %v833_v41 = vadd.f32 %v1341_v35, %v135_v23  ;;  %v594_v42 = vpop.f32.mrb[19].mxu0  ;;  %v722_v43 = vpop.f32.mrb[19].mxu1 }
 0x105   :  { %v1031_v37 = vadd.f32 %v1701_v1, %v960_v31  ;;  %v958_v39 = vld [vmem:[#allocation2 + $0x160] sm:$0xff]  ;;  %865 = vst.msk [vmem:[#allocation2 + $0x90] sm:$0xff] %vm19_vm0, %v800_v24  ;;  %897 = vst.msk [vmem:[#allocation2 + $0x190] sm:$0xff] %vm19_vm0, %v832_v25  ;;  %v997_v44 = vadd.f32 %v1701_v1, %v926_v38  ;;  %v929_v46 = vld [vmem:[#allocation2 + $0x78] sm:$0xff]  ;;  %v799_v48 = vadd.f32 %v594_v42, %v101_v28 }
 0x106   :  { %v1029_v45 = vadd.f32 %v1701_v1, %v958_v39  ;;  %v961_v47 = vld [vmem:[#allocation2 + $0x178] sm:$0xff]  ;;  %863 = vst.msk [vmem:[#allocation2 + $0x80] sm:$0xff] %vm19_vm0, %v798_v32  ;;  %895 = vst.msk [vmem:[#allocation2 + $0x180] sm:$0xff] %vm19_vm0, %v830_v33  ;;  %v831_v49 = vadd.f32 %v722_v43, %v133_v29  ;;  %v1063_v50 = vmax.f32 %v999_v36, 0.0  ;;  %v1000_v52 = vadd.f32 %v1701_v1, %v929_v46  ;;  %v927_v54 = vld [vmem:[#allocation2 + $0x68] sm:$0xff] }
 0x107   :  { %v1095_v51 = vmax.f32 %v1031_v37, 0.0  ;;  %v1032_v53 = vadd.f32 %v1701_v1, %v961_v47  ;;  %v959_v55 = vld [vmem:[#allocation2 + $0x168] sm:$0xff]  ;;  %866 = vst.msk [vmem:[#allocation2 + $0x98] sm:$0xff] %vm19_vm0, %v801_v40  ;;  %898 = vst.msk [vmem:[#allocation2 + $0x198] sm:$0xff] %vm19_vm0, %v833_v41  ;;  %v1061_v56 = vmax.f32 %v997_v44, 0.0  ;;  %v998_v58 = vadd.f32 %v1701_v1, %v927_v54  ;;  %v106_v60 = vld [vmem:[#allocation2 + $0xb0] sm:$0xff] }
 0x108   :  { %v1093_v57 = vmax.f32 %v1029_v45, 0.0  ;;  %v1030_v59 = vadd.f32 %v1701_v1, %v959_v55  ;;  %864 = vst.msk [vmem:[#allocation2 + $0x88] sm:$0xff] %vm19_vm0, %v799_v48  ;;  %896 = vst.msk [vmem:[#allocation2 + $0x188] sm:$0xff] %vm19_vm0, %v831_v49  ;;  %v138_v61 = vld [vmem:[#allocation2 + $0x1b0] sm:$0xff]  ;;  %v1064_v62 = vmax.f32 %v1000_v52, 0.0  ;;  %v104_v0 = vld [vmem:[#allocation2 + $0xa0] sm:$0xff] }
 0x109   :  { %1127 = vst.msk [vmem:[%s2082_s3 + $0x70] sm:$0xff] %vm19_vm0, %v1063_v50  ;;  %1159 = vst.msk [vmem:[%s2082_s3 + $0x170] sm:$0xff] %vm19_vm0, %v1095_v51  ;;  %v1096_v63 = vmax.f32 %v1032_v53, 0.0  ;;  %v136_v2 = vld [vmem:[#allocation2 + $0x1a0] sm:$0xff]  ;;  %v1062_v3 = vmax.f32 %v998_v58, 0.0  ;;  %v1312_v5 = vpop.f32.mrb[20].mxu0 }
 0x10a   :  { %1125 = vst.msk [vmem:[%s2082_s3 + $0x60] sm:$0xff] %vm19_vm0, %v1061_v56  ;;  %1157 = vst.msk [vmem:[%s2082_s3 + $0x160] sm:$0xff] %vm19_vm0, %v1093_v57  ;;  %v1094_v4 = vmax.f32 %v1030_v59, 0.0  ;;  %v1344_v6 = vpop.f32.mrb[20].mxu1  ;;  %v107_v7 = vld [vmem:[#allocation2 + $0xb8] sm:$0xff]  ;;  %v804_v9 = vadd.f32 %v1312_v5, %v106_v60  ;;  %v607_v11 = vpop.f32.mrb[21].mxu0 }
 0x10b   :  { %v139_v8 = vld [vmem:[#allocation2 + $0x1b8] sm:$0xff]  ;;  %1128 = vst.msk [vmem:[%s2082_s3 + $0x78] sm:$0xff] %vm19_vm0, %v1064_v62  ;;  %1160 = vst.msk [vmem:[%s2082_s3 + $0x178] sm:$0xff] %vm19_vm0, %v1096_v63  ;;  %v836_v10 = vadd.f32 %v1344_v6, %v138_v61  ;;  %v735_v12 = vpop.f32.mrb[21].mxu1  ;;  %v105_v13 = vld [vmem:[#allocation2 + $0xa8] sm:$0xff]  ;;  %v802_v17 = vadd.f32 %v607_v11, %v104_v0  ;;  %v1313_v19 = vpop.f32.mrb[22].mxu0 }
 0x10c   :  { %v137_v14 = vld [vmem:[#allocation2 + $0x1a8] sm:$0xff]  ;;  %1126 = vst.msk [vmem:[%s2082_s3 + $0x68] sm:$0xff] %vm19_vm0, %v1062_v3  ;;  %1158 = vst.msk [vmem:[%s2082_s3 + $0x168] sm:$0xff] %vm19_vm0, %v1094_v4  ;;  %v932_v15 = vld [vmem:[#allocation2 + $0x90] sm:$0xff]  ;;  %v834_v18 = vadd.f32 %v735_v12, %v136_v2  ;;  %v1345_v20 = vpop.f32.mrb[22].mxu1  ;;  %v805_v25 = vadd.f32 %v1313_v19, %v107_v7  ;;  %v610_v27 = vpop.f32.mrb[23].mxu0 }
 0x10d   :  { %v964_v16 = vld [vmem:[#allocation2 + $0x190] sm:$0xff]  ;;  %v1003_v21 = vadd.f32 %v1701_v1, %v932_v15  ;;  %v930_v23 = vld [vmem:[#allocation2 + $0x80] sm:$0xff]  ;;  %869 = vst.msk [vmem:[#allocation2 + $0xb0] sm:$0xff] %vm19_vm0, %v804_v9  ;;  %901 = vst.msk [vmem:[#allocation2 + $0x1b0] sm:$0xff] %vm19_vm0, %v836_v10  ;;  %v837_v26 = vadd.f32 %v1345_v20, %v139_v8  ;;  %v738_v28 = vpop.f32.mrb[23].mxu1  ;;  %v803_v33 = vadd.f32 %v610_v27, %v105_v13 }
 0x10e   :  { %v1035_v22 = vadd.f32 %v1701_v1, %v964_v16  ;;  %v962_v24 = vld [vmem:[#allocation2 + $0x180] sm:$0xff]  ;;  %v1001_v29 = vadd.f32 %v1701_v1, %v930_v23  ;;  %v933_v31 = vld [vmem:[#allocation2 + $0x98] sm:$0xff]  ;;  %867 = vst.msk [vmem:[#allocation2 + $0xa0] sm:$0xff] %vm19_vm0, %v802_v17  ;;  %899 = vst.msk [vmem:[#allocation2 + $0x1a0] sm:$0xff] %vm19_vm0, %v834_v18  ;;  %v835_v34 = vadd.f32 %v738_v28, %v137_v14 }
 0x10f   :  { %v1033_v30 = vadd.f32 %v1701_v1, %v962_v24  ;;  %v965_v32 = vld [vmem:[#allocation2 + $0x198] sm:$0xff]  ;;  %v1067_v35 = vmax.f32 %v1003_v21, 0.0  ;;  %v1004_v37 = vadd.f32 %v1701_v1, %v933_v31  ;;  %v931_v39 = vld [vmem:[#allocation2 + $0x88] sm:$0xff]  ;;  %870 = vst.msk [vmem:[#allocation2 + $0xb8] sm:$0xff] %vm19_vm0, %v805_v25  ;;  %902 = vst.msk [vmem:[#allocation2 + $0x1b8] sm:$0xff] %vm19_vm0, %v837_v26 }
 0x110   :  { %v1099_v36 = vmax.f32 %v1035_v22, 0.0  ;;  %v1036_v38 = vadd.f32 %v1701_v1, %v965_v32  ;;  %v963_v40 = vld [vmem:[#allocation2 + $0x188] sm:$0xff]  ;;  %v1065_v41 = vmax.f32 %v1001_v29, 0.0  ;;  %v1002_v43 = vadd.f32 %v1701_v1, %v931_v39  ;;  %868 = vst.msk [vmem:[#allocation2 + $0xa8] sm:$0xff] %vm19_vm0, %v803_v33  ;;  %900 = vst.msk [vmem:[#allocation2 + $0x1a8] sm:$0xff] %vm19_vm0, %v835_v34  ;;  %v110_v45 = vld [vmem:[#allocation2 + $0xd0] sm:$0xff] }
 0x111   :  { %v1097_v42 = vmax.f32 %v1033_v30, 0.0  ;;  %v1034_v44 = vadd.f32 %v1701_v1, %v963_v40  ;;  %v142_v46 = vld [vmem:[#allocation2 + $0x1d0] sm:$0xff]  ;;  %1131 = vst.msk [vmem:[%s2082_s3 + $0x90] sm:$0xff] %vm19_vm0, %v1067_v35  ;;  %v1068_v47 = vmax.f32 %v1004_v37, 0.0  ;;  %v108_v49 = vld [vmem:[#allocation2 + $0xc0] sm:$0xff]  ;;  %v1316_v53 = vpop.f32.mrb[24].mxu0 }
 0x112   :  { %1163 = vst.msk [vmem:[%s2082_s3 + $0x190] sm:$0xff] %vm19_vm0, %v1099_v36  ;;  %v1100_v48 = vmax.f32 %v1036_v38, 0.0  ;;  %v140_v50 = vld [vmem:[#allocation2 + $0x1c0] sm:$0xff]  ;;  %1129 = vst.msk [vmem:[%s2082_s3 + $0x80] sm:$0xff] %vm19_vm0, %v1065_v41  ;;  %v1066_v51 = vmax.f32 %v1002_v43, 0.0  ;;  %v1348_v54 = vpop.f32.mrb[24].mxu1  ;;  %v808_v57 = vadd.f32 %v1316_v53, %v110_v45 }
 0x113   :  { %1161 = vst.msk [vmem:[%s2082_s3 + $0x180] sm:$0xff] %vm19_vm0, %v1097_v42  ;;  %v1098_v52 = vmax.f32 %v1034_v44, 0.0  ;;  %v111_v55 = vld [vmem:[#allocation2 + $0xd8] sm:$0xff]  ;;  %1132 = vst.msk [vmem:[%s2082_s3 + $0x98] sm:$0xff] %vm19_vm0, %v1068_v47  ;;  %v840_v58 = vadd.f32 %v1348_v54, %v142_v46  ;;  %v623_v59 = vpop.f32.mrb[25].mxu0  ;;  %v751_v60 = vpop.f32.mrb[25].mxu1 }
 0x114   :  { %v143_v56 = vld [vmem:[#allocation2 + $0x1d8] sm:$0xff]  ;;  %1164 = vst.msk [vmem:[%s2082_s3 + $0x198] sm:$0xff] %vm19_vm0, %v1100_v48  ;;  %v109_v61 = vld [vmem:[#allocation2 + $0xc8] sm:$0xff]  ;;  %1130 = vst.msk [vmem:[%s2082_s3 + $0x88] sm:$0xff] %vm19_vm0, %v1066_v51  ;;  %v806_v2 = vadd.f32 %v623_v59, %v108_v49  ;;  %v838_v3 = vadd.f32 %v751_v60, %v140_v50  ;;  %v1317_v4 = vpop.f32.mrb[26].mxu0  ;;  %v1349_v5 = vpop.f32.mrb[26].mxu1 }
 0x115   :  { %v141_v62 = vld [vmem:[#allocation2 + $0x1c8] sm:$0xff]  ;;  %1162 = vst.msk [vmem:[%s2082_s3 + $0x188] sm:$0xff] %vm19_vm0, %v1098_v52  ;;  %v936_v63 = vld [vmem:[#allocation2 + $0xb0] sm:$0xff]  ;;  %v934_v8 = vld [vmem:[#allocation2 + $0xa0] sm:$0xff]  ;;  %v809_v10 = vadd.f32 %v1317_v4, %v111_v55  ;;  %v841_v11 = vadd.f32 %v1349_v5, %v143_v56  ;;  %v626_v12 = vpop.f32.mrb[27].mxu0  ;;  %v754_v13 = vpop.f32.mrb[27].mxu1 }
 0x116   :  { %v968_v0 = vld [vmem:[#allocation2 + $0x1b0] sm:$0xff]  ;;  %v1007_v6 = vadd.f32 %v1701_v1, %v936_v63  ;;  %v966_v9 = vld [vmem:[#allocation2 + $0x1a0] sm:$0xff]  ;;  %873 = vst.msk [vmem:[#allocation2 + $0xd0] sm:$0xff] %vm19_vm0, %v808_v57  ;;  %905 = vst.msk [vmem:[#allocation2 + $0x1d0] sm:$0xff] %vm19_vm0, %v840_v58  ;;  %v1005_v14 = vadd.f32 %v1701_v1, %v934_v8  ;;  %v807_v18 = vadd.f32 %v626_v12, %v109_v61 }
 0x117   :  { %v1039_v7 = vadd.f32 %v1701_v1, %v968_v0  ;;  %v1037_v15 = vadd.f32 %v1701_v1, %v966_v9  ;;  %v937_v16 = vld [vmem:[#allocation2 + $0xb8] sm:$0xff]  ;;  %871 = vst.msk [vmem:[#allocation2 + $0xc0] sm:$0xff] %vm19_vm0, %v806_v2  ;;  %903 = vst.msk [vmem:[#allocation2 + $0x1c0] sm:$0xff] %vm19_vm0, %v838_v3  ;;  %v839_v19 = vadd.f32 %v754_v13, %v141_v62  ;;  %v935_v24 = vld [vmem:[#allocation2 + $0xa8] sm:$0xff] }
 0x118   :  { %v969_v17 = vld [vmem:[#allocation2 + $0x1b8] sm:$0xff]  ;;  %v1071_v20 = vmax.f32 %v1007_v6, 0.0  ;;  %v1008_v22 = vadd.f32 %v1701_v1, %v937_v16  ;;  %v967_v25 = vld [vmem:[#allocation2 + $0x1a8] sm:$0xff]  ;;  %874 = vst.msk [vmem:[#allocation2 + $0xd8] sm:$0xff] %vm19_vm0, %v809_v10  ;;  %906 = vst.msk [vmem:[#allocation2 + $0x1d8] sm:$0xff] %vm19_vm0, %v841_v11  ;;  %v1069_v26 = vmax.f32 %v1005_v14, 0.0  ;;  %v1006_v28 = vadd.f32 %v1701_v1, %v935_v24 }
 0x119   :  { %v1103_v21 = vmax.f32 %v1039_v7, 0.0  ;;  %v1040_v23 = vadd.f32 %v1701_v1, %v969_v17  ;;  %v1101_v27 = vmax.f32 %v1037_v15, 0.0  ;;  %v1038_v29 = vadd.f32 %v1701_v1, %v967_v25  ;;  %872 = vst.msk [vmem:[#allocation2 + $0xc8] sm:$0xff] %vm19_vm0, %v807_v18  ;;  %904 = vst.msk [vmem:[#allocation2 + $0x1c8] sm:$0xff] %vm19_vm0, %v839_v19  ;;  %v114_v30 = vld [vmem:[#allocation2 + $0xf0] sm:$0xff]  ;;  %v112_v34 = vld [vmem:[#allocation2 + $0xe0] sm:$0xff] }
 0x11a   :  { %v146_v31 = vld [vmem:[#allocation2 + $0x1f0] sm:$0xff]  ;;  %1135 = vst.msk [vmem:[%s2082_s3 + $0xb0] sm:$0xff] %vm19_vm0, %v1071_v20  ;;  %v1072_v32 = vmax.f32 %v1008_v22, 0.0  ;;  %v144_v35 = vld [vmem:[#allocation2 + $0x1e0] sm:$0xff]  ;;  %1133 = vst.msk [vmem:[%s2082_s3 + $0xa0] sm:$0xff] %vm19_vm0, %v1069_v26  ;;  %v1070_v36 = vmax.f32 %v1006_v28, 0.0 }
 0x11b   :  { %1167 = vst.msk [vmem:[%s2082_s3 + $0x1b0] sm:$0xff] %vm19_vm0, %v1103_v21  ;;  %v1104_v33 = vmax.f32 %v1040_v23, 0.0  ;;  %1165 = vst.msk [vmem:[%s2082_s3 + $0x1a0] sm:$0xff] %vm19_vm0, %v1101_v27  ;;  %v1102_v37 = vmax.f32 %v1038_v29, 0.0  ;;  %v1320_v38 = vpop.f32.mrb[28].mxu0  ;;  %v1352_v39 = vpop.f32.mrb[28].mxu1 }
 0x11c   :  { %v115_v40 = vld [vmem:[#allocation2 + $0xf8] sm:$0xff]  ;;  %1136 = vst.msk [vmem:[%s2082_s3 + $0xb8] sm:$0xff] %vm19_vm0, %v1072_v32  ;;  %v812_v42 = vadd.f32 %v1320_v38, %v114_v30  ;;  %v844_v43 = vadd.f32 %v1352_v39, %v146_v31  ;;  %v639_v44 = vpop.f32.mrb[29].mxu0  ;;  %v767_v45 = vpop.f32.mrb[29].mxu1  ;;  %v113_v46 = vld [vmem:[#allocation2 + $0xe8] sm:$0xff]  ;;  %1134 = vst.msk [vmem:[%s2082_s3 + $0xa8] sm:$0xff] %vm19_vm0, %v1070_v36 }
 0x11d   :  { %v147_v41 = vld [vmem:[#allocation2 + $0x1f8] sm:$0xff]  ;;  %1168 = vst.msk [vmem:[%s2082_s3 + $0x1b8] sm:$0xff] %vm19_vm0, %v1104_v33  ;;  %v145_v47 = vld [vmem:[#allocation2 + $0x1e8] sm:$0xff]  ;;  %1166 = vst.msk [vmem:[%s2082_s3 + $0x1a8] sm:$0xff] %vm19_vm0, %v1102_v37  ;;  %v810_v50 = vadd.f32 %v639_v44, %v112_v34  ;;  %v842_v51 = vadd.f32 %v767_v45, %v144_v35  ;;  %v1321_v52 = vpop.f32.mrb[30].mxu0  ;;  %v1353_v53 = vpop.f32.mrb[30].mxu1 }
 0x11e   :  { %v940_v48 = vld [vmem:[#allocation2 + $0xd0] sm:$0xff]  ;;  %v938_v56 = vld [vmem:[#allocation2 + $0xc0] sm:$0xff]  ;;  %877 = vst.msk [vmem:[#allocation2 + $0xf0] sm:$0xff] %vm19_vm0, %v812_v42  ;;  %909 = vst.msk [vmem:[#allocation2 + $0x1f0] sm:$0xff] %vm19_vm0, %v844_v43  ;;  %v813_v58 = vadd.f32 %v1321_v52, %v115_v40  ;;  %v845_v59 = vadd.f32 %v1353_v53, %v147_v41  ;;  %v642_v60 = vpop.f32.mrb[31].mxu0  ;;  %v770_v61 = vpop.f32.mrb[31].mxu1 }
 0x11f   :  { %v972_v49 = vld [vmem:[#allocation2 + $0x1d0] sm:$0xff]  ;;  %v1011_v54 = vadd.f32 %v1701_v1, %v940_v48  ;;  %v970_v57 = vld [vmem:[#allocation2 + $0x1c0] sm:$0xff]  ;;  %v1009_v62 = vadd.f32 %v1701_v1, %v938_v56  ;;  %v941_v0 = vld [vmem:[#allocation2 + $0xd8] sm:$0xff]  ;;  %875 = vst.msk [vmem:[#allocation2 + $0xe0] sm:$0xff] %vm19_vm0, %v810_v50  ;;  %v811_v3 = vadd.f32 %v642_v60, %v113_v46  ;;  %v843_v4 = vadd.f32 %v770_v61, %v145_v47 }
 0x120   :  { %v1043_v55 = vadd.f32 %v1701_v1, %v972_v49  ;;  %v1041_v63 = vadd.f32 %v1701_v1, %v970_v57  ;;  %v973_v2 = vld [vmem:[#allocation2 + $0x1d8] sm:$0xff]  ;;  %907 = vst.msk [vmem:[#allocation2 + $0x1e0] sm:$0xff] %vm19_vm0, %v842_v51  ;;  %v1012_v7 = vadd.f32 %v1701_v1, %v941_v0  ;;  %v939_v9 = vld [vmem:[#allocation2 + $0xc8] sm:$0xff]  ;;  %878 = vst.msk [vmem:[#allocation2 + $0xf8] sm:$0xff] %vm19_vm0, %v813_v58 }
 0x121   :  { %v1075_v5 = vmax.f32 %v1011_v54, 0.0  ;;  %v1044_v8 = vadd.f32 %v1701_v1, %v973_v2  ;;  %v971_v10 = vld [vmem:[#allocation2 + $0x1c8] sm:$0xff]  ;;  %910 = vst.msk [vmem:[#allocation2 + $0x1f8] sm:$0xff] %vm19_vm0, %v845_v59  ;;  %v1073_v11 = vmax.f32 %v1009_v62, 0.0  ;;  %v1010_v13 = vadd.f32 %v1701_v1, %v939_v9  ;;  %876 = vst.msk [vmem:[#allocation2 + $0xe8] sm:$0xff] %vm19_vm0, %v811_v3 }
 0x122   :  { %v1107_v6 = vmax.f32 %v1043_v55, 0.0  ;;  %v1105_v12 = vmax.f32 %v1041_v63, 0.0  ;;  %v1042_v14 = vadd.f32 %v1701_v1, %v971_v10  ;;  %908 = vst.msk [vmem:[#allocation2 + $0x1e8] sm:$0xff] %vm19_vm0, %v843_v4  ;;  %v1076_v15 = vmax.f32 %v1012_v7, 0.0 }
 0x123   :  { %1139 = vst.msk [vmem:[%s2082_s3 + $0xd0] sm:$0xff] %vm19_vm0, %v1075_v5  ;;  %v1108_v16 = vmax.f32 %v1044_v8, 0.0  ;;  %1137 = vst.msk [vmem:[%s2082_s3 + $0xc0] sm:$0xff] %vm19_vm0, %v1073_v11  ;;  %v1074_v17 = vmax.f32 %v1010_v13, 0.0 }
 0x124   :  { %1171 = vst.msk [vmem:[%s2082_s3 + $0x1d0] sm:$0xff] %vm19_vm0, %v1107_v6  ;;  %1169 = vst.msk [vmem:[%s2082_s3 + $0x1c0] sm:$0xff] %vm19_vm0, %v1105_v12  ;;  %v1106_v18 = vmax.f32 %v1042_v14, 0.0 }
 0x125   :  { %1140 = vst.msk [vmem:[%s2082_s3 + $0xd8] sm:$0xff] %vm19_vm0, %v1076_v15  ;;  %1172 = vst.msk [vmem:[%s2082_s3 + $0x1d8] sm:$0xff] %vm19_vm0, %v1108_v16  ;;  %v944_v19 = vld [vmem:[#allocation2 + $0xf0] sm:$0xff] }
 0x126   :  { %1138 = vst.msk [vmem:[%s2082_s3 + $0xc8] sm:$0xff] %vm19_vm0, %v1074_v17  ;;  %1170 = vst.msk [vmem:[%s2082_s3 + $0x1c8] sm:$0xff] %vm19_vm0, %v1106_v18  ;;  %v976_v20 = vld [vmem:[#allocation2 + $0x1f0] sm:$0xff]  ;;  %v1015_v21 = vadd.f32 %v1701_v1, %v944_v19  ;;  %v942_v23 = vld [vmem:[#allocation2 + $0xe0] sm:$0xff] }
 0x127   :  { %v1047_v22 = vadd.f32 %v1701_v1, %v976_v20  ;;  %v974_v24 = vld [vmem:[#allocation2 + $0x1e0] sm:$0xff]  ;;  %v1013_v25 = vadd.f32 %v1701_v1, %v942_v23  ;;  %v945_v27 = vld [vmem:[#allocation2 + $0xf8] sm:$0xff] }
 0x128   :  { %v1045_v26 = vadd.f32 %v1701_v1, %v974_v24  ;;  %v977_v28 = vld [vmem:[#allocation2 + $0x1f8] sm:$0xff]  ;;  %v1079_v29 = vmax.f32 %v1015_v21, 0.0  ;;  %v1016_v31 = vadd.f32 %v1701_v1, %v945_v27  ;;  %v943_v33 = vld [vmem:[#allocation2 + $0xe8] sm:$0xff] }
 0x129   :  { %v1111_v30 = vmax.f32 %v1047_v22, 0.0  ;;  %v1048_v32 = vadd.f32 %v1701_v1, %v977_v28  ;;  %v975_v34 = vld [vmem:[#allocation2 + $0x1e8] sm:$0xff]  ;;  %v1077_v35 = vmax.f32 %v1013_v25, 0.0  ;;  %v1014_v37 = vadd.f32 %v1701_v1, %v943_v33 }
 0x12a   :  { %v1109_v36 = vmax.f32 %v1045_v26, 0.0  ;;  %v1046_v38 = vadd.f32 %v1701_v1, %v975_v34  ;;  %1143 = vst.msk [vmem:[%s2082_s3 + $0xf0] sm:$0xff] %vm19_vm0, %v1079_v29  ;;  %v1080_v39 = vmax.f32 %v1016_v31, 0.0 }
 0x12b   :  { %1175 = vst.msk [vmem:[%s2082_s3 + $0x1f0] sm:$0xff] %vm19_vm0, %v1111_v30  ;;  %v1112_v40 = vmax.f32 %v1048_v32, 0.0  ;;  %1141 = vst.msk [vmem:[%s2082_s3 + $0xe0] sm:$0xff] %vm19_vm0, %v1077_v35  ;;  %v1078_v1 = vmax.f32 %v1014_v37, 0.0 }
 0x12c   :  { %1173 = vst.msk [vmem:[%s2082_s3 + $0x1e0] sm:$0xff] %vm19_vm0, %v1109_v36  ;;  %v1110_v41 = vmax.f32 %v1046_v38, 0.0  ;;  %1144 = vst.msk [vmem:[%s2082_s3 + $0xf8] sm:$0xff] %vm19_vm0, %v1080_v39 }
 0x12d   :  { %1176 = vst.msk [vmem:[%s2082_s3 + $0x1f8] sm:$0xff] %vm19_vm0, %v1112_v40  ;;  %1142 = vst.msk [vmem:[%s2082_s3 + $0xe8] sm:$0xff] %vm19_vm0, %v1078_v1 }
 0x12e   :  { %1174 = vst.msk [vmem:[%s2082_s3 + $0x1e8] sm:$0xff] %vm19_vm0, %v1110_v41 }

// kernel: visual_encoder_forward.11
= control target key start
LH: loop header
LB: loop body
LE: loop exit
PB: predicated region body
PF: predicated region fallthrough
CT: control target
= control target key end

     0   :  { %vm19_vm0 = vcmask 261120   ;;  %v532_v0 = vmov 0   ;;  %v533_v2 = vmov 0.0   ;;  %vm212_vm1 = vcmask 130048   ;;  %s772_s1 = inlined_call_operand.vmem [shape: bf16[144,32], index: 1, kind: input, shape index: {}]   ;;  %s773_s0 = inlined_call_operand.vmem [shape: bf16[128,144], index: 0, kind: input, shape index: {}]   ;;  %s774_s2 = inlined_call_operand.vmem [shape: f32[1,32], index: 2, kind: input, shape index: {}]   ;;  %s775_s3 = inlined_call_operand.vmem [shape: f32[128,32], index: 3, kind: output, shape index: {}]  }
   0x1   :  { %237 = vmatprep.subr.bf16.mxu0 %v532_v0  ;;  %479 = vmatprep.subr.bf16.mxu1 %v532_v0  ;;  %v499_v1 = vld [vmem:[%s772_s1] sm:$0xff]   ;;  %20 = vst.msk [vmem:[#allocation2] sm:$0xff] %vm19_vm0, %v533_v2  ;;  %21 = vst.msk [vmem:[#allocation2 + $0x8] sm:$0xff] %vm19_vm0, %v533_v2  ;;  %v500_v3 = vld [vmem:[%s772_s1 + $0x8] sm:$0xff]  }
   0x2   :  { %22 = vst.msk [vmem:[#allocation2 + $0x10] sm:$0xff] %vm19_vm0, %v533_v2  ;;  %23 = vst.msk [vmem:[#allocation2 + $0x18] sm:$0xff] %vm19_vm0, %v533_v2  ;;  %238 = vmatpush1.bf16.msra.mxu0 %v499_v1  ;;  %488 = vmatpush1.bf16.msra.mxu1 %v499_v1  ;;  %v501_v4 = vld [vmem:[%s772_s1 + $0x10] sm:$0xff]   ;;  %v502_v5 = vld [vmem:[%s772_s1 + $0x18] sm:$0xff]  }
   0x3   :  { %24 = vst.msk [vmem:[#allocation2 + $0x20] sm:$0xff] %vm19_vm0, %v533_v2  ;;  %25 = vst.msk [vmem:[#allocation2 + $0x28] sm:$0xff] %vm19_vm0, %v533_v2  ;;  %239 = vmatprep.subr.bf16.mxu0 %v532_v0  ;;  %480 = vmatprep.subr.bf16.mxu1 %v532_v0  ;;  %v510_v6 = vld [vmem:[%s773_s0 + $0x4] ss:$8 sps:$4 sm:$0xff]   ;;  %v505_v10 = vld [vmem:[%s772_s1 + $0x30] sm:$0xff]  }
   0x4   :  { %26 = vst.msk [vmem:[#allocation2 + $0x30] sm:$0xff] %vm19_vm0, %v533_v2  ;;  %27 = vst.msk [vmem:[#allocation2 + $0x38] sm:$0xff] %vm19_vm0, %v533_v2  ;;  %v513_v7 = vld [vmem:[%s773_s0 + $0x44] ss:$8 sps:$4 sm:$0xff]   ;;  %470 = vmatprep.mubr.msk.bf16.mxu0 %vm212_vm1, %v510_v6  ;;  %v506_v11 = vld [vmem:[%s772_s1 + $0x38] sm:$0xff]  }
   0x5   :  { %28 = vst.msk [vmem:[#allocation2 + $0x40] sm:$0xff] %vm19_vm0, %v533_v2  ;;  %29 = vst.msk [vmem:[#allocation2 + $0x48] sm:$0xff] %vm19_vm0, %v533_v2  ;;  %474 = vmatprep.mubr.msk.bf16.mxu1 %vm212_vm1, %v513_v7  ;;  %v503_v8 = vld [vmem:[%s772_s1 + $0x20] sm:$0xff]   ;;  %v504_v9 = vld [vmem:[%s772_s1 + $0x28] sm:$0xff]  }
   0x6   :  { %30 = vst.msk [vmem:[#allocation2 + $0x50] sm:$0xff] %vm19_vm0, %v533_v2  ;;  %31 = vst.msk [vmem:[#allocation2 + $0x58] sm:$0xff] %vm19_vm0, %v533_v2  ;;  %240 = vmatpush1.bf16.msra.mxu0 %v500_v3  ;;  %489 = vmatpush1.bf16.msra.mxu1 %v500_v3  ;;  %v507_v12 = vld [vmem:[%s772_s1 + $0x40] sm:$0xff]   ;;  %v514_v15 = vld [vmem:[%s773_s0 + $0x14] ss:$8 sps:$4 sm:$0xff]  }
   0x7   :  { %32 = vst.msk [vmem:[#allocation2 + $0x60] sm:$0xff] %vm19_vm0, %v533_v2  ;;  %33 = vst.msk [vmem:[#allocation2 + $0x68] sm:$0xff] %vm19_vm0, %v533_v2  ;;  %241 = vmatprep.subr.bf16.mxu0 %v532_v0  ;;  %481 = vmatprep.subr.bf16.mxu1 %v532_v0  ;;  %v508_v13 = vld [vmem:[%s773_s0] ss:$8 sps:$4 sm:$0xff]   ;;  %v516_v16 = vld [vmem:[%s773_s0 + $0x54] ss:$8 sps:$4 sm:$0xff]  }
   0x8   :  { %34 = vst.msk [vmem:[#allocation2 + $0x70] sm:$0xff] %vm19_vm0, %v533_v2  ;;  %35 = vst.msk [vmem:[#allocation2 + $0x78] sm:$0xff] %vm19_vm0, %v533_v2  ;;  %v511_v14 = vld [vmem:[%s773_s0 + $0x40] ss:$8 sps:$4 sm:$0xff]   ;;  %v518_v17 = vld [vmem:[%s773_s0 + $0x10] ss:$8 sps:$4 sm:$0xff]  }
   0x9   :  { %v519_v18 = vld [vmem:[%s773_s0 + $0x50] ss:$8 sps:$4 sm:$0xff]   ;;  %v520_v19 = vld [vmem:[%s773_s0 + $0x24] ss:$8 sps:$4 sm:$0xff]   ;;  %v524_v21 = vld [vmem:[%s773_s0 + $0x20] ss:$8 sps:$4 sm:$0xff]  }
   0xa   :  { %242 = vmatpush1.bf16.msra.mxu0 %v501_v4  ;;  %490 = vmatpush1.bf16.msra.mxu1 %v501_v4  ;;  %v522_v20 = vld [vmem:[%s773_s0 + $0x64] ss:$8 sps:$4 sm:$0xff]   ;;  %v525_v22 = vld [vmem:[%s773_s0 + $0x60] ss:$8 sps:$4 sm:$0xff]   ;;  %v526_v23 = vld [vmem:[%s773_s0 + $0x34] ss:$8 sps:$4 sm:$0xff]  }
   0xb   :  { %243 = vmatprep.subr.bf16.mxu0 %v532_v0  ;;  %482 = vmatprep.subr.bf16.mxu1 %v532_v0  ;;  %v528_v24 = vld [vmem:[%s773_s0 + $0x74] ss:$8 sps:$4 sm:$0xff]   ;;  %v530_v25 = vld [vmem:[%s773_s0 + $0x30] ss:$8 sps:$4 sm:$0xff]   ;;  %v36_v27 = vld [vmem:[#allocation2] sm:$0xff] }
   0xc   :  { %v531_v26 = vld [vmem:[%s773_s0 + $0x70] ss:$8 sps:$4 sm:$0xff]   ;;  %v44_v28 = vld [vmem:[#allocation2 + $0x40] sm:$0xff]  ;;  %v37_v31 = vld [vmem:[#allocation2 + $0x8] sm:$0xff] }
   0xd   :  { %v45_v32 = vld [vmem:[#allocation2 + $0x48] sm:$0xff]  ;;  %v38_v43 = vld [vmem:[#allocation2 + $0x10] sm:$0xff]  ;;  %v678_v45 = vld [vmem:[%s774_s2] ss:$0 sm:$0xff] }
   0xe   :  { %244 = vmatpush1.bf16.msra.mxu0 %v502_v5  ;;  %491 = vmatpush1.bf16.msra.mxu1 %v502_v5  ;;  %v46_v44 = vld [vmem:[#allocation2 + $0x50] sm:$0xff]  ;;  %v39_v48 = vld [vmem:[#allocation2 + $0x18] sm:$0xff]  ;;  %v40_v6 = vld [vmem:[#allocation2 + $0x20] sm:$0xff] }
   0xf   :  { %245 = vmatprep.subr.bf16.mxu0 %v532_v0  ;;  %483 = vmatprep.subr.bf16.mxu1 %v532_v0  ;;  %v47_v49 = vld [vmem:[#allocation2 + $0x58] sm:$0xff]  ;;  %v48_v7 = vld [vmem:[#allocation2 + $0x60] sm:$0xff] }
  0x12   :  { %246 = vmatpush1.bf16.msra.mxu0 %v503_v8  ;;  %492 = vmatpush1.bf16.msra.mxu1 %v503_v8 }
  0x13   :  { %247 = vmatprep.subr.bf16.mxu0 %v532_v0  ;;  %484 = vmatprep.subr.bf16.mxu1 %v532_v0 }
  0x16   :  { %248 = vmatpush1.bf16.msra.mxu0 %v504_v9  ;;  %493 = vmatpush1.bf16.msra.mxu1 %v504_v9 }
  0x17   :  { %249 = vmatprep.subr.bf16.mxu0 %v532_v0  ;;  %485 = vmatprep.subr.bf16.mxu1 %v532_v0 }
  0x1a   :  { %250 = vmatpush1.bf16.msra.mxu0 %v505_v10  ;;  %494 = vmatpush1.bf16.msra.mxu1 %v505_v10 }
  0x1b   :  { %251 = vmatprep.subr.bf16.mxu0 %v532_v0  ;;  %486 = vmatprep.subr.bf16.mxu1 %v532_v0 }
  0x1e   :  { %252 = vmatpush1.bf16.msra.mxu0 %v506_v11  ;;  %495 = vmatpush1.bf16.msra.mxu1 %v506_v11 }
  0x1f   :  { %253 = vmatprep.subr.bf16.mxu0 %v532_v0  ;;  %487 = vmatprep.subr.bf16.mxu1 %v532_v0 }
  0x22   :  { %254 = vmatpush1.bf16.msra.mxu0 %v507_v12  ;;  %496 = vmatpush1.bf16.msra.mxu1 %v507_v12  ;;  %v41_v12 = vld [vmem:[#allocation2 + $0x28] sm:$0xff] }
  0x25   :  { %270 = vmatmul.mubr.bf16.vlgmr.msra.gmra.mrb[0].mxu0 %v508_v13  ;;  %302 = vmatmul.mubr.bf16.vlgmr.msra.gmra.mrb[0].mxu1 %v511_v14  ;;  %v49_v13 = vld [vmem:[#allocation2 + $0x68] sm:$0xff] }
  0x26   :  { %471 = vmatprep.mubr.msk.bf16.mxu0 %vm212_vm1, %v514_v15  ;;  %475 = vmatprep.mubr.msk.bf16.mxu1 %vm212_vm1, %v516_v16 }
  0x2d   :  { %278 = vmatmul.mubr.bf16.gmra.mrb[4].mxu0 %v518_v17  ;;  %310 = vmatmul.mubr.bf16.gmra.mrb[4].mxu1 %v519_v18 }
  0x2e   :  { %472 = vmatprep.mubr.msk.bf16.mxu0 %vm212_vm1, %v520_v19  ;;  %476 = vmatprep.mubr.msk.bf16.mxu1 %vm212_vm1, %v522_v20 }
  0x35   :  { %286 = vmatmul.mubr.bf16.gmra.mrb[8].mxu0 %v524_v21  ;;  %318 = vmatmul.mubr.bf16.gmra.mrb[8].mxu1 %v525_v22 }
  0x36   :  { %473 = vmatprep.mubr.msk.bf16.mxu0 %vm212_vm1, %v526_v23  ;;  %477 = vmatprep.mubr.msk.bf16.mxu1 %vm212_vm1, %v528_v24 }
  0x3d   :  { %294 = vmatmul.mubr.bf16.gmra.mrb[12].mxu0 %v530_v25  ;;  %326 = vmatmul.mubr.bf16.gmra.mrb[12].mxu1 %v531_v26 }
  0xf8   :  { %v271_v29 = vpop.f32.mrb[0].mxu0  ;;  %v303_v30 = vpop.f32.mrb[0].mxu1 }
  0xf9   :  { %v334_v33 = vadd.f32 %v271_v29, %v36_v27  ;;  %v342_v34 = vadd.f32 %v303_v30, %v44_v28  ;;  %v273_v35 = vpop.f32.mrb[1].mxu0  ;;  %v305_v36 = vpop.f32.mrb[1].mxu1 }
  0xfa   :  { %v274_v37 = vpop.f32.mrb[2].mxu0  ;;  %v306_v38 = vpop.f32.mrb[2].mxu1  ;;  %v50_v35 = vld [vmem:[#allocation2 + $0x70] sm:$0xff] }
  0xfb   :  { %351 = vst.msk [vmem:[#allocation2] sm:$0xff] %vm19_vm0, %v334_v33  ;;  %359 = vst.msk [vmem:[#allocation2 + $0x40] sm:$0xff] %vm19_vm0, %v342_v34  ;;  %v335_v39 = vadd.f32 %v274_v37, %v37_v31  ;;  %v343_v40 = vadd.f32 %v306_v38, %v45_v32  ;;  %v276_v41 = vpop.f32.mrb[3].mxu0  ;;  %v308_v42 = vpop.f32.mrb[3].mxu1  ;;  %v42_v34 = vld [vmem:[#allocation2 + $0x30] sm:$0xff] }
  0xfc   :  { %v51_v41 = vld [vmem:[#allocation2 + $0x78] sm:$0xff] }
  0xfd   :  { %352 = vst.msk [vmem:[#allocation2 + $0x8] sm:$0xff] %vm19_vm0, %v335_v39  ;;  %360 = vst.msk [vmem:[#allocation2 + $0x48] sm:$0xff] %vm19_vm0, %v343_v40  ;;  %v43_v40 = vld [vmem:[#allocation2 + $0x38] sm:$0xff] }
 0x100   :  { %v279_v46 = vpop.f32.mrb[4].mxu0  ;;  %v311_v47 = vpop.f32.mrb[4].mxu1 }
 0x101   :  { %v336_v50 = vadd.f32 %v279_v46, %v38_v43  ;;  %v344_v51 = vadd.f32 %v311_v47, %v46_v44  ;;  %v281_v52 = vpop.f32.mrb[5].mxu0  ;;  %v313_v53 = vpop.f32.mrb[5].mxu1 }
 0x102   :  { %v370_v54 = vld [vmem:[#allocation2] sm:$0xff]  ;;  %v282_v56 = vpop.f32.mrb[6].mxu0  ;;  %v314_v57 = vpop.f32.mrb[6].mxu1 }
 0x103   :  { %v378_v55 = vld [vmem:[#allocation2 + $0x40] sm:$0xff]  ;;  %v393_v58 = vadd.f32 %v678_v45, %v370_v54  ;;  %353 = vst.msk [vmem:[#allocation2 + $0x10] sm:$0xff] %vm19_vm0, %v336_v50  ;;  %361 = vst.msk [vmem:[#allocation2 + $0x50] sm:$0xff] %vm19_vm0, %v344_v51  ;;  %v337_v60 = vadd.f32 %v282_v56, %v39_v48  ;;  %v345_v61 = vadd.f32 %v314_v57, %v47_v49  ;;  %v284_v62 = vpop.f32.mrb[7].mxu0  ;;  %v316_v63 = vpop.f32.mrb[7].mxu1 }
 0x104   :  { %v401_v59 = vadd.f32 %v678_v45, %v378_v55  ;;  %v371_v0 = vld [vmem:[#allocation2 + $0x8] sm:$0xff] }
 0x105   :  { %v379_v1 = vld [vmem:[#allocation2 + $0x48] sm:$0xff]  ;;  %v409_v2 = vmax.f32 %v393_v58, 0.0  ;;  %v394_v4 = vadd.f32 %v678_v45, %v371_v0  ;;  %354 = vst.msk [vmem:[#allocation2 + $0x18] sm:$0xff] %vm19_vm0, %v337_v60  ;;  %362 = vst.msk [vmem:[#allocation2 + $0x58] sm:$0xff] %vm19_vm0, %v345_v61 }
 0x106   :  { %v417_v3 = vmax.f32 %v401_v59, 0.0  ;;  %v402_v5 = vadd.f32 %v678_v45, %v379_v1 }
 0x107   :  { %425 = vst.msk [vmem:[%s775_s3] sm:$0xff] %vm19_vm0, %v409_v2  ;;  %v410_v8 = vmax.f32 %v394_v4, 0.0 }
 0x108   :  { %433 = vst.msk [vmem:[%s775_s3 + $0x40] sm:$0xff] %vm19_vm0, %v417_v3  ;;  %v418_v9 = vmax.f32 %v402_v5, 0.0  ;;  %v287_v10 = vpop.f32.mrb[8].mxu0  ;;  %v319_v11 = vpop.f32.mrb[8].mxu1 }
 0x109   :  { %426 = vst.msk [vmem:[%s775_s3 + $0x8] sm:$0xff] %vm19_vm0, %v410_v8  ;;  %v338_v14 = vadd.f32 %v287_v10, %v40_v6  ;;  %v346_v15 = vadd.f32 %v319_v11, %v48_v7  ;;  %v289_v16 = vpop.f32.mrb[9].mxu0  ;;  %v321_v17 = vpop.f32.mrb[9].mxu1 }
 0x10a   :  { %434 = vst.msk [vmem:[%s775_s3 + $0x48] sm:$0xff] %vm19_vm0, %v418_v9  ;;  %v372_v18 = vld [vmem:[#allocation2 + $0x10] sm:$0xff]  ;;  %v290_v20 = vpop.f32.mrb[10].mxu0  ;;  %v322_v21 = vpop.f32.mrb[10].mxu1 }
 0x10b   :  { %v380_v19 = vld [vmem:[#allocation2 + $0x50] sm:$0xff]  ;;  %v395_v22 = vadd.f32 %v678_v45, %v372_v18  ;;  %355 = vst.msk [vmem:[#allocation2 + $0x20] sm:$0xff] %vm19_vm0, %v338_v14  ;;  %363 = vst.msk [vmem:[#allocation2 + $0x60] sm:$0xff] %vm19_vm0, %v346_v15  ;;  %v339_v24 = vadd.f32 %v290_v20, %v41_v12  ;;  %v347_v25 = vadd.f32 %v322_v21, %v49_v13  ;;  %v292_v26 = vpop.f32.mrb[11].mxu0  ;;  %v324_v27 = vpop.f32.mrb[11].mxu1 }
 0x10c   :  { %v403_v23 = vadd.f32 %v678_v45, %v380_v19  ;;  %v373_v28 = vld [vmem:[#allocation2 + $0x18] sm:$0xff] }
 0x10d   :  { %v381_v29 = vld [vmem:[#allocation2 + $0x58] sm:$0xff]  ;;  %v411_v30 = vmax.f32 %v395_v22, 0.0  ;;  %v396_v32 = vadd.f32 %v678_v45, %v373_v28  ;;  %356 = vst.msk [vmem:[#allocation2 + $0x28] sm:$0xff] %vm19_vm0, %v339_v24  ;;  %364 = vst.msk [vmem:[#allocation2 + $0x68] sm:$0xff] %vm19_vm0, %v347_v25 }
 0x10e   :  { %v419_v31 = vmax.f32 %v403_v23, 0.0  ;;  %v404_v33 = vadd.f32 %v678_v45, %v381_v29 }
 0x10f   :  { %427 = vst.msk [vmem:[%s775_s3 + $0x10] sm:$0xff] %vm19_vm0, %v411_v30  ;;  %v412_v36 = vmax.f32 %v396_v32, 0.0 }
 0x110   :  { %435 = vst.msk [vmem:[%s775_s3 + $0x50] sm:$0xff] %vm19_vm0, %v419_v31  ;;  %v420_v37 = vmax.f32 %v404_v33, 0.0  ;;  %v295_v38 = vpop.f32.mrb[12].mxu0  ;;  %v327_v39 = vpop.f32.mrb[12].mxu1 }
 0x111   :  { %428 = vst.msk [vmem:[%s775_s3 + $0x18] sm:$0xff] %vm19_vm0, %v412_v36  ;;  %v340_v42 = vadd.f32 %v295_v38, %v42_v34  ;;  %v348_v43 = vadd.f32 %v327_v39, %v50_v35  ;;  %v297_v44 = vpop.f32.mrb[13].mxu0  ;;  %v329_v46 = vpop.f32.mrb[13].mxu1 }
 0x112   :  { %436 = vst.msk [vmem:[%s775_s3 + $0x58] sm:$0xff] %vm19_vm0, %v420_v37  ;;  %v374_v47 = vld [vmem:[#allocation2 + $0x20] sm:$0xff]  ;;  %v298_v49 = vpop.f32.mrb[14].mxu0  ;;  %v330_v50 = vpop.f32.mrb[14].mxu1 }
 0x113   :  { %v382_v48 = vld [vmem:[#allocation2 + $0x60] sm:$0xff]  ;;  %v397_v51 = vadd.f32 %v678_v45, %v374_v47  ;;  %357 = vst.msk [vmem:[#allocation2 + $0x30] sm:$0xff] %vm19_vm0, %v340_v42  ;;  %365 = vst.msk [vmem:[#allocation2 + $0x70] sm:$0xff] %vm19_vm0, %v348_v43  ;;  %v341_v53 = vadd.f32 %v298_v49, %v43_v40  ;;  %v349_v54 = vadd.f32 %v330_v50, %v51_v41  ;;  %v300_v55 = vpop.f32.mrb[15].mxu0  ;;  %v332_v56 = vpop.f32.mrb[15].mxu1 }
 0x114   :  { %v405_v52 = vadd.f32 %v678_v45, %v382_v48  ;;  %v375_v57 = vld [vmem:[#allocation2 + $0x28] sm:$0xff] }
 0x115   :  { %v383_v58 = vld [vmem:[#allocation2 + $0x68] sm:$0xff]  ;;  %v413_v59 = vmax.f32 %v397_v51, 0.0  ;;  %v398_v61 = vadd.f32 %v678_v45, %v375_v57  ;;  %358 = vst.msk [vmem:[#allocation2 + $0x38] sm:$0xff] %vm19_vm0, %v341_v53  ;;  %366 = vst.msk [vmem:[#allocation2 + $0x78] sm:$0xff] %vm19_vm0, %v349_v54 }
 0x116   :  { %v421_v60 = vmax.f32 %v405_v52, 0.0  ;;  %v406_v62 = vadd.f32 %v678_v45, %v383_v58 }
 0x117   :  { %429 = vst.msk [vmem:[%s775_s3 + $0x20] sm:$0xff] %vm19_vm0, %v413_v59  ;;  %v414_v63 = vmax.f32 %v398_v61, 0.0 }
 0x118   :  { %437 = vst.msk [vmem:[%s775_s3 + $0x60] sm:$0xff] %vm19_vm0, %v421_v60  ;;  %v422_v0 = vmax.f32 %v406_v62, 0.0 }
 0x119   :  { %430 = vst.msk [vmem:[%s775_s3 + $0x28] sm:$0xff] %vm19_vm0, %v414_v63 }
 0x11a   :  { %438 = vst.msk [vmem:[%s775_s3 + $0x68] sm:$0xff] %vm19_vm0, %v422_v0  ;;  %v376_v1 = vld [vmem:[#allocation2 + $0x30] sm:$0xff] }
 0x11b   :  { %v384_v2 = vld [vmem:[#allocation2 + $0x70] sm:$0xff]  ;;  %v399_v3 = vadd.f32 %v678_v45, %v376_v1 }
 0x11c   :  { %v407_v4 = vadd.f32 %v678_v45, %v384_v2  ;;  %v377_v5 = vld [vmem:[#allocation2 + $0x38] sm:$0xff] }
 0x11d   :  { %v385_v6 = vld [vmem:[#allocation2 + $0x78] sm:$0xff]  ;;  %v415_v7 = vmax.f32 %v399_v3, 0.0  ;;  %v400_v9 = vadd.f32 %v678_v45, %v377_v5 }
 0x11e   :  { %v423_v8 = vmax.f32 %v407_v4, 0.0  ;;  %v408_v10 = vadd.f32 %v678_v45, %v385_v6 }
 0x11f   :  { %431 = vst.msk [vmem:[%s775_s3 + $0x30] sm:$0xff] %vm19_vm0, %v415_v7  ;;  %v416_v11 = vmax.f32 %v400_v9, 0.0 }
 0x120   :  { %439 = vst.msk [vmem:[%s775_s3 + $0x70] sm:$0xff] %vm19_vm0, %v423_v8  ;;  %v424_v12 = vmax.f32 %v408_v10, 0.0 }
 0x121   :  { %432 = vst.msk [vmem:[%s775_s3 + $0x38] sm:$0xff] %vm19_vm0, %v416_v11 }
 0x122   :  { %440 = vst.msk [vmem:[%s775_s3 + $0x78] sm:$0xff] %vm19_vm0, %v424_v12 }

// kernel: visual_encoder_forward.12
= control target key start
LH: loop header
LB: loop body
LE: loop exit
PB: predicated region body
PF: predicated region fallthrough
CT: control target
= control target key end

     0   :  { %v508_v1 = vmov 0.0   ;;  %vm509_vm0 = vmmov 0   ;;  %vm224_vm1 = vcmask 261120   ;;  %vm19_vm2 = vcmask 523264   ;;  %s657_s1 = inlined_call_operand.vmem [shape: bf16[288,64], index: 1, kind: input, shape index: {}]   ;;  %s658_s0 = inlined_call_operand.vmem [shape: bf16[40,288], index: 0, kind: input, shape index: {}]   ;;  %s659_s2 = inlined_call_operand.vmem [shape: f32[1,64], index: 2, kind: input, shape index: {}]   ;;  %s660_s3 = inlined_call_operand.vmem [shape: f32[40,64], index: 3, kind: output, shape index: {}]  }
   0x1   :  { %v479_v0 = vld [vmem:[%s657_s1 + $0x40] sm:$0xff]   ;;  %461 = vmatprep.subr.bf16.mxu1 %v508_v1  ;;  %465 = vmatprep.mubr.msk.bf16.mxu1 %vm509_vm0, %v508_v1  ;;  %v481_v3 = vld [vmem:[%s657_s1 + $0x48] sm:$0xff]   ;;  %v483_v5 = vld [vmem:[%s657_s1 + $0x50] sm:$0xff]   ;;  %20 = vst.msk [vmem:[#allocation2] sm:$0xff] %vm19_vm2, %v508_v1 }
   0x2   :  { %v480_v2 = vld [vmem:[%s657_s1] sm:$0xff]   ;;  %422 = vmatprep.subr.bf16.mxu0 %v479_v0  ;;  %v482_v4 = vld [vmem:[%s657_s1 + $0x8] sm:$0xff]   ;;  %v484_v6 = vld [vmem:[%s657_s1 + $0x10] sm:$0xff]   ;;  %21 = vst.msk [vmem:[#allocation2 + $0x8] sm:$0xff] %vm19_vm2, %v508_v1 }
   0x3   :  { %423 = vmatpush3.bf16.msra.mxu0 %v480_v2  ;;  %v485_v7 = vld [vmem:[%s657_s1 + $0x58] sm:$0xff]   ;;  %v487_v9 = vld [vmem:[%s657_s1 + $0x60] sm:$0xff]   ;;  %v489_v12 = vld [vmem:[%s657_s1 + $0x68] sm:$0xff]   ;;  %22 = vst.msk [vmem:[#allocation2 + $0x10] sm:$0xff] %vm19_vm2, %v508_v1 }
   0x4   :  { %424 = vmatprep.subr.bf16.mxu0 %v481_v3  ;;  %v486_v8 = vld [vmem:[%s657_s1 + $0x18] sm:$0xff]   ;;  %v493_v10 = vld [vmem:[%s657_s1 + $0x80] sm:$0xff]   ;;  %v490_v13 = vld [vmem:[%s657_s1 + $0x28] sm:$0xff]   ;;  %23 = vst.msk [vmem:[#allocation2 + $0x18] sm:$0xff] %vm19_vm2, %v508_v1 }
   0x5   :  { %v488_v11 = vld [vmem:[%s657_s1 + $0x20] sm:$0xff]   ;;  %462 = vmatpush3.bf16.msra.mxu1 %v493_v10  ;;  %v496_v14 = vld [vmem:[%s657_s1 + $0x88] sm:$0xff]   ;;  %v491_v15 = vld [vmem:[%s657_s1 + $0x70] sm:$0xff]   ;;  %24 = vst.msk [vmem:[#allocation2 + $0x20] sm:$0xff] %vm19_vm2, %v508_v1 }
   0x6   :  { %463 = vmatprep.subr.bf16.mxu1 %v508_v1  ;;  %v499_v16 = vld [vmem:[%s658_s0 + $0x4] ss:$12 sps:$4 sm:$0xff]   ;;  %v500_v17 = vld [vmem:[%s658_s0 + $0x8] ss:$12 sps:$4 sm:$0xff]   ;;  %v494_v19 = vld [vmem:[%s657_s1 + $0x78] sm:$0xff]  }
   0x7   :  { %425 = vmatpush3.bf16.msra.mxu0 %v482_v4  ;;  %266 = vmatprep.mubr.bf16.mxu0 %v499_v16  ;;  %v492_v18 = vld [vmem:[%s657_s1 + $0x30] sm:$0xff]   ;;  %v495_v20 = vld [vmem:[%s657_s1 + $0x38] sm:$0xff]   ;;  %v504_v21 = vld [vmem:[%s658_s0 + $0x20] ss:$12 sps:$4 sm:$0xff]  }
   0x8   :  { %426 = vmatprep.subr.bf16.mxu0 %v483_v5  ;;  %v497_v22 = vld [vmem:[%s658_s0] ss:$12 sps:$4 sm:$0xff]   ;;  %v501_v23 = vld [vmem:[%s658_s0 + $0x1c] ss:$12 sps:$4 sm:$0xff]   ;;  %v507_v24 = vld [vmem:[%s658_s0 + $0x38] ss:$0 sps:$4 sm:$0xff]  }
   0x9   :  { %464 = vmatpush3.bf16.msra.mxu1 %v496_v14  ;;  %v38_v25 = vld [vmem:[%s658_s0 + $0x30] sm:$0xff]  ;;  %v503_v26 = vld [vmem:[%s658_s0 + $0x18] ss:$12 sps:$4 sm:$0xff]   ;;  %v26_v45 = vld [vmem:[#allocation2 + $0x8] sm:$0xff] }
   0xa   :  { %v398_v27 = vcombine.high %v38_v25, %v38_v25  ;;  %v397_v28 = vcombine.low %v38_v25, %v38_v25  ;;  %v25_v41 = vld [vmem:[#allocation2] sm:$0xff]  ;;  %v27_v57 = vld [vmem:[#allocation2 + $0x10] sm:$0xff] }
   0xb   :  { %427 = vmatpush3.bf16.msra.mxu0 %v484_v6  ;;  %v421_v61 = vld [vmem:[%s659_s2] ss:$0 sm:$0xff]  ;;  %v28_v62 = vld [vmem:[#allocation2 + $0x18] sm:$0xff] }
   0xc   :  { %428 = vmatprep.subr.bf16.mxu0 %v485_v7  ;;  %466 = vmatmul.mubr.msk.bf16.vlgmr.msra.gmra.mrb[0].mxu1 %vm224_vm1, %v500_v17 }
   0xd   :  { %469 = vmatprep.mubr.msk.bf16.mxu1 %vm509_vm0, %v508_v1 }
   0xf   :  { %429 = vmatpush3.bf16.msra.mxu0 %v486_v8 }
  0x10   :  { %430 = vmatprep.subr.bf16.mxu0 %v487_v9 }
  0x13   :  { %431 = vmatpush3.bf16.msra.mxu0 %v488_v11  ;;  %v29_v11 = vld [vmem:[#allocation2 + $0x20] sm:$0xff] }
  0x14   :  { %432 = vmatprep.subr.bf16.mxu0 %v489_v12  ;;  %470 = vmatmul.mubr.msk.bf16.gmra.mrb[4].mxu1 %vm224_vm1, %v504_v21 }
  0x15   :  { %473 = vmatprep.mubr.msk.bf16.mxu1 %vm509_vm0, %v508_v1 }
  0x17   :  { %433 = vmatpush3.bf16.msra.mxu0 %v490_v13 }
  0x18   :  { %434 = vmatprep.subr.bf16.mxu0 %v491_v15 }
  0x1b   :  { %435 = vmatpush3.bf16.msra.mxu0 %v492_v18 }
  0x1c   :  { %436 = vmatprep.subr.bf16.mxu0 %v494_v19  ;;  %474 = vmatmul.mubr.msk.bf16.gmra.mrb[8].mxu1 %vm224_vm1, %v507_v24 }
  0x1f   :  { %437 = vmatpush3.bf16.msra.mxu0 %v495_v20 }
  0x22   :  { %267 = vmatmul.mubr.bf16.vlgmr.msra.gmra.mrb[0].mxu0 %v497_v22 }
  0x23   :  { %274 = vmatprep.mubr.bf16.mxu0 %v501_v23 }
  0x2a   :  { %275 = vmatmul.mubr.bf16.gmra.mrb[4].mxu0 %v503_v26 }
  0x2b   :  { %282 = vmatprep.mubr.bf16.mxu0 %v398_v27 }
  0x32   :  { %283 = vmatmul.mubr.bf16.gmra.mrb[8].mxu0 %v397_v28 }
  0xdf   :  { %v324_v29 = vpop.f32.mrb[0].mxu1 }
  0xe0   :  { %v467_v30 = vpop.f32.mrb[1].mxu1 }
  0xe1   :  { %v327_v31 = vpop.f32.mrb[2].mxu1 }
  0xe2   :  { %v468_v32 = vpop.f32.mrb[3].mxu1 }
  0xe7   :  { %v332_v33 = vpop.f32.mrb[4].mxu1 }
  0xe8   :  { %v471_v34 = vpop.f32.mrb[5].mxu1 }
  0xe9   :  { %v335_v35 = vpop.f32.mrb[6].mxu1 }
  0xea   :  { %v472_v37 = vpop.f32.mrb[7].mxu1 }
  0xef   :  { %v340_v46 = vpop.f32.mrb[8].mxu1 }
  0xf0   :  { %v475_v49 = vpop.f32.mrb[9].mxu1 }
  0xf1   :  { %v343_v50 = vpop.f32.mrb[10].mxu1 }
  0xf2   :  { %v476_v53 = vpop.f32.mrb[11].mxu1 }
  0xf5   :  { %v438_v36 = vpop.f32.mrb[0].mxu0 }
  0xf6   :  { %v439_v38 = vpop.f32.mrb[1].mxu0 }
  0xf7   :  { %v440_v39 = vadd.f32 %v439_v38, %v438_v36  ;;  %v441_v40 = vpop.f32.mrb[2].mxu0 }
  0xf8   :  { %v442_v42 = vpop.f32.mrb[3].mxu0 }
  0xf9   :  { %v325_v43 = vadd.f32 %v440_v39, %v324_v29  ;;  %v443_v44 = vadd.f32 %v442_v42, %v441_v40 }
  0xfb   :  { %v346_v47 = vadd.f32 %v325_v43, %v25_v41  ;;  %v328_v48 = vadd.f32 %v443_v44, %v327_v31 }
  0xfd   :  { %352 = vst.msk [vmem:[#allocation2] sm:$0xff] %vm19_vm2, %v346_v47  ;;  %v347_v51 = vadd.f32 %v328_v48, %v26_v45  ;;  %v444_v52 = vpop.f32.mrb[4].mxu0 }
  0xfe   :  { %v445_v54 = vpop.f32.mrb[5].mxu0 }
  0xff   :  { %353 = vst.msk [vmem:[#allocation2 + $0x8] sm:$0xff] %vm19_vm2, %v347_v51  ;;  %v446_v55 = vadd.f32 %v445_v54, %v444_v52  ;;  %v447_v56 = vpop.f32.mrb[6].mxu0 }
 0x100   :  { %v448_v58 = vpop.f32.mrb[7].mxu0 }
 0x101   :  { %v333_v59 = vadd.f32 %v446_v55, %v332_v33  ;;  %v449_v60 = vadd.f32 %v448_v58, %v447_v56 }
 0x103   :  { %v348_v63 = vadd.f32 %v333_v59, %v27_v57  ;;  %v336_v0 = vadd.f32 %v449_v60, %v335_v35 }
 0x104   :  { %v360_v1 = vld [vmem:[#allocation2] sm:$0xff] }
 0x105   :  { %v372_v2 = vadd.f32 %v421_v61, %v360_v1  ;;  %354 = vst.msk [vmem:[#allocation2 + $0x10] sm:$0xff] %vm19_vm2, %v348_v63  ;;  %v349_v3 = vadd.f32 %v336_v0, %v28_v62  ;;  %v450_v4 = vpop.f32.mrb[8].mxu0 }
 0x106   :  { %v361_v5 = vld [vmem:[#allocation2 + $0x8] sm:$0xff]  ;;  %v451_v6 = vpop.f32.mrb[9].mxu0 }
 0x107   :  { %v377_v7 = vmax.f32 %v372_v2, 0.0  ;;  %v373_v8 = vadd.f32 %v421_v61, %v361_v5  ;;  %355 = vst.msk [vmem:[#allocation2 + $0x18] sm:$0xff] %vm19_vm2, %v349_v3  ;;  %v452_v9 = vadd.f32 %v451_v6, %v450_v4  ;;  %v453_v10 = vpop.f32.mrb[10].mxu0 }
 0x108   :  { %v454_v12 = vpop.f32.mrb[11].mxu0 }
 0x109   :  { %382 = vst.msk [vmem:[%s660_s3] sm:$0xff] %vm19_vm2, %v377_v7  ;;  %v378_v13 = vmax.f32 %v373_v8, 0.0  ;;  %v341_v14 = vadd.f32 %v452_v9, %v340_v46 }
 0x10b   :  { %383 = vst.msk [vmem:[%s660_s3 + $0x8] sm:$0xff] %vm19_vm2, %v378_v13  ;;  %v350_v15 = vadd.f32 %v341_v14, %v29_v11 }
 0x10c   :  { %v362_v16 = vld [vmem:[#allocation2 + $0x10] sm:$0xff] }
 0x10d   :  { %v374_v17 = vadd.f32 %v421_v61, %v362_v16  ;;  %356 = vst.msk [vmem:[#allocation2 + $0x20] sm:$0xff] %vm19_vm2, %v350_v15 }
 0x10e   :  { %v363_v18 = vld [vmem:[#allocation2 + $0x18] sm:$0xff] }
 0x10f   :  { %v379_v19 = vmax.f32 %v374_v17, 0.0  ;;  %v375_v20 = vadd.f32 %v421_v61, %v363_v18 }
 0x111   :  { %384 = vst.msk [vmem:[%s660_s3 + $0x10] sm:$0xff] %vm19_vm2, %v379_v19  ;;  %v380_v21 = vmax.f32 %v375_v20, 0.0 }
 0x113   :  { %385 = vst.msk [vmem:[%s660_s3 + $0x18] sm:$0xff] %vm19_vm2, %v380_v21 }
 0x114   :  { %v364_v22 = vld [vmem:[#allocation2 + $0x20] sm:$0xff] }
 0x115   :  { %v376_v23 = vadd.f32 %v421_v61, %v364_v22 }
 0x117   :  { %v381_v24 = vmax.f32 %v376_v23, 0.0 }
 0x119   :  { %386 = vst.msk [vmem:[%s660_s3 + $0x20] sm:$0xff] %vm19_vm2, %v381_v24 }

// kernel: visual_encoder_forward.13
= control target key start
LH: loop header
LB: loop body
LE: loop exit
PB: predicated region body
PF: predicated region fallthrough
CT: control target
= control target key end

     0   :  { %vm134_vm0 = vcmask 1041408   ;;  %vm135_vm1 = vcmask 1042432   ;;  %vm109_vm2 = vcmask 39936   ;;  %v389_v1 = vmov 65535   ;;  %s563_s1 = inlined_call_operand.vmem [shape: bf16[5,8], index: 1, kind: input, shape index: {}]   ;;  %s564_s0 = inlined_call_operand.vmem [shape: bf16[128,5], index: 0, kind: input, shape index: {}]   ;;  %s565_s2 = inlined_call_operand.vmem [shape: f32[1,8], index: 2, kind: input, shape index: {}]   ;;  %s566_s3 = inlined_call_operand.vmem [shape: f32[128,8], index: 3, kind: output, shape index: {}]  }
   0x1   :  { %v68_v0 = vld [vmem:[%s563_s1] sm:$0x7]  ;;  %v136_v2 = vsel %vm134_vm0, 4294967295, %v389_v1  ;;  %v383_v7 = vld [vmem:[%s564_s0 + $0x8] sm:$0xff]   ;;  %vm19_vm3 = vcmask 64512   ;;  %v385_v9 = vld [vmem:[%s564_s0 + $0x10] sm:$0xff]  }
   0x2   :  { %v381_v3 = vld [vmem:[%s564_s0] sm:$0xff]   ;;  %v137_v4 = vsel %vm135_vm1, %v136_v2, 0  ;;  %v384_v8 = vld [vmem:[%s564_s0 + $0x28] sm:$0xff]   ;;  %v390_v10 = vmov 0.0   ;;  %v386_v11 = vld [vmem:[%s564_s0 + $0x30] sm:$0xff]  }
   0x3   :  { %v382_v5 = vld [vmem:[%s564_s0 + $0x20] sm:$0xff]   ;;  %v139_v6 = vand.u32 %v137_v4, %v68_v0  ;;  %361 = vmatprep.mubr.msk.bf16.mxu0 %vm109_vm2, %v381_v3  ;;  %22 = vst.msk [vmem:[#allocation2 + $0x10] sm:$0xff] %vm19_vm3, %v390_v10  ;;  %20 = vst.msk [vmem:[#allocation2] sm:$0xff] %vm19_vm3, %v390_v10  ;;  %v387_v12 = vld [vmem:[%s564_s0 + $0x18] sm:$0xff]  }
   0x4   :  { %369 = vmatprep.mubr.msk.bf16.mxu1 %vm109_vm2, %v382_v5  ;;  %21 = vst.msk [vmem:[#allocation2 + $0x8] sm:$0xff] %vm19_vm3, %v390_v10  ;;  %23 = vst.msk [vmem:[#allocation2 + $0x18] sm:$0xff] %vm19_vm3, %v390_v10  ;;  %v388_v13 = vld [vmem:[%s564_s0 + $0x38] sm:$0xff]   ;;  %v473_v42 = vld [vmem:[%s565_s2] ss:$0 sm:$0xff] }
   0x5   :  { %359 = vmatprep.subr.bf16.mxu0 %v139_v6  ;;  %377 = vmatprep.subr.bf16.mxu1 %v139_v6  ;;  %24 = vst.msk [vmem:[#allocation2 + $0x20] sm:$0xff] %vm19_vm3, %v390_v10  ;;  %25 = vst.msk [vmem:[#allocation2 + $0x28] sm:$0xff] %vm19_vm3, %v390_v10 }
   0x6   :  { %360 = vmatpush3.bf16.msra.mxu0 %v139_v6  ;;  %378 = vmatpush3.bf16.msra.mxu1 %v139_v6  ;;  %26 = vst.msk [vmem:[#allocation2 + $0x30] sm:$0xff] %vm19_vm3, %v390_v10  ;;  %27 = vst.msk [vmem:[#allocation2 + $0x38] sm:$0xff] %vm19_vm3, %v390_v10 }
   0x7   :  { %28 = vst.msk [vmem:[#allocation2 + $0x40] sm:$0xff] %vm19_vm3, %v390_v10  ;;  %29 = vst.msk [vmem:[#allocation2 + $0x48] sm:$0xff] %vm19_vm3, %v390_v10 }
   0x8   :  { %30 = vst.msk [vmem:[#allocation2 + $0x50] sm:$0xff] %vm19_vm3, %v390_v10  ;;  %31 = vst.msk [vmem:[#allocation2 + $0x58] sm:$0xff] %vm19_vm3, %v390_v10 }
   0x9   :  { %32 = vst.msk [vmem:[#allocation2 + $0x60] sm:$0xff] %vm19_vm3, %v390_v10  ;;  %33 = vst.msk [vmem:[#allocation2 + $0x68] sm:$0xff] %vm19_vm3, %v390_v10  ;;  %362 = vmatmul.mubr.msk.bf16.vlgmr.msra.gmra.mrb[0].mxu0 %vm109_vm2, %v383_v7  ;;  %370 = vmatmul.mubr.msk.bf16.vlgmr.msra.gmra.mrb[0].mxu1 %vm109_vm2, %v384_v8 }
   0xa   :  { %34 = vst.msk [vmem:[#allocation2 + $0x70] sm:$0xff] %vm19_vm3, %v390_v10  ;;  %35 = vst.msk [vmem:[#allocation2 + $0x78] sm:$0xff] %vm19_vm3, %v390_v10  ;;  %365 = vmatprep.mubr.msk.bf16.mxu0 %vm109_vm2, %v385_v9  ;;  %373 = vmatprep.mubr.msk.bf16.mxu1 %vm109_vm2, %v386_v11  ;;  %v38_v14 = vld [vmem:[#allocation2 + $0x10] sm:$0xff]  ;;  %v36_v16 = vld [vmem:[#allocation2] sm:$0xff] }
   0xb   :  { %v39_v20 = vld [vmem:[#allocation2 + $0x18] sm:$0xff]  ;;  %v37_v26 = vld [vmem:[#allocation2 + $0x8] sm:$0xff] }
   0xc   :  { %v40_v40 = vld [vmem:[#allocation2 + $0x20] sm:$0xff]  ;;  %v41_v51 = vld [vmem:[#allocation2 + $0x28] sm:$0xff] }
   0xd   :  { %v42_v38 = vld [vmem:[#allocation2 + $0x30] sm:$0xff]  ;;  %v43_v45 = vld [vmem:[#allocation2 + $0x38] sm:$0xff] }
   0xe   :  { %v44_v17 = vld [vmem:[#allocation2 + $0x40] sm:$0xff]  ;;  %v45_v27 = vld [vmem:[#allocation2 + $0x48] sm:$0xff] }
   0xf   :  { %v46_v15 = vld [vmem:[#allocation2 + $0x50] sm:$0xff]  ;;  %v47_v21 = vld [vmem:[#allocation2 + $0x58] sm:$0xff] }
  0x10   :  { %v48_v41 = vld [vmem:[#allocation2 + $0x60] sm:$0xff]  ;;  %v49_v52 = vld [vmem:[#allocation2 + $0x68] sm:$0xff] }
  0x11   :  { %366 = vmatmul.mubr.msk.bf16.gmra.mrb[4].mxu0 %vm109_vm2, %v387_v12  ;;  %374 = vmatmul.mubr.msk.bf16.gmra.mrb[4].mxu1 %vm109_vm2, %v388_v13  ;;  %v50_v39 = vld [vmem:[#allocation2 + $0x70] sm:$0xff]  ;;  %v51_v46 = vld [vmem:[#allocation2 + $0x78] sm:$0xff] }
  0xdc   :  { %v363_v18 = vpop.f32.mrb[0].mxu0  ;;  %v371_v19 = vpop.f32.mrb[0].mxu1 }
  0xdd   :  { %v240_v22 = vadd.f32 %v363_v18, %v38_v14  ;;  %v248_v23 = vadd.f32 %v371_v19, %v46_v15  ;;  %v175_v24 = vpop.f32.mrb[1].mxu0  ;;  %v207_v25 = vpop.f32.mrb[1].mxu1 }
  0xde   :  { %v238_v28 = vadd.f32 %v175_v24, %v36_v16  ;;  %v246_v29 = vadd.f32 %v207_v25, %v44_v17  ;;  %v364_v30 = vpop.f32.mrb[2].mxu0  ;;  %v372_v31 = vpop.f32.mrb[2].mxu1 }
  0xdf   :  { %257 = vst.msk [vmem:[#allocation2 + $0x10] sm:$0xff] %vm19_vm3, %v240_v22  ;;  %265 = vst.msk [vmem:[#allocation2 + $0x50] sm:$0xff] %vm19_vm3, %v248_v23  ;;  %v241_v32 = vadd.f32 %v364_v30, %v39_v20  ;;  %v249_v33 = vadd.f32 %v372_v31, %v47_v21  ;;  %v178_v34 = vpop.f32.mrb[3].mxu0  ;;  %v210_v35 = vpop.f32.mrb[3].mxu1 }
  0xe0   :  { %255 = vst.msk [vmem:[#allocation2] sm:$0xff] %vm19_vm3, %v238_v28  ;;  %263 = vst.msk [vmem:[#allocation2 + $0x40] sm:$0xff] %vm19_vm3, %v246_v29  ;;  %v239_v36 = vadd.f32 %v178_v34, %v37_v26  ;;  %v247_v37 = vadd.f32 %v210_v35, %v45_v27 }
  0xe1   :  { %258 = vst.msk [vmem:[#allocation2 + $0x18] sm:$0xff] %vm19_vm3, %v241_v32  ;;  %266 = vst.msk [vmem:[#allocation2 + $0x58] sm:$0xff] %vm19_vm3, %v249_v33 }
  0xe2   :  { %256 = vst.msk [vmem:[#allocation2 + $0x8] sm:$0xff] %vm19_vm3, %v239_v36  ;;  %264 = vst.msk [vmem:[#allocation2 + $0x48] sm:$0xff] %vm19_vm3, %v247_v37 }
  0xe4   :  { %v367_v43 = vpop.f32.mrb[4].mxu0  ;;  %v375_v44 = vpop.f32.mrb[4].mxu1 }
  0xe5   :  { %v244_v47 = vadd.f32 %v367_v43, %v42_v38  ;;  %v252_v48 = vadd.f32 %v375_v44, %v50_v39  ;;  %v191_v49 = vpop.f32.mrb[5].mxu0  ;;  %v223_v50 = vpop.f32.mrb[5].mxu1 }
  0xe6   :  { %v276_v53 = vld [vmem:[#allocation2 + $0x10] sm:$0xff]  ;;  %v242_v55 = vadd.f32 %v191_v49, %v40_v40  ;;  %v250_v56 = vadd.f32 %v223_v50, %v48_v41  ;;  %v368_v57 = vpop.f32.mrb[6].mxu0  ;;  %v376_v58 = vpop.f32.mrb[6].mxu1 }
  0xe7   :  { %v284_v54 = vld [vmem:[#allocation2 + $0x50] sm:$0xff]  ;;  %v299_v59 = vadd.f32 %v473_v42, %v276_v53  ;;  %v274_v61 = vld [vmem:[#allocation2] sm:$0xff]  ;;  %261 = vst.msk [vmem:[#allocation2 + $0x30] sm:$0xff] %vm19_vm3, %v244_v47  ;;  %269 = vst.msk [vmem:[#allocation2 + $0x70] sm:$0xff] %vm19_vm3, %v252_v48  ;;  %v245_v63 = vadd.f32 %v368_v57, %v43_v45  ;;  %v253_v0 = vadd.f32 %v376_v58, %v51_v46  ;;  %v194_v1 = vpop.f32.mrb[7].mxu0  ;;  %v226_v2 = vpop.f32.mrb[7].mxu1 }
  0xe8   :  { %v307_v60 = vadd.f32 %v473_v42, %v284_v54  ;;  %v282_v62 = vld [vmem:[#allocation2 + $0x40] sm:$0xff]  ;;  %v297_v3 = vadd.f32 %v473_v42, %v274_v61  ;;  %v277_v5 = vld [vmem:[#allocation2 + $0x18] sm:$0xff]  ;;  %259 = vst.msk [vmem:[#allocation2 + $0x20] sm:$0xff] %vm19_vm3, %v242_v55  ;;  %267 = vst.msk [vmem:[#allocation2 + $0x60] sm:$0xff] %vm19_vm3, %v250_v56  ;;  %v243_v7 = vadd.f32 %v194_v1, %v41_v51 }
  0xe9   :  { %v305_v4 = vadd.f32 %v473_v42, %v282_v62  ;;  %v285_v6 = vld [vmem:[#allocation2 + $0x58] sm:$0xff]  ;;  %v251_v8 = vadd.f32 %v226_v2, %v49_v52  ;;  %315 = vst.msk [vmem:[%s566_s3 + $0x10] sm:$0xff] %vm19_vm3, %v299_v59  ;;  %v300_v9 = vadd.f32 %v473_v42, %v277_v5  ;;  %v275_v11 = vld [vmem:[#allocation2 + $0x8] sm:$0xff]  ;;  %262 = vst.msk [vmem:[#allocation2 + $0x38] sm:$0xff] %vm19_vm3, %v245_v63 }
  0xea   :  { %323 = vst.msk [vmem:[%s566_s3 + $0x50] sm:$0xff] %vm19_vm3, %v307_v60  ;;  %v308_v10 = vadd.f32 %v473_v42, %v285_v6  ;;  %v283_v12 = vld [vmem:[#allocation2 + $0x48] sm:$0xff]  ;;  %270 = vst.msk [vmem:[#allocation2 + $0x78] sm:$0xff] %vm19_vm3, %v253_v0  ;;  %v298_v13 = vadd.f32 %v473_v42, %v275_v11 }
  0xeb   :  { %313 = vst.msk [vmem:[%s566_s3] sm:$0xff] %vm19_vm3, %v297_v3  ;;  %321 = vst.msk [vmem:[%s566_s3 + $0x40] sm:$0xff] %vm19_vm3, %v305_v4  ;;  %v306_v14 = vadd.f32 %v473_v42, %v283_v12 }
  0xec   :  { %260 = vst.msk [vmem:[#allocation2 + $0x28] sm:$0xff] %vm19_vm3, %v243_v7  ;;  %268 = vst.msk [vmem:[#allocation2 + $0x68] sm:$0xff] %vm19_vm3, %v251_v8 }
  0xed   :  { %316 = vst.msk [vmem:[%s566_s3 + $0x18] sm:$0xff] %vm19_vm3, %v300_v9  ;;  %324 = vst.msk [vmem:[%s566_s3 + $0x58] sm:$0xff] %vm19_vm3, %v308_v10 }
  0xee   :  { %314 = vst.msk [vmem:[%s566_s3 + $0x8] sm:$0xff] %vm19_vm3, %v298_v13  ;;  %322 = vst.msk [vmem:[%s566_s3 + $0x48] sm:$0xff] %vm19_vm3, %v306_v14  ;;  %v280_v15 = vld [vmem:[#allocation2 + $0x30] sm:$0xff] }
  0xef   :  { %v288_v16 = vld [vmem:[#allocation2 + $0x70] sm:$0xff]  ;;  %v303_v17 = vadd.f32 %v473_v42, %v280_v15  ;;  %v278_v19 = vld [vmem:[#allocation2 + $0x20] sm:$0xff] }
  0xf0   :  { %v311_v18 = vadd.f32 %v473_v42, %v288_v16  ;;  %v286_v20 = vld [vmem:[#allocation2 + $0x60] sm:$0xff]  ;;  %v301_v21 = vadd.f32 %v473_v42, %v278_v19  ;;  %v281_v23 = vld [vmem:[#allocation2 + $0x38] sm:$0xff] }
  0xf1   :  { %v309_v22 = vadd.f32 %v473_v42, %v286_v20  ;;  %v289_v24 = vld [vmem:[#allocation2 + $0x78] sm:$0xff]  ;;  %319 = vst.msk [vmem:[%s566_s3 + $0x30] sm:$0xff] %vm19_vm3, %v303_v17  ;;  %v304_v25 = vadd.f32 %v473_v42, %v281_v23 }
  0xf2   :  { %327 = vst.msk [vmem:[%s566_s3 + $0x70] sm:$0xff] %vm19_vm3, %v311_v18  ;;  %v312_v26 = vadd.f32 %v473_v42, %v289_v24  ;;  %317 = vst.msk [vmem:[%s566_s3 + $0x20] sm:$0xff] %vm19_vm3, %v301_v21 }
  0xf3   :  { %v279_v27 = vld [vmem:[#allocation2 + $0x28] sm:$0xff]  ;;  %325 = vst.msk [vmem:[%s566_s3 + $0x60] sm:$0xff] %vm19_vm3, %v309_v22  ;;  %320 = vst.msk [vmem:[%s566_s3 + $0x38] sm:$0xff] %vm19_vm3, %v304_v25 }
  0xf4   :  { %v287_v28 = vld [vmem:[#allocation2 + $0x68] sm:$0xff]  ;;  %v302_v29 = vadd.f32 %v473_v42, %v279_v27  ;;  %328 = vst.msk [vmem:[%s566_s3 + $0x78] sm:$0xff] %vm19_vm3, %v312_v26 }
  0xf5   :  { %v310_v30 = vadd.f32 %v473_v42, %v287_v28 }
  0xf6   :  { %318 = vst.msk [vmem:[%s566_s3 + $0x28] sm:$0xff] %vm19_vm3, %v302_v29 }
  0xf7   :  { %326 = vst.msk [vmem:[%s566_s3 + $0x68] sm:$0xff] %vm19_vm3, %v310_v30 }

// kernel: visual_encoder_forward.15
= control target key start
LH: loop header
LB: loop body
LE: loop exit
PB: predicated region body
PF: predicated region fallthrough
CT: control target
= control target key end

     0   :  { %s660_s9 = smov 0   ;;  %s662_s10 = smov 0   ;;  %s721_s0 = inlined_call_operand.vmem [shape: f32[2,8,2,128], index: 0, kind: input, shape index: {}]   ;;  %s722_s1 = inlined_call_operand.vmem [shape: f32[2,32,128], index: 1, kind: input, shape index: {}]   ;;  %s723_s2 = inlined_call_operand.vmem [shape: f32[2,8,2,32], index: 2, kind: output, shape index: {}]  }
   0x1   :  { %s664_s11 = smov 0   ;;  %s666_s12 = smov 0  }
   0x2   :  { %s668_s13 = smov 0  }
   0x3 LB: > { %s21_s14 = sadd.s32 1, %s628_s11  ;;  %s24_s15 = sadd.s32 1, %s632_s12  ;;  %s636_s13 = sphi %s668_s13, %s12_s13   ;;  %s632_s12 = sphi %s666_s12, %s727_s12   ;;  %s628_s11 = sphi %s664_s11, %s726_s11   ;;  %s624_s10 = sphi %s662_s10, %s725_s10   ;;  %s620_s9 = sphi %s660_s9, %s724_s9  }
   0x4   : > { %p22_p0 = scmp.ge.s32.totalorder %s21_s14, 8  ;;  %p506_p1 = scmp.ge.s32.totalorder %s636_s13, 1 }
   0x5   : > { %p171_p2 = scmp.lt.s32.totalorder %s636_s13, 17 }
   0x6   : > { %s729_s14 = smov (%p22_p0, %s21_s14), 0  ;;  %s731_s15 = smov (!%p22_p0, %s24_s15), %s632_s12 }
   0x7   : > { %p172_p3 = pnand %p506_p1, %p171_p2  ;;  %p26_p4 = scmp.ge.s32.totalorder %s731_s15, 2 }
   0x8   : > { %s214_s16 = smul.u32 (!%p172_p3), 7, %s624_s10  ;;  %s507_s17 = sshll.u32 (!%p172_p3), %s624_s10, 1 }
   0x9   : > { %s733_s15 = smov (%p26_p4, %s731_s15), 0  ;;  %175 = sbr.rel (%p172_p3) target bundleno = 739 (0x2e3), region = 28 }
   0xa   : > { %s216_s18 = ssub.s32 (!%p172_p3), 1, %s507_s17  ;;  %p219_p5 = scmp.lt.s32.totalorder (!%p172_p3), %s624_s10, 1 }
   0xb   : > { %s217_s19 = smul.u32 (!%p172_p3), %s620_s9, %s216_s18  ;;  %p515_p7 = scmp.ne.s32.totalorder (!%p172_p3), %s620_s9, 0 }
   0xd   : > { %s218_s20 = sadd.s32 (!%p172_p3), %s217_s19, %s214_s16 }
   0xe   : > { %p221_p6 = scmp.lt.s32.totalorder (!%p172_p3), %s218_s20, 7 }
  0x10   : > { %s735_s10 = smov (!%p219_p5, %s624_s10), 1  ;;  %s737_s20 = smov (!%p221_p6, %s218_s20), 7 }
  0x11   : > { %s508_s21 = sshll.u32 %s735_s10, 3  ;;  %s520_s22 = sshll.u32 %s735_s10, 5  ;;  %vm259_vm0 = vcmask (!%p515_p7), 254976   ;;  %v638_v0 = vmov (!%p515_p7), 0.0  }
  0x12   : > { %s236_s25 = scalar_lea.vmem %s722_s1, %s520_s22  ;;  %s224_s26 = sadd.s32 %s508_s21, %s737_s20  ;;  %260 = vst.msk [vmem:[#allocation2] sm:$0x3] (!%p515_p7), %vm259_vm0, %v638_v0  ;;  %261 = vst.msk [vmem:[#allocation3] sm:$0x3] (!%p515_p7), %vm259_vm0, %v638_v0 }
  0x13   : > { %s509_s27 = sshll.u32 %s224_s26, 1  ;;  %258 = sbr.rel (%p515_p7) target bundleno = 26 (0x1a), region = 32 }
  0x14   : > { %s226_s30 = scalar_lea.vmem %s721_s0, %s509_s27  ;;  %s702_s5 = scalar_lea.vmem %s723_s2, %s509_s27 }
  0x1a PF: > { %v264_v1 = vld [vmem:[%s236_s25] sm:$0xff]  ;;  %v265_v2 = vld [vmem:[%s236_s25 + $0x8] sm:$0xff]  ;;  %v266_v3 = vld [vmem:[%s236_s25 + $0x10] sm:$0xff]  ;;  %v639_v4 = vmov 0.0|0.0   ;;  %vm640_vm1 = vmmov 0   ;;  %v641_v7 = vmov 0.0  }
  0x1b   : > { %537 = vmatprep.subr.bf16.mxu0 %v639_v4  ;;  %v538_v5 = vpack.c.bf16 %v265_v2, %v264_v1  ;;  %v267_v6 = vld [vmem:[%s236_s25 + $0x18] sm:$0xff]  ;;  %534 = vmatprep.mubr.msk.f32.mxu0 %vm640_vm1, %v641_v7  ;;  %v262_v9 = vld [vmem:[#allocation2] sm:$0x3]  ;;  %vm268_vm2 = vcmask 261120   ;;  %s642_s6 = smov 64   ;;  %s643_s7 = smov 32  }
  0x1c   : > { %v541_v8 = vpack.c.bf16 %v267_v6, %v266_v3  ;;  %v263_v10 = vld [vmem:[%s226_s30] sm:$0x3]  ;;  %v350_v15 = vld [vmem:[#allocation3] sm:$0x3]  ;;  %s644_s8 = smov 96   ;;  %vm376_vm3 = vcmask 254976  }
  0x1d   : > { %539 = vmatpush3.bf16.msra.mxu0 %v538_v5 }
  0x1e   : > { %540 = vmatprep.subr.bf16.mxu0 %v639_v4 }
  0x21   : > { %542 = vmatpush3.bf16.msra.mxu0 %v541_v8 }
  0x24   : > { %535 = vmatmul.mubr.msk.f32.vlgmr.msra.gmra.mrb[0].mxu0 %vm268_vm2, %v262_v9 }
  0xf7   : > { %v338_v11 = vpop.f32.mrb[0].mxu0 }
  0xf8   : > { %v342_v12 = vadd.f32 %v338_v11, %v263_v10  ;;  %v536_v13 = vpop.f32.mrb[1].mxu0 }
  0xfa   : > { %590 = vtanh.f32 %v342_v12  ;;  %v517_v16 = vmul.f32 -1.442695, %v342_v12 }
  0xfc   : > { %592 = vpow2.f32 %v517_v16 }
 0x104   : > { %v591_v14 = vpop.eup %590 }
 0x105   : > { %357 = vrot.lane.b32.xlu0 %v591_v14, %s642_s6 }
 0x106   : > { %v593_v17 = vpop.eup %592 }
 0x107   : > { %v346_v18 = vadd.f32 1.0, %v593_v17 }
 0x109   : > { %352 = vrot.lane.b32.xlu0 %v350_v15, %s643_s7  ;;  %594 = vrcp.f32 %v346_v18 }
 0x113   : > { %v595_v19 = vpop.eup %594 }
 0x177   : > { %v358_v20 = vpop.permute.xlu0 %357 }
 0x178   : > { %v360_v21 = vmul.f32 %v595_v19, %v358_v20 }
 0x17a   : > { %362 = vrot.lane.b32.xlu1 %v360_v21, %s643_s7 }
 0x17b   : > { %v353_v22 = vpop.permute.xlu0 %352 }
 0x17c   : > { %v355_v23 = vmul.f32 %v595_v19, %v353_v22 }
 0x1ec   : > { %v363_v24 = vpop.permute.xlu1 %362 }
 0x1ed   : > { %v365_v25 = vadd.f32 %v363_v24, %v355_v23 }
 0x1ef   : > { %596 = vtanh.f32 %v365_v25  ;;  %373 = vrot.lane.b32.xlu0 %v365_v25, %s644_s8 }
 0x1f9   : > { %v597_v26 = vpop.eup %596 }
 0x1fa   : > { %368 = vrot.lane.b32.xlu1 %v597_v26, %s642_s6 }
 0x261   : > { %v374_v27 = vpop.permute.xlu0 %373 }
 0x262   : > { %377 = vst.msk [vmem:[#allocation3] sm:$0x3] %vm376_vm3, %v374_v27 }
 0x26c   : > { %v369_v28 = vpop.permute.xlu1 %368 }
 0x26d   : > { %v371_v29 = vmul.f32 %v595_v19, %v369_v28 }
 0x26f   : > { %379 = vrot.lane.b32.xlu1 %v371_v29, %s643_s7 }
 0x2e1   : > { %v380_v30 = vpop.permute.xlu1 %379 }
 0x2e2   : > { %382 = vst.msk [vmem:[#allocation2] sm:$0x3] %vm376_vm3, %v380_v30  ;;  %383 = vst.msk [vmem:[%s702_s5] sm:$0x3] %vm376_vm3, %v380_v30 }
 0x2e3 PF: > { %s12_s13 = sadd.s32 1, %s636_s13   ;;  %s724_s9 = smov %s628_s11 }
 0x2e4   : > { %p9_p8 = scmp.ge.s32.totalorder %s12_s13, 18   ;;  %s725_s10 = smov %s632_s12 }
 0x2e5   : > { %s726_s11 = smov %s729_s14  ;;  %s727_s12 = smov %s733_s15 }
 0x2e6   :  { %11 = sbr.rel (!%p9_p8) target bundleno = 3 (0x3), region = 65 }

// kernel: visual_encoder_forward.14
= control target key start
LH: loop header
LB: loop body
LE: loop exit
PB: predicated region body
PF: predicated region fallthrough
CT: control target
= control target key end

     0   :  { %v192_v1 = vmov 0   ;;  %vm82_vm0 = vcmask 523264   ;;  %v146_v10 = vlaneseq  ;;  %s255_s1 = inlined_call_operand.vmem [shape: bf16[64,256], index: 1, kind: input, shape index: {}]   ;;  %s256_s0 = inlined_call_operand.vmem [shape: bf16[16,64], index: 0, kind: input, shape index: {}]   ;;  %s257_s2 = inlined_call_operand.vmem [shape: f32[1,256], index: 2, kind: input, shape index: {}]   ;;  %s258_s3 = inlined_call_operand.vmem [shape: f32[16,256], index: 3, kind: output, shape index: {}]  }
   0x1   :  { %v179_v0 = vld [vmem:[%s255_s1 + $0x4] ss:$8 sps:$4 sm:$0xff]   ;;  %118 = vmatprep.mubr.bf16.mxu0 %v192_v1  ;;  %v181_v2 = vld [vmem:[%s255_s1] ss:$8 sps:$4 sm:$0xff]   ;;  %v182_v3 = vld [vmem:[%s255_s1 + $0x14] ss:$8 sps:$4 sm:$0xff]  }
   0x2   :  { %86 = vmatprep.subr.bf16.mxu0 %v179_v0  ;;  %v184_v4 = vld [vmem:[%s255_s1 + $0x10] ss:$8 sps:$4 sm:$0xff]   ;;  %v185_v5 = vld [vmem:[%s255_s1 + $0x24] ss:$8 sps:$4 sm:$0xff]   ;;  %v187_v6 = vld [vmem:[%s255_s1 + $0x20] ss:$8 sps:$4 sm:$0xff]  }
   0x3   :  { %87 = vmatpush1.bf16.msra.mxu0 %v181_v2  ;;  %v188_v7 = vld [vmem:[%s255_s1 + $0x34] ss:$8 sps:$4 sm:$0xff]   ;;  %v190_v8 = vld [vmem:[%s255_s1 + $0x30] ss:$8 sps:$4 sm:$0xff]   ;;  %v191_v9 = vld [vmem:[%s256_s0] sm:$0xff]   ;;  %v147_v11 = vshrl.u32 %v146_v10, 7 }
   0x4   :  { %88 = vmatprep.subr.bf16.mxu0 %v182_v3  ;;  %v144_v13 = vld [vmem:[%s257_s2] sm:$0x3] }
   0x5   :  { %v148_v12 = vsub.s32 0, %v147_v11  ;;  %v152_v14 = vsub.s32 1, %v147_v11 }
   0x7   :  { %89 = vmatpush1.bf16.msra.mxu0 %v184_v4  ;;  %v149_v15 = vrot.slane %v144_v13, %v148_v12  ;;  %v153_v16 = vrot.slane %v144_v13, %v152_v14 }
   0x8   :  { %90 = vmatprep.subr.bf16.mxu0 %v185_v5 }
   0xb   :  { %91 = vmatpush1.bf16.msra.mxu0 %v187_v6 }
   0xc   :  { %92 = vmatprep.subr.bf16.mxu0 %v188_v7 }
   0xf   :  { %93 = vmatpush1.bf16.msra.mxu0 %v190_v8 }
  0x12   :  { %177 = vmatmul.mubr.msk.bf16.vlgmr.msra.gmra.mrb[0].mxu0 %vm82_vm0, %v191_v9 }
  0xe5   :  { %v120_v17 = vpop.f32.mrb[0].mxu0 }
  0xe6   :  { %v156_v18 = vadd.f32 %v149_v15, %v120_v17  ;;  %v122_v19 = vpop.f32.mrb[1].mxu0 }
  0xe7   :  { %v157_v20 = vadd.f32 %v153_v16, %v122_v19  ;;  %v124_v21 = vpop.f32.mrb[2].mxu0 }
  0xe8   :  { %160 = vst [vmem:[%s258_s3] sm:$0xff] %v156_v18  ;;  %v158_v22 = vadd.f32 %v149_v15, %v124_v21  ;;  %v126_v23 = vpop.f32.mrb[3].mxu0 }
  0xe9   :  { %161 = vst [vmem:[%s258_s3 + $0x8] sm:$0xff] %v157_v20  ;;  %v159_v24 = vadd.f32 %v153_v16, %v126_v23 }
  0xea   :  { %162 = vst [vmem:[%s258_s3 + $0x10] sm:$0xff] %v158_v22 }
  0xeb   :  { %163 = vst [vmem:[%s258_s3 + $0x18] sm:$0xff] %v159_v24 }

// kernel: visual_encoder_forward.16
= control target key start
LH: loop header
LB: loop body
LE: loop exit
PB: predicated region body
PF: predicated region fallthrough
CT: control target
= control target key end

     0   :  { %vm19_vm0 = vcmask 261120   ;;  %v164_v0 = vmov 0.0   ;;  %vm165_vm1 = vmmov 0   ;;  %vm63_vm2 = vcmask 523264   ;;  %s216_s1 = inlined_call_operand.vmem [shape: bf16[64,32], index: 1, kind: input, shape index: {}]   ;;  %s217_s0 = inlined_call_operand.vmem [shape: bf16[16,64], index: 0, kind: input, shape index: {}]   ;;  %s218_s2 = inlined_call_operand.vmem [shape: f32[1,32], index: 2, kind: input, shape index: {}]   ;;  %s219_s3 = inlined_call_operand.vmem [shape: f32[16,32], index: 3, kind: output, shape index: {}]  }
   0x1   :  { %145 = vmatprep.subr.bf16.mxu0 %v164_v0  ;;  %v159_v1 = vld [vmem:[%s216_s1] sm:$0xff]   ;;  %153 = vmatprep.mubr.msk.bf16.mxu0 %vm165_vm1, %v164_v0  ;;  %20 = vst.msk [vmem:[#allocation2] sm:$0xff] %vm19_vm0, %v164_v0  ;;  %21 = vst.msk [vmem:[#allocation2 + $0x8] sm:$0xff] %vm19_vm0, %v164_v0  ;;  %v160_v2 = vld [vmem:[%s216_s1 + $0x8] sm:$0xff]  }
   0x2   :  { %146 = vmatpush3.bf16.msra.mxu0 %v159_v1  ;;  %v161_v3 = vld [vmem:[%s216_s1 + $0x10] sm:$0xff]   ;;  %v162_v4 = vld [vmem:[%s216_s1 + $0x18] sm:$0xff]   ;;  %v163_v5 = vld [vmem:[%s217_s0] sm:$0xff]  }
   0x3   :  { %147 = vmatprep.subr.bf16.mxu0 %v164_v0  ;;  %v139_v14 = vld [vmem:[%s218_s2] ss:$0 sm:$0xff] }
   0x6   :  { %148 = vmatpush3.bf16.msra.mxu0 %v160_v2 }
   0x7   :  { %149 = vmatprep.subr.bf16.mxu0 %v164_v0 }
   0x8   :  { %v22_v6 = vld [vmem:[#allocation2] sm:$0xff]  ;;  %v23_v8 = vld [vmem:[#allocation2 + $0x8] sm:$0xff] }
   0xa   :  { %150 = vmatpush3.bf16.msra.mxu0 %v161_v3 }
   0xb   :  { %151 = vmatprep.subr.bf16.mxu0 %v164_v0 }
   0xe   :  { %152 = vmatpush3.bf16.msra.mxu0 %v162_v4 }
  0x11   :  { %154 = vmatmul.mubr.msk.bf16.vlgmr.msra.gmra.mrb[0].mxu0 %vm63_vm2, %v163_v5 }
  0xe4   :  { %v101_v7 = vpop.f32.mrb[0].mxu0 }
  0xe5   :  { %v108_v9 = vadd.f32 %v101_v7, %v22_v6  ;;  %v155_v10 = vpop.f32.mrb[1].mxu0 }
  0xe6   :  { %v104_v11 = vpop.f32.mrb[2].mxu0 }
  0xe7   :  { %111 = vst.msk [vmem:[#allocation2] sm:$0xff] %vm19_vm0, %v108_v9  ;;  %v109_v12 = vadd.f32 %v104_v11, %v23_v8  ;;  %v156_v13 = vpop.f32.mrb[3].mxu0 }
  0xe9   :  { %112 = vst.msk [vmem:[#allocation2 + $0x8] sm:$0xff] %vm19_vm0, %v109_v12 }
  0xee   :  { %v116_v15 = vld [vmem:[#allocation2] sm:$0xff] }
  0xef   :  { %v125_v16 = vadd.f32 %v139_v14, %v116_v15 }
  0xf0   :  { %v117_v17 = vld [vmem:[#allocation2 + $0x8] sm:$0xff] }
  0xf1   :  { %127 = vst.msk [vmem:[%s219_s3] sm:$0xff] %vm19_vm0, %v125_v16  ;;  %v126_v18 = vadd.f32 %v139_v14, %v117_v17 }
  0xf3   :  { %128 = vst.msk [vmem:[%s219_s3 + $0x8] sm:$0xff] %vm19_vm0, %v126_v18 }

// kernel: visual_encoder_forward.17
= control target key start
LH: loop header
LB: loop body
LE: loop exit
PB: predicated region body
PF: predicated region fallthrough
CT: control target
= control target key end

     0   :  { %v158_v1 = vmov 0   ;;  %vm58_vm0 = vcmask 261120   ;;  %v122_v6 = vlaneseq  ;;  %s209_s1 = inlined_call_operand.vmem [shape: bf16[32,256], index: 1, kind: input, shape index: {}]   ;;  %s210_s0 = inlined_call_operand.vmem [shape: bf16[16,32], index: 0, kind: input, shape index: {}]   ;;  %s211_s2 = inlined_call_operand.vmem [shape: f32[1,256], index: 2, kind: input, shape index: {}]   ;;  %s212_s3 = inlined_call_operand.vmem [shape: f32[16,256], index: 3, kind: output, shape index: {}]  }
   0x1   :  { %v151_v0 = vld [vmem:[%s209_s1 + $0x4] ss:$8 sps:$4 sm:$0xff]   ;;  %94 = vmatprep.mubr.bf16.mxu0 %v158_v1  ;;  %v153_v2 = vld [vmem:[%s209_s1] ss:$8 sps:$4 sm:$0xff]   ;;  %v154_v3 = vld [vmem:[%s209_s1 + $0x14] ss:$8 sps:$4 sm:$0xff]  }
   0x2   :  { %62 = vmatprep.subr.bf16.mxu0 %v151_v0  ;;  %v156_v4 = vld [vmem:[%s209_s1 + $0x10] ss:$8 sps:$4 sm:$0xff]   ;;  %v157_v5 = vld [vmem:[%s210_s0] sm:$0xff]   ;;  %v123_v7 = vshrl.u32 %v122_v6, 7 }
   0x3   :  { %63 = vmatpush1.bf16.msra.mxu0 %v153_v2  ;;  %v120_v9 = vld [vmem:[%s211_s2] sm:$0x3] }
   0x4   :  { %64 = vmatprep.subr.bf16.mxu0 %v154_v3  ;;  %v124_v8 = vsub.s32 0, %v123_v7  ;;  %v128_v10 = vsub.s32 1, %v123_v7 }
   0x6   :  { %v125_v11 = vrot.slane %v120_v9, %v124_v8  ;;  %v129_v12 = vrot.slane %v120_v9, %v128_v10 }
   0x7   :  { %65 = vmatpush1.bf16.msra.mxu0 %v156_v4 }
   0xa   :  { %149 = vmatmul.mubr.msk.bf16.vlgmr.msra.gmra.mrb[0].mxu0 %vm58_vm0, %v157_v5 }
  0xdd   :  { %v96_v13 = vpop.f32.mrb[0].mxu0 }
  0xde   :  { %v132_v14 = vadd.f32 %v125_v11, %v96_v13  ;;  %v98_v15 = vpop.f32.mrb[1].mxu0 }
  0xdf   :  { %v133_v16 = vadd.f32 %v129_v12, %v98_v15  ;;  %v100_v17 = vpop.f32.mrb[2].mxu0 }
  0xe0   :  { %136 = vst [vmem:[%s212_s3] sm:$0xff] %v132_v14  ;;  %v134_v18 = vadd.f32 %v125_v11, %v100_v17  ;;  %v102_v19 = vpop.f32.mrb[3].mxu0 }
  0xe1   :  { %137 = vst [vmem:[%s212_s3 + $0x8] sm:$0xff] %v133_v16  ;;  %v135_v20 = vadd.f32 %v129_v12, %v102_v19 }
  0xe2   :  { %138 = vst [vmem:[%s212_s3 + $0x10] sm:$0xff] %v134_v18 }
  0xe3   :  { %139 = vst [vmem:[%s212_s3 + $0x18] sm:$0xff] %v135_v20 }

// kernel: visual_encoder_forward.19
= control target key start
LH: loop header
LB: loop body
LE: loop exit
PB: predicated region body
PF: predicated region fallthrough
CT: control target
= control target key end

     0   :  { %v204_v1 = vmov 0.0   ;;  %vm205_vm0 = vmmov 0   ;;  %vm20_vm1 = vcmask 261120   ;;  %s265_s0 = inlined_call_operand.vmem [shape: bf16[16,64], index: 0, kind: input, shape index: {}]   ;;  %s266_s1 = inlined_call_operand.vmem [shape: bf16[64,32], index: 1, kind: input, shape index: {}]   ;;  %s267_s2 = inlined_call_operand.vmem [shape: f32[1,32], index: 2, kind: input, shape index: {}]   ;;  %s268_s3 = inlined_call_operand.hbm [shape: f32[16,32], index: 3, kind: output, shape index: {}]  }
   0x1   :  { %v175_v0 = vld [vmem:[%s266_s1] sm:$0xff]   ;;  %158 = vmatprep.subr.bf16.mxu0 %v204_v1  ;;  %v176_v2 = vld [vmem:[%s266_s1 + $0x8] sm:$0xff]   ;;  %166 = vmatprep.mubr.msk.bf16.mxu0 %vm205_vm0, %v204_v1  ;;  %21 = vst.msk [vmem:[#allocation2] sm:$0xff] %vm20_vm1, %v204_v1  ;;  %22 = vst.msk [vmem:[#allocation2 + $0x8] sm:$0xff] %vm20_vm1, %v204_v1 }
   0x2   :  { %159 = vmatpush3.bf16.msra.mxu0 %v175_v0 }
   0x3   :  { %160 = vmatprep.subr.bf16.mxu0 %v204_v1 }
   0x4   :  { %8 = vsyncpa [#allocation4], 0  ;;  %v177_v3 = vld [vmem:[%s266_s1 + $0x10] sm:$0xff]   ;;  %v178_v4 = vld [vmem:[%s266_s1 + $0x18] sm:$0xff]   ;;  %vm64_vm2 = vcmask 523264  }
   0x5   :  { %v179_v5 = vld [vmem:[%s265_s0] sm:$0xff]   ;;  %s206_s0 = smov [#allocation3]  }
   0x6   :  { %161 = vmatpush3.bf16.msra.mxu0 %v176_v2  ;;  %v152_v14 = vld [vmem:[%s267_s2] ss:$0 sm:$0xff]  ;;  %s135_s23 = sshll.u32 %s206_s0, 4  ;;  %s136_s23 = int_to_ptr.vmem [resolvable:$true] %s135_s23 }
   0x7   :  { %162 = vmatprep.subr.bf16.mxu0 %v204_v1  ;;  %s180_s24 = scalar_lea.vmem %s136_s23, 256  ;;  %p185_p1 = scmp.lt.s32.totalorder %s136_s23, %s136_s23 }
   0x8   :  { %v23_v6 = vld [vmem:[#allocation2] sm:$0xff]  ;;  %v24_v8 = vld [vmem:[#allocation2 + $0x8] sm:$0xff]  ;;  %p181_p0 = scmp.ne.s32.totalorder %s136_s23, %s180_s24  ;;  %p186_p2 = scmp.lt.s32.totalorder %s180_s24, %s180_s24 }
   0xa   :  { %163 = vmatpush3.bf16.msra.mxu0 %v177_v3  ;;  %p187_p3 = por %p186_p2, %p185_p1 }
   0xb   :  { %164 = vmatprep.subr.bf16.mxu0 %v204_v1 }
   0xc   :  { %p188_p4 = pnand %p187_p3, %p181_p0 }
   0xe   :  { %165 = vmatpush3.bf16.msra.mxu0 %v178_v4 }
  0x11   :  { %167 = vmatmul.mubr.msk.bf16.vlgmr.msra.gmra.mrb[0].mxu0 %vm64_vm2, %v179_v5 }
  0xe4   :  { %v102_v7 = vpop.f32.mrb[0].mxu0 }
  0xe5   :  { %v109_v9 = vadd.f32 %v102_v7, %v23_v6  ;;  %v168_v10 = vpop.f32.mrb[1].mxu0 }
  0xe6   :  { %v105_v11 = vpop.f32.mrb[2].mxu0 }
  0xe7   :  { %112 = vst.msk [vmem:[#allocation2] sm:$0xff] %vm20_vm1, %v109_v9  ;;  %v110_v12 = vadd.f32 %v105_v11, %v24_v8  ;;  %v169_v13 = vpop.f32.mrb[3].mxu0 }
  0xe9   :  { %113 = vst.msk [vmem:[#allocation2 + $0x8] sm:$0xff] %vm20_vm1, %v110_v12 }
  0xee   :  { %v117_v15 = vld [vmem:[#allocation2] sm:$0xff] }
  0xef   :  { %v126_v16 = vadd.f32 %v152_v14, %v117_v15 }
  0xf0   :  { %v118_v17 = vld [vmem:[#allocation2 + $0x8] sm:$0xff] }
  0xf1   :  { %v127_v18 = vadd.f32 %v152_v14, %v118_v17  ;;  %128 = vst.msk [vmem:[#allocation3] sm:$0xff] %vm20_vm1, %v126_v16 }
  0xf3   :  { %129 = vst.msk [vmem:[#allocation3 + $0x8] sm:$0xff] %vm20_vm1, %v127_v18 }
  0xf4   :  { %191 = shalt.err (!%p188_p4)
}
  0xf5   :  { %s192_s26 = scalar_lea.hbm %s268_s3, 256 }
  0xf6   :  { %p193_p5 = scmp.ne.s32.totalorder %s268_s3, %s192_s26  ;;  %p196_p6 = scmp.lt.u32.totalorder %s192_s26, %s268_s3 }
  0xf8   :  { %p198_p7 = pnand %p196_p6, %p193_p5 }
  0xfa   :  { %201 = shalt.err (!%p198_p7)
}
  0xfb   :  { %s207_s4 = smov 128   ;;  %s208_s5 = smov 8  }
  0xfc   :  { %141 = dma.vmem_to_hbm [thread:$0]  %s136_s23, 256, %s268_s3, [#allocation4], %s207_s4, %s207_s4, %s208_s5  }
  0xfd   :  { %202 = dma.done.wait [#allocation4], 256  }
  0xfe   :  { %203 = vsyncadd [#allocation4], 4294967040 }
  0xff   :  { %145 = vsyncpa [#allocation4], 1 }

</bundles_post_ra>
